<compile_context>
chip_gen: v7x
topology: tpu7x:2x2x1
jax: 0.10.0
libtpu: 0.0.40
codegen_flags: <defaults>
</compile_context>

<pallas_src>
import functools

import jax
import jax.numpy as jnp
from jax import lax
from jax.experimental import pallas as pl
from jax.experimental.pallas import tpu as pltpu


# ---------------------------------------------------------------------------
# Kernel
# ---------------------------------------------------------------------------
def _inception_resnet_c_half_kernel(
    x_ref,                     # (1, HW + 2*W, Cpad)  f32  (padded image)
    w01_ref, b01_ref,          # fused 1x1 convs: (Cpad, 256) bf16, (1, 256) f32
    w13_ref, b13_ref,          # 1x3 conv: (3, 128, 128) bf16, (1, 128) f32
    w31_ref, b31_ref,          # 3x1 conv: (3, 128, 128) bf16, (1, 128) f32
    wf_ref, bf_ref,            # final 1x1 (scale folded): (256, Cpad) bf16, (1, Cpad) f32
    o_ref,                     # (1, tile_hw, Cpad) f32
    *, img_w: int, img_hw: int, tile_hw: int, ext_hw: int, activation: bool):
  t = pl.program_id(1)
  start = pl.multiple_of(t * tile_hw, tile_hw)

  # tile of rows + one image-row halo above and below (for the 3x1 conv)
  x_ext = x_ref[0, pl.ds(start, ext_hw), :]                 # (ext_hw, Cpad) f32

  def mm(a, wv):
    return jnp.dot(a.astype(jnp.bfloat16), wv,
                   preferred_element_type=jnp.float32)

  # ---- fused branch_0 + branch_1[0] 1x1 convs (+folded BN) + ReLU ----------
  h01 = jnp.maximum(mm(x_ext, w01_ref[...]) + b01_ref[...], 0.0)  # (ext_hw,256)
  b0_ext = h01[:, :128]                                           # branch_0
  a_ext = h01[:, 128:]                                            # branch_1 a

  # row iota and column-within-image position (tile_hw and halo are multiples
  # of img_w, so local index mod img_w == true column)
  r = lax.broadcasted_iota(jnp.int32, (ext_hw, 1), 0)
  wpos = r % img_w

  # ---- branch_1[1]: 1x3 conv, padding (0,1) (+BN) + ReLU -------------------
  acc = mm(a_ext, w13_ref[1])                          # center tap
  left = pltpu.roll(a_ext, 1, axis=0)                  # left[p] = a[p-1]
  left = jnp.where(wpos == 0, 0.0, left)               # zero-pad at w == 0
  acc = acc + mm(left, w13_ref[0])
  right = pltpu.roll(a_ext, ext_hw - 1, axis=0)        # right[p] = a[p+1]
  right = jnp.where(wpos == img_w - 1, 0.0, right)     # zero-pad at w == W-1
  acc = acc + mm(right, w13_ref[2])
  b_ext = jnp.maximum(acc + b13_ref[...], 0.0)         # (ext_hw, 128)

  # zero halo rows that fall outside the image -> the 3x1 conv's zero padding
  g = r + t * tile_hw                                  # padded-global flat row
  in_img = jnp.logical_and(g >= img_w, g < img_w + img_hw)
  b_ext = jnp.where(in_img, b_ext, 0.0)

  # ---- branch_1[2]: 3x1 conv, padding (1,0) (+BN) + ReLU -------------------
  acc = mm(b_ext[0:tile_hw], w31_ref[0])                               # h - 1
  acc = acc + mm(b_ext[img_w:img_w + tile_hw], w31_ref[1])             # h
  acc = acc + mm(b_ext[2 * img_w:2 * img_w + tile_hw], w31_ref[2])     # h + 1
  c = jnp.maximum(acc + b31_ref[...], 0.0)             # (tile_hw, 128)

  # ---- final 1x1 conv (scale pre-folded) over concat + residual ------------
  b0 = b0_ext[img_w:img_w + tile_hw]
  cat = jnp.concatenate([b0, c], axis=1)               # (tile_hw, 256) aligned
  res = mm(cat, wf_ref[...]) + bf_ref[...]             # (tile_hw, Cpad)

  x_int = x_ext[img_w:img_w + tile_hw, :]
  y = x_int + res
  if activation:
    y = jnp.maximum(y, 0.0)
  o_ref[0] = y.astype(o_ref.dtype)


# ---------------------------------------------------------------------------
# Parameters (synthetic, BN folded) and packing for the kernel
# ---------------------------------------------------------------------------
def init_params(key, cin):
  """Deterministic synthetic parameters; BN folded into conv weights (f32)."""
  ks = iter(jax.random.split(key, 24))
  eps = 1e-3

  def conv_w(shape, fan_in):
    return jax.random.normal(next(ks), shape, jnp.float32) / jnp.sqrt(fan_in)

  def fold_bn(wmat, cout):
    gamma = 1.0 + 0.1 * jax.random.normal(next(ks), (cout,), jnp.float32)
    beta = 0.1 * jax.random.normal(next(ks), (cout,), jnp.float32)
    mean = 0.1 * jax.random.normal(next(ks), (cout,), jnp.float32)
    var = 0.5 + jax.random.uniform(next(ks), (cout,), jnp.float32)
    s = gamma / jnp.sqrt(var + eps)
    return wmat * s, (beta - mean * s)[None, :]

  w_b0, b_b0 = fold_bn(conv_w((cin, 96), cin), 96)          # branch_0 1x1
  w_b1a, b_b1a = fold_bn(conv_w((cin, 96), cin), 96)        # branch_1[0] 1x1
  w13, b13 = fold_bn(conv_w((3, 96, 112), 96 * 3), 112)     # 1x3 (kw, Cin, Co)
  w31, b31 = fold_bn(conv_w((3, 112, 128), 112 * 3), 128)   # 3x1 (kh, Cin, Co)
  wf = conv_w((224, cin), 224)                              # final 1x1 + bias
  bf = 0.1 * jax.random.normal(next(ks), (1, cin), jnp.float32)
  return dict(w_b0=w_b0, b_b0=b_b0, w_b1a=w_b1a, b_b1a=b_b1a,
              w13=w13, b13=b13, w31=w31, b31=b31, wf=wf, bf=bf)


def _pack_params(p, c_pad, scale):
  """Fuse/zero-pad logical weights into lane-aligned bf16 kernel operands.

  `scale` (residual scaling) is folded into the final-conv weight/bias so the
  kernel's residual path is a plain add.
  """
  cin = p["w_b0"].shape[0]
  w01 = jnp.zeros((c_pad, 256), jnp.float32)
  w01 = w01.at[:cin, 0:96].set(p["w_b0"]).at[:cin, 128:224].set(p["w_b1a"])
  b01 = jnp.zeros((1, 256), jnp.float32)
  b01 = b01.at[:, 0:96].set(p["b_b0"]).at[:, 128:224].set(p["b_b1a"])
  w13 = jnp.zeros((3, 128, 128), jnp.float32).at[:, :96, :112].set(p["w13"])
  b13 = jnp.zeros((1, 128), jnp.float32).at[:, :112].set(p["b13"])
  w31 = jnp.zeros((3, 128, 128), jnp.float32).at[:, :112, :].set(p["w31"])
  b31 = p["b31"]
  wf = jnp.zeros((256, c_pad), jnp.float32)
  wf = wf.at[0:96, :cin].set(p["wf"][:96]).at[128:256, :cin].set(p["wf"][96:])
  wf = wf * scale                                   # fold residual scale
  bf = jnp.zeros((1, c_pad), jnp.float32).at[:, :cin].set(p["bf"]) * scale
  return dict(w01=w01.astype(jnp.bfloat16), b01=b01,
              w13=w13.astype(jnp.bfloat16), b13=b13,
              w31=w31.astype(jnp.bfloat16), b31=b31,
              wf=wf.astype(jnp.bfloat16), bf=bf)


# ---------------------------------------------------------------------------
# Wrapper
# ---------------------------------------------------------------------------
def _pick_tile_rows(h, w, max_tile_hw=512):
  """Largest divisor of h whose flat tile is 8-aligned and fits the budget."""
  best = h  # fallback: whole image per grid step
  found = False
  for rows in range(1, h + 1):
    if rows * w > max_tile_hw:
      break
    if h % rows == 0 and (rows * w) % 8 == 0:
      best, found = rows, True
  return best if found else h


def inception_resnet_c_half(x_nchw, params, *, scale=1.0, activation=True):
  n, c, h, w = x_nchw.shape
  hw = h * w
  c_pad = ((c + 127) // 128) * 128            # lane-dense channel dim
  tile_rows = _pick_tile_rows(h, w)
  tile_hw = tile_rows * w
  n_tiles = hw // tile_hw
  ext_hw = tile_hw + 2 * w                    # tile + 1-row halo each side

  packed = _pack_params(params, c_pad, float(scale))

  # NCHW -> channels-last flat spatial, pad channels to c_pad, and pad one
  # zero image-row above/below (halo source rows for the tiled 3x1 conv).
  x = jnp.transpose(x_nchw, (0, 2, 3, 1)).reshape(n, hw, c).astype(jnp.float32)
  x = jnp.pad(x, ((0, 0), (w, w), (0, c_pad - c)))

  kern = functools.partial(
      _inception_resnet_c_half_kernel,
      img_w=w, img_hw=hw, tile_hw=tile_hw, ext_hw=ext_hw,
      activation=bool(activation))

  order = ("w01", "b01", "w13", "b13", "w31", "b31", "wf", "bf")
  weights = [packed[k] for k in order]

  def w_spec(arr):
    nd = arr.ndim
    return pl.BlockSpec(arr.shape, lambda b, t, _nd=nd: (0,) * _nd)

  out = pl.pallas_call(
      kern,
      out_shape=jax.ShapeDtypeStruct((n, hw, c_pad), jnp.float32),
      grid=(n, n_tiles),
      in_specs=[pl.BlockSpec((1, hw + 2 * w, c_pad), lambda b, t: (b, 0, 0))]
               + [w_spec(a) for a in weights],
      out_specs=pl.BlockSpec((1, tile_hw, c_pad), lambda b, t: (b, t, 0)),
      compiler_params=pltpu.CompilerParams(
          dimension_semantics=("parallel", "parallel")),
  )(x, *weights)

  out = out[:, :, :c].reshape(n, h, w, c)
  return jnp.transpose(out, (0, 3, 1, 2))


# ---------------------------------------------------------------------------
# Pure-JAX reference (f32) of the module with the same folded weights
# ---------------------------------------------------------------------------
def reference_forward(x_nchw, p, *, scale=1.0, activation=True):
  n, c, h, w = x_nchw.shape
  x = jnp.transpose(x_nchw, (0, 2, 3, 1)).astype(jnp.float32)   # NHWC
  relu = lambda v: jnp.maximum(v, 0.0)
  b0 = relu(x @ p["w_b0"] + p["b_b0"][0])
  a = relu(x @ p["w_b1a"] + p["b_b1a"][0])
  ap = jnp.pad(a, ((0, 0), (0, 0), (1, 1), (0, 0)))
  b = relu(ap[:, :, 0:w] @ p["w13"][0] + ap[:, :, 1:w + 1] @ p["w13"][1]
           + ap[:, :, 2:w + 2] @ p["w13"][2] + p["b13"][0])
  bp = jnp.pad(b, ((0, 0), (1, 1), (0, 0), (0, 0)))
  cc = relu(bp[:, 0:h] @ p["w31"][0] + bp[:, 1:h + 1] @ p["w31"][1]
            + bp[:, 2:h + 2] @ p["w31"][2] + p["b31"][0])
  cat = jnp.concatenate([b0, cc], axis=-1)
  res = cat @ p["wf"] + p["bf"][0]
  y = x + scale * res
  if activation:
    y = relu(y)
  return jnp.transpose(y, (0, 3, 1, 2))


if __name__ == "__main__":
  key = jax.random.PRNGKey(0)
  kx, kp = jax.random.split(key)
  N, C, H, W = 2, 4, 16, 16                  # in_channels = 4
  x = jax.random.normal(kx, (N, C, H, W), jnp.float32)
  params = init_params(kp, C)

  y = inception_resnet_c_half(x, params, scale=0.2, activation=True)
  jax.block_until_ready(y)
  assert y.shape == (N, C, H, W) and y.dtype == jnp.float32

  y_ref = reference_forward(x, params, scale=0.2, activation=True)
  err = float(jnp.max(jnp.abs(y - y_ref)))
  assert err < 7.5e-2, f"max abs error {err}"   # bf16-matmul tolerance
  print("KERNEL_OK")
</pallas_src>

<mosaic_0001>
module attributes {stable_mosaic.version = 11 : i64} {
  func.func @_inception_resnet_c_half_kernel(%arg0: i32, %arg1: i32, %arg2: memref<1x288x128xf32, #tpu.memory_space<vmem>>, %arg3: memref<128x256xbf16, #tpu.memory_space<vmem>>, %arg4: memref<1x256xf32, #tpu.memory_space<vmem>>, %arg5: memref<3x128x128xbf16, #tpu.memory_space<vmem>>, %arg6: memref<1x128xf32, #tpu.memory_space<vmem>>, %arg7: memref<3x128x128xbf16, #tpu.memory_space<vmem>>, %arg8: memref<1x128xf32, #tpu.memory_space<vmem>>, %arg9: memref<256x128xbf16, #tpu.memory_space<vmem>>, %arg10: memref<1x128xf32, #tpu.memory_space<vmem>>, %arg11: memref<1x256x128xf32, #tpu.memory_space<vmem>>) attributes {dimension_semantics = [#tpu.dimension_semantics<parallel>, #tpu.dimension_semantics<parallel>], iteration_bounds = array<i64: 2, 1>, scalar_prefetch = 0 : i64, scratch_operands = 0 : i64, tpu.core_type = #tpu.core_type<tc>, window_params = [{transform_indices = @transform_0, window_bounds = array<i64: 1, 288, 128>}, {pipeline_mode = #tpu.pipeline_mode<synchronous>, transform_indices = @transform_1, window_bounds = array<i64: 128, 256>}, {pipeline_mode = #tpu.pipeline_mode<synchronous>, transform_indices = @transform_2, window_bounds = array<i64: 1, 256>}, {pipeline_mode = #tpu.pipeline_mode<synchronous>, transform_indices = @transform_3, window_bounds = array<i64: 3, 128, 128>}, {pipeline_mode = #tpu.pipeline_mode<synchronous>, transform_indices = @transform_4, window_bounds = array<i64: 1, 128>}, {pipeline_mode = #tpu.pipeline_mode<synchronous>, transform_indices = @transform_5, window_bounds = array<i64: 3, 128, 128>}, {pipeline_mode = #tpu.pipeline_mode<synchronous>, transform_indices = @transform_6, window_bounds = array<i64: 1, 128>}, {pipeline_mode = #tpu.pipeline_mode<synchronous>, transform_indices = @transform_7, window_bounds = array<i64: 256, 128>}, {pipeline_mode = #tpu.pipeline_mode<synchronous>, transform_indices = @transform_8, window_bounds = array<i64: 1, 128>}, {transform_indices = @transform_9, window_bounds = array<i64: 1, 256, 128>}]} {
    %c256_i32 = arith.constant 256 : i32
    %0 = arith.muli %arg1, %c256_i32 : i32
    %1 = tpu.assume_multiple %0, 256 : i32
    %c0 = arith.constant 0 : index
    %2 = arith.index_cast %1 : i32 to index
    %c0_0 = arith.constant 0 : index
    %3 = vector.load %arg2[%c0, %2, %c0_0] : memref<1x288x128xf32, #tpu.memory_space<vmem>>, vector<1x288x128xf32>
    %4 = vector.shape_cast %3 : vector<1x288x128xf32> to vector<288x128xf32>
    %c0_1 = arith.constant 0 : index
    %c0_2 = arith.constant 0 : index
    %5 = vector.load %arg3[%c0_1, %c0_2] : memref<128x256xbf16, #tpu.memory_space<vmem>>, vector<128x256xbf16>
    %6 = arith.truncf %4 : vector<288x128xf32> to vector<288x128xbf16>
    %cst = arith.constant dense<0.000000e+00> : vector<288x256xf32>
    %7 = tpu.matmul %6, %5, %cst {dimension_numbers = #tpu.dot_dimension_numbers<[1], [0], [0], [1], [0, 0, 1, 1], [], []>} : vector<288x128xbf16>, vector<128x256xbf16>, vector<288x256xf32> -> vector<288x256xf32>
    %c0_3 = arith.constant 0 : index
    %c0_4 = arith.constant 0 : index
    %8 = vector.load %arg4[%c0_3, %c0_4] : memref<1x256xf32, #tpu.memory_space<vmem>>, vector<1x256xf32>
    %9 = vector.broadcast %8 : vector<1x256xf32> to vector<288x256xf32>
    %10 = arith.addf %7, %9 : vector<288x256xf32>
    %cst_5 = arith.constant 0.000000e+00 : f32
    %11 = vector.broadcast %cst_5 : f32 to vector<288x256xf32>
    %12 = arith.maximumf %10, %11 : vector<288x256xf32>
    %13 = vector.extract_strided_slice %12 {offsets = [0, 0], sizes = [288, 128], strides = [1, 1]} : vector<288x256xf32> to vector<288x128xf32>
    %14 = vector.extract_strided_slice %12 {offsets = [0, 128], sizes = [288, 128], strides = [1, 1]} : vector<288x256xf32> to vector<288x128xf32>
    %15 = tpu.iota {dimensions = array<i32: 0>} : vector<288x1xi32>
    %c16_i32 = arith.constant 16 : i32
    %c0_i32 = arith.constant 0 : i32
    %16 = arith.cmpi eq, %c16_i32, %c0_i32 : i32
    %c1_i32 = arith.constant 1 : i32
    %17 = arith.select %16, %c1_i32, %c16_i32 : i32
    %18 = vector.broadcast %17 : i32 to vector<288x1xi32>
    %19 = arith.remsi %15, %18 : vector<288x1xi32>
    %c0_i32_6 = arith.constant 0 : i32
    %20 = vector.broadcast %c0_i32_6 : i32 to vector<288x1xi32>
    %21 = arith.cmpi ne, %19, %20 : vector<288x1xi32>
    %c0_i32_7 = arith.constant 0 : i32
    %22 = vector.broadcast %c0_i32_7 : i32 to vector<288x1xi32>
    %23 = arith.cmpi slt, %19, %22 : vector<288x1xi32>
    %c0_i32_8 = arith.constant 0 : i32
    %24 = arith.cmpi slt, %17, %c0_i32_8 : i32
    %25 = vector.broadcast %24 : i1 to vector<288x1xi1>
    %26 = vector.broadcast %25 : vector<288x1xi1> to vector<288x1xi1>
    %27 = arith.xori %23, %26 : vector<288x1xi1>
    %28 = arith.andi %27, %21 : vector<288x1xi1>
    %29 = vector.broadcast %17 : i32 to vector<288x1xi32>
    %30 = arith.addi %19, %29 : vector<288x1xi32>
    %31 = arith.select %28, %30, %19 : vector<288x1xi1>, vector<288x1xi32>
    %c1 = arith.constant 1 : index
    %c0_9 = arith.constant 0 : index
    %c0_10 = arith.constant 0 : index
    %32 = vector.load %arg5[%c1, %c0_9, %c0_10] : memref<3x128x128xbf16, #tpu.memory_space<vmem>>, vector<1x128x128xbf16>
    %33 = vector.shape_cast %32 : vector<1x128x128xbf16> to vector<128x128xbf16>
    %34 = arith.truncf %14 : vector<288x128xf32> to vector<288x128xbf16>
    %cst_11 = arith.constant dense<0.000000e+00> : vector<288x128xf32>
    %35 = tpu.matmul %34, %33, %cst_11 {dimension_numbers = #tpu.dot_dimension_numbers<[1], [0], [0], [1], [0, 0, 1, 1], [], []>} : vector<288x128xbf16>, vector<128x128xbf16>, vector<288x128xf32> -> vector<288x128xf32>
    %c1_i32_12 = arith.constant 1 : i32
    %36 = tpu.dynamic_rotate %14 by %c1_i32_12 dim 0 : vector<288x128xf32>, i32 -> vector<288x128xf32>
    %c0_i32_13 = arith.constant 0 : i32
    %37 = vector.broadcast %c0_i32_13 : i32 to vector<288x1xi32>
    %38 = arith.cmpi eq, %31, %37 : vector<288x1xi32>
    %cst_14 = arith.constant 0.000000e+00 : f32
    %39 = vector.shape_cast %38 : vector<288x1xi1> to vector<288x1xi1>
    %40 = vector.broadcast %39 : vector<288x1xi1> to vector<288x128xi1>
    %41 = vector.broadcast %cst_14 : f32 to vector<288x128xf32>
    %42 = arith.select %40, %41, %36 : vector<288x128xi1>, vector<288x128xf32>
    %c0_15 = arith.constant 0 : index
    %c0_16 = arith.constant 0 : index
    %c0_17 = arith.constant 0 : index
    %43 = vector.load %arg5[%c0_15, %c0_16, %c0_17] : memref<3x128x128xbf16, #tpu.memory_space<vmem>>, vector<1x128x128xbf16>
    %44 = vector.shape_cast %43 : vector<1x128x128xbf16> to vector<128x128xbf16>
    %45 = arith.truncf %42 : vector<288x128xf32> to vector<288x128xbf16>
    %cst_18 = arith.constant dense<0.000000e+00> : vector<288x128xf32>
    %46 = tpu.matmul %45, %44, %cst_18 {dimension_numbers = #tpu.dot_dimension_numbers<[1], [0], [0], [1], [0, 0, 1, 1], [], []>} : vector<288x128xbf16>, vector<128x128xbf16>, vector<288x128xf32> -> vector<288x128xf32>
    %47 = arith.addf %35, %46 : vector<288x128xf32>
    %c287_i32 = arith.constant 287 : i32
    %48 = tpu.dynamic_rotate %14 by %c287_i32 dim 0 : vector<288x128xf32>, i32 -> vector<288x128xf32>
    %c15_i32 = arith.constant 15 : i32
    %49 = vector.broadcast %c15_i32 : i32 to vector<288x1xi32>
    %50 = arith.cmpi eq, %31, %49 : vector<288x1xi32>
    %cst_19 = arith.constant 0.000000e+00 : f32
    %51 = vector.shape_cast %50 : vector<288x1xi1> to vector<288x1xi1>
    %52 = vector.broadcast %51 : vector<288x1xi1> to vector<288x128xi1>
    %53 = vector.broadcast %cst_19 : f32 to vector<288x128xf32>
    %54 = arith.select %52, %53, %48 : vector<288x128xi1>, vector<288x128xf32>
    %c2 = arith.constant 2 : index
    %c0_20 = arith.constant 0 : index
    %c0_21 = arith.constant 0 : index
    %55 = vector.load %arg5[%c2, %c0_20, %c0_21] : memref<3x128x128xbf16, #tpu.memory_space<vmem>>, vector<1x128x128xbf16>
    %56 = vector.shape_cast %55 : vector<1x128x128xbf16> to vector<128x128xbf16>
    %57 = arith.truncf %54 : vector<288x128xf32> to vector<288x128xbf16>
    %cst_22 = arith.constant dense<0.000000e+00> : vector<288x128xf32>
    %58 = tpu.matmul %57, %56, %cst_22 {dimension_numbers = #tpu.dot_dimension_numbers<[1], [0], [0], [1], [0, 0, 1, 1], [], []>} : vector<288x128xbf16>, vector<128x128xbf16>, vector<288x128xf32> -> vector<288x128xf32>
    %59 = arith.addf %47, %58 : vector<288x128xf32>
    %c0_23 = arith.constant 0 : index
    %c0_24 = arith.constant 0 : index
    %60 = vector.load %arg6[%c0_23, %c0_24] : memref<1x128xf32, #tpu.memory_space<vmem>>, vector<1x128xf32>
    %61 = vector.broadcast %60 : vector<1x128xf32> to vector<288x128xf32>
    %62 = arith.addf %59, %61 : vector<288x128xf32>
    %cst_25 = arith.constant 0.000000e+00 : f32
    %63 = vector.broadcast %cst_25 : f32 to vector<288x128xf32>
    %64 = arith.maximumf %62, %63 : vector<288x128xf32>
    %c256_i32_26 = arith.constant 256 : i32
    %65 = arith.muli %arg1, %c256_i32_26 : i32
    %66 = vector.broadcast %65 : i32 to vector<288x1xi32>
    %67 = arith.addi %15, %66 : vector<288x1xi32>
    %c16_i32_27 = arith.constant 16 : i32
    %68 = vector.broadcast %c16_i32_27 : i32 to vector<288x1xi32>
    %69 = arith.cmpi sge, %67, %68 : vector<288x1xi32>
    %c272_i32 = arith.constant 272 : i32
    %70 = vector.broadcast %c272_i32 : i32 to vector<288x1xi32>
    %71 = arith.cmpi slt, %67, %70 : vector<288x1xi32>
    %72 = arith.andi %69, %71 : vector<288x1xi1>
    %cst_28 = arith.constant 0.000000e+00 : f32
    %73 = vector.shape_cast %72 : vector<288x1xi1> to vector<288x1xi1>
    %74 = vector.broadcast %73 : vector<288x1xi1> to vector<288x128xi1>
    %75 = vector.broadcast %cst_28 : f32 to vector<288x128xf32>
    %76 = arith.select %74, %64, %75 : vector<288x128xi1>, vector<288x128xf32>
    %77 = vector.extract_strided_slice %76 {offsets = [0, 0], sizes = [256, 128], strides = [1, 1]} : vector<288x128xf32> to vector<256x128xf32>
    %c0_29 = arith.constant 0 : index
    %c0_30 = arith.constant 0 : index
    %c0_31 = arith.constant 0 : index
    %78 = vector.load %arg7[%c0_29, %c0_30, %c0_31] : memref<3x128x128xbf16, #tpu.memory_space<vmem>>, vector<1x128x128xbf16>
    %79 = vector.shape_cast %78 : vector<1x128x128xbf16> to vector<128x128xbf16>
    %80 = arith.truncf %77 : vector<256x128xf32> to vector<256x128xbf16>
    %cst_32 = arith.constant dense<0.000000e+00> : vector<256x128xf32>
    %81 = tpu.matmul %80, %79, %cst_32 {dimension_numbers = #tpu.dot_dimension_numbers<[1], [0], [0], [1], [0, 0, 1, 1], [], []>} : vector<256x128xbf16>, vector<128x128xbf16>, vector<256x128xf32> -> vector<256x128xf32>
    %82 = vector.extract_strided_slice %76 {offsets = [16, 0], sizes = [256, 128], strides = [1, 1]} : vector<288x128xf32> to vector<256x128xf32>
    %c1_33 = arith.constant 1 : index
    %c0_34 = arith.constant 0 : index
    %c0_35 = arith.constant 0 : index
    %83 = vector.load %arg7[%c1_33, %c0_34, %c0_35] : memref<3x128x128xbf16, #tpu.memory_space<vmem>>, vector<1x128x128xbf16>
    %84 = vector.shape_cast %83 : vector<1x128x128xbf16> to vector<128x128xbf16>
    %85 = arith.truncf %82 : vector<256x128xf32> to vector<256x128xbf16>
    %cst_36 = arith.constant dense<0.000000e+00> : vector<256x128xf32>
    %86 = tpu.matmul %85, %84, %cst_36 {dimension_numbers = #tpu.dot_dimension_numbers<[1], [0], [0], [1], [0, 0, 1, 1], [], []>} : vector<256x128xbf16>, vector<128x128xbf16>, vector<256x128xf32> -> vector<256x128xf32>
    %87 = arith.addf %81, %86 : vector<256x128xf32>
    %88 = vector.extract_strided_slice %76 {offsets = [32, 0], sizes = [256, 128], strides = [1, 1]} : vector<288x128xf32> to vector<256x128xf32>
    %c2_37 = arith.constant 2 : index
    %c0_38 = arith.constant 0 : index
    %c0_39 = arith.constant 0 : index
    %89 = vector.load %arg7[%c2_37, %c0_38, %c0_39] : memref<3x128x128xbf16, #tpu.memory_space<vmem>>, vector<1x128x128xbf16>
    %90 = vector.shape_cast %89 : vector<1x128x128xbf16> to vector<128x128xbf16>
    %91 = arith.truncf %88 : vector<256x128xf32> to vector<256x128xbf16>
    %cst_40 = arith.constant dense<0.000000e+00> : vector<256x128xf32>
    %92 = tpu.matmul %91, %90, %cst_40 {dimension_numbers = #tpu.dot_dimension_numbers<[1], [0], [0], [1], [0, 0, 1, 1], [], []>} : vector<256x128xbf16>, vector<128x128xbf16>, vector<256x128xf32> -> vector<256x128xf32>
    %93 = arith.addf %87, %92 : vector<256x128xf32>
    %c0_41 = arith.constant 0 : index
    %c0_42 = arith.constant 0 : index
    %94 = vector.load %arg8[%c0_41, %c0_42] : memref<1x128xf32, #tpu.memory_space<vmem>>, vector<1x128xf32>
    %95 = vector.broadcast %94 : vector<1x128xf32> to vector<256x128xf32>
    %96 = arith.addf %93, %95 : vector<256x128xf32>
    %cst_43 = arith.constant 0.000000e+00 : f32
    %97 = vector.broadcast %cst_43 : f32 to vector<256x128xf32>
    %98 = arith.maximumf %96, %97 : vector<256x128xf32>
    %99 = vector.extract_strided_slice %13 {offsets = [16, 0], sizes = [256, 128], strides = [1, 1]} : vector<288x128xf32> to vector<256x128xf32>
    %100 = tpu.concatenate %99, %98 in 1 : vector<256x128xf32>, vector<256x128xf32> -> vector<256x256xf32>
    %c0_44 = arith.constant 0 : index
    %c0_45 = arith.constant 0 : index
    %101 = vector.load %arg9[%c0_44, %c0_45] : memref<256x128xbf16, #tpu.memory_space<vmem>>, vector<256x128xbf16>
    %102 = arith.truncf %100 : vector<256x256xf32> to vector<256x256xbf16>
    %cst_46 = arith.constant dense<0.000000e+00> : vector<256x128xf32>
    %103 = tpu.matmul %102, %101, %cst_46 {dimension_numbers = #tpu.dot_dimension_numbers<[1], [0], [0], [1], [0, 0, 1, 1], [], []>} : vector<256x256xbf16>, vector<256x128xbf16>, vector<256x128xf32> -> vector<256x128xf32>
    %c0_47 = arith.constant 0 : index
    %c0_48 = arith.constant 0 : index
    %104 = vector.load %arg10[%c0_47, %c0_48] : memref<1x128xf32, #tpu.memory_space<vmem>>, vector<1x128xf32>
    %105 = vector.broadcast %104 : vector<1x128xf32> to vector<256x128xf32>
    %106 = arith.addf %103, %105 : vector<256x128xf32>
    %107 = vector.extract_strided_slice %4 {offsets = [16, 0], sizes = [256, 128], strides = [1, 1]} : vector<288x128xf32> to vector<256x128xf32>
    %108 = arith.addf %107, %106 : vector<256x128xf32>
    %cst_49 = arith.constant 0.000000e+00 : f32
    %109 = vector.broadcast %cst_49 : f32 to vector<256x128xf32>
    %110 = arith.maximumf %108, %109 : vector<256x128xf32>
    %c0_50 = arith.constant 0 : index
    %c0_51 = arith.constant 0 : index
    %c0_52 = arith.constant 0 : index
    %111 = vector.load %arg11[%c0_50, %c0_51, %c0_52] : memref<1x256x128xf32, #tpu.memory_space<vmem>>, vector<1x256x128xf32>
    %112 = vector.shape_cast %111 : vector<1x256x128xf32> to vector<256x128xf32>
    %113 = vector.shape_cast %110 : vector<256x128xf32> to vector<1x256x128xf32>
    tpu.vector_store %arg11[%c0_50, %c0_51, %c0_52], %113 {strides = array<i32>} : memref<1x256x128xf32, #tpu.memory_space<vmem>>, vector<1x256x128xf32>,
    return
  }
  func.func @transform_0(%arg0: i32, %arg1: i32) -> (i32, i32, i32) {
    %c0_i32 = arith.constant 0 : i32
    %c0_i32_0 = arith.constant 0 : i32
    %c0_i32_1 = arith.constant 0 : i32
    return %arg0, %c0_i32, %c0_i32_0 : i32, i32, i32
  }
  func.func @transform_1(%arg0: i32, %arg1: i32) -> (i32, i32) {
    %c0_i32 = arith.constant 0 : i32
    %c0_i32_0 = arith.constant 0 : i32
    %c0_i32_1 = arith.constant 0 : i32
    return %c0_i32, %c0_i32_0 : i32, i32
  }
  func.func @transform_2(%arg0: i32, %arg1: i32) -> (i32, i32) {
    %c0_i32 = arith.constant 0 : i32
    %c0_i32_0 = arith.constant 0 : i32
    %c0_i32_1 = arith.constant 0 : i32
    return %c0_i32, %c0_i32_0 : i32, i32
  }
  func.func @transform_3(%arg0: i32, %arg1: i32) -> (i32, i32, i32) {
    %c0_i32 = arith.constant 0 : i32
    %c0_i32_0 = arith.constant 0 : i32
    %c0_i32_1 = arith.constant 0 : i32
    %c0_i32_2 = arith.constant 0 : i32
    return %c0_i32, %c0_i32_0, %c0_i32_1 : i32, i32, i32
  }
  func.func @transform_4(%arg0: i32, %arg1: i32) -> (i32, i32) {
    %c0_i32 = arith.constant 0 : i32
    %c0_i32_0 = arith.constant 0 : i32
    %c0_i32_1 = arith.constant 0 : i32
    return %c0_i32, %c0_i32_0 : i32, i32
  }
  func.func @transform_5(%arg0: i32, %arg1: i32) -> (i32, i32, i32) {
    %c0_i32 = arith.constant 0 : i32
    %c0_i32_0 = arith.constant 0 : i32
    %c0_i32_1 = arith.constant 0 : i32
    %c0_i32_2 = arith.constant 0 : i32
    return %c0_i32, %c0_i32_0, %c0_i32_1 : i32, i32, i32
  }
  func.func @transform_6(%arg0: i32, %arg1: i32) -> (i32, i32) {
    %c0_i32 = arith.constant 0 : i32
    %c0_i32_0 = arith.constant 0 : i32
    %c0_i32_1 = arith.constant 0 : i32
    return %c0_i32, %c0_i32_0 : i32, i32
  }
  func.func @transform_7(%arg0: i32, %arg1: i32) -> (i32, i32) {
    %c0_i32 = arith.constant 0 : i32
    %c0_i32_0 = arith.constant 0 : i32
    %c0_i32_1 = arith.constant 0 : i32
    return %c0_i32, %c0_i32_0 : i32, i32
  }
  func.func @transform_8(%arg0: i32, %arg1: i32) -> (i32, i32) {
    %c0_i32 = arith.constant 0 : i32
    %c0_i32_0 = arith.constant 0 : i32
    %c0_i32_1 = arith.constant 0 : i32
    return %c0_i32, %c0_i32_0 : i32, i32
  }
  func.func @transform_9(%arg0: i32, %arg1: i32) -> (i32, i32, i32) {
    %c0_i32 = arith.constant 0 : i32
    %c0_i32_0 = arith.constant 0 : i32
    return %arg0, %arg1, %c0_i32 : i32, i32, i32
  }
}

</mosaic_0001>

<bundles_post_ra>
// kernel: tpu_custom_call.1
= control target key start
LH: loop header
LB: loop body
LE: loop exit
PB: predicated region body
PF: predicated region fallthrough
CT: control target
= control target key end

     0   :  { %s7312_s0 = inlined_call_operand.hbm [shape: f32[2,288,128], index: 0, kind: input, shape index: {}]   ;;  %s7313_s1 = inlined_call_operand.hbm [shape: bf16[128,256], index: 1, kind: input, shape index: {}]   ;;  %s7314_s2 = inlined_call_operand.vmem [shape: f32[1,256], index: 2, kind: input, shape index: {}]   ;;  %s7315_s3 = inlined_call_operand.hbm [shape: bf16[3,128,128], index: 3, kind: input, shape index: {}]   ;;  %s7316_s4 = inlined_call_operand.vmem [shape: f32[1,128], index: 4, kind: input, shape index: {}]   ;;  %s7317_s5 = inlined_call_operand.hbm [shape: bf16[3,128,128], index: 5, kind: input, shape index: {}]   ;;  %s7318_s6 = inlined_call_operand.vmem [shape: f32[1,128], index: 6, kind: input, shape index: {}]   ;;  %s7319_s7 = inlined_call_operand.hbm [shape: bf16[256,128], index: 7, kind: input, shape index: {}]   ;;  %s7320_s8 = inlined_call_operand.vmem [shape: f32[1,128], index: 8, kind: input, shape index: {}]   ;;  %s7321_s9 = inlined_call_operand.hbm [shape: f32[2,256,128], index: 9, kind: output, shape index: {}]  }
   0x1   :  { %7388 = sst [smem:[#allocation91_spill]] %s7316_s4 }
   0x2   :  { %7389 = sst [smem:[#allocation92_spill]] %s7318_s6 }
   0x3   :  { %7390 = sst [smem:[#allocation93_spill]] %s7320_s8 }
   0x4   :  { %7391 = sst [smem:[#allocation94_spill]] %s7321_s9 }
   0x5   :  { %14 = vsyncpa [#allocation3], 0 }
   0x6   :  { %16 = vsyncpa [#allocation3 + $0x1], 0 }
   0x7   :  { %17 = vsyncpa [#allocation6], 0 }
   0x8   :  { %18 = vsyncpa [#allocation9], 0 }
   0x9   :  { %19 = vsyncpa [#allocation4], 0 }
   0xa   :  { %21 = vsyncpa [#allocation4 + $0x1], 0  ;;  %s5778_s30 = smov 0   ;;  %s5780_s10 = smov 0  }
   0xb   :  { %s5782_s11 = smov 0   ;;  %s5784_s12 = smov 0  }
   0xc   :  { %s5786_s13 = smov 0   ;;  %s5788_s14 = smov 0  }
   0xd LB: > { %7392 = sst [smem:[#allocation16_spill]] %s5691_s30  ;;  %s4278_s15 = sadd.s32 4294967295, %s5711_s14   ;;  %s5711_s14 = sphi %s5788_s14, %s27_s14   ;;  %s5707_s13 = sphi %s5786_s13, %s7622_s13   ;;  %s5703_s12 = sphi %s5784_s12, %s7621_s12   ;;  %s5699_s11 = sphi %s5782_s11, %s7620_s11   ;;  %s5695_s10 = sphi %s5780_s10, %s7619_s10   ;;  %s5691_s30 = sphi %s5778_s30, %s7618_s30  }
   0xe   : > { %7393 = sst [smem:[#allocation17_spill]] %s5703_s12  ;;  %s4279_s16 = sadd.s32 4294967294, %s5711_s14  }
   0xf   : > { %p59_p0 = scmp.ne.s32.totalorder %s5695_s10, %s5691_s30  ;;  %p5812_p1 = scmp.eq.s32.totalorder %s4278_s15, 0 }
  0x10   : > { %p5816_p2 = scmp.eq.s32.totalorder %s4278_s15, 1  ;;  %p259_p3 = scmp.eq.s32.totalorder %s4279_s16, 1 }
  0x11   : > { %s7394_s17 = scalar_select %p5812_p1, 1, 0 }
  0x12   : > { %s7395_s18 = scalar_select %p5816_p2, 1, 0 }
  0x13   : > { %p5822_p4 = por %p5812_p1, %p59_p0  ;;  %p4280_p5 = scmp.ge.s32.totalorder %s5711_s14, 1 }
  0x14   : > { %p5827_p6 = por %p259_p3, %p59_p0  ;;  %p266_p7 = scmp.lt.s32.totalorder %s5711_s14, 3 }
  0x15   : > { %s7396_s19 = scalar_select %p5822_p4, 1, 0 }
  0x16   : > { %s7397_s20 = scalar_select %p5827_p6, 1, 0 }
  0x17   : > { %p5832_p8 = pnand %p4280_p5, %p266_p7  ;;  %s5713_s22 = smov [#allocation5]  }
  0x18   : > { %7398 = sst [smem:[#allocation18_spill]] %s7397_s20  ;;  %s278_s23 = sshll.u32 %s5713_s22, 4  ;;  %s279_s23 = int_to_ptr.vmem [resolvable:$true] %s278_s23 }
  0x19   : > { %s7399_s21 = scalar_select %p5832_p8, 1, 0 }
  0x1a   : > { %p5267_p9 = pneg %p5832_p8  ;;  %s5714_s25 = smov [#allocation8]  }
  0x1b   : > { %s310_s26 = sshll.u32 %s5714_s25, 4  ;;  %s5479_s29 = scalar_lea.hbm %s7313_s1, 2048  ;;  %s311_s26 = int_to_ptr.vmem [resolvable:$true] %s310_s26 }
  0x1c   : > { %p5841_p11 = pnand %p5267_p9, %p5812_p1  ;;  %p5480_p12 = scmp.ne.s32.totalorder %s7313_s1, %s5479_s29 }
  0x1d   : > { %p5486_p5 = scmp.lt.u32.totalorder %s5479_s29, %s7313_s1 }
  0x1e   : > { %p5853_p13 = pneg %p5841_p11 }
  0x20   : > { %p5482_p0 = pnand %p5853_p13, %p5480_p12 }
  0x22   : > { %p5483_p3 = pneg %p5482_p0 }
  0x24   : > { %p5488_p7 = pnand %p5486_p5, %p5483_p3 }
  0x26   : > { %5491 = shalt.err (!%p5488_p7)
}
  0x27   : > { %s5492_s25 = scalar_lea.vmem %s279_s23, 2048  ;;  %p5500_p1 = scmp.lt.s32.totalorder %s279_s23, %s279_s23 }
  0x28   : > { %p5493_p9 = scmp.ne.s32.totalorder %s279_s23, %s5492_s25  ;;  %p5501_p4 = scmp.lt.s32.totalorder %s5492_s25, %s5492_s25 }
  0x2a   : > { %p5495_p10 = pnand %p5493_p9, %p5853_p13  ;;  %p5502_p8 = por %p5501_p4, %p5500_p1 }
  0x2c   : > { %p5496_p6 = pneg %p5495_p10 }
  0x2e   : > { %p5503_p2 = pnand %p5502_p8, %p5496_p6 }
  0x30   : > { %5506 = shalt.err (!%p5503_p2)
}
  0x31   : > { %s7329_s27 = smov 128   ;;  %s5716_s28 = smov 8  }
  0x32   : > { %5270 = dma.hbm_to_vmem [thread:$0]  (!%p5841_p11), %s7313_s1, 2048, %s279_s23, [#allocation6], %s7329_s27, %s7329_s27, %s5716_s28  }
  0x33   : > { %s5717_s29 = smov [#allocation7]   ;;  %s5507_s9 = scalar_lea.hbm %s7317_s5, 3072 }
  0x34   : > { %s294_s15 = sshll.u32 %s5717_s29, 4  ;;  %p5508_p1 = scmp.ne.s32.totalorder %s7317_s5, %s5507_s9  ;;  %s295_s15 = int_to_ptr.vmem [resolvable:$true] %s294_s15 }
  0x35   : > { %p5514_p6 = scmp.lt.u32.totalorder %s5507_s9, %s7317_s5 }
  0x36   : > { %p5510_p2 = pnand %p5508_p1, %p5853_p13 }
  0x38   : > { %p5511_p4 = pneg %p5510_p2 }
  0x3a   : > { %p5516_p8 = pnand %p5514_p6, %p5511_p4 }
  0x3c   : > { %5519 = shalt.err (!%p5516_p8)
}
  0x3d   : > { %s5520_s23 = scalar_lea.vmem %s311_s26, 3072  ;;  %p5528_p3 = scmp.lt.s32.totalorder %s311_s26, %s311_s26 }
  0x3e   : > { %p5521_p10 = scmp.ne.s32.totalorder %s311_s26, %s5520_s23  ;;  %p5529_p5 = scmp.lt.s32.totalorder %s5520_s23, %s5520_s23 }
  0x40   : > { %p5523_p12 = pnand %p5521_p10, %p5853_p13  ;;  %p5530_p7 = por %p5529_p5, %p5528_p3 }
  0x42   : > { %p5524_p0 = pneg %p5523_p12 }
  0x44   : > { %p5531_p9 = pnand %p5530_p7, %p5524_p0 }
  0x46   : > { %5534 = shalt.err (!%p5531_p9)
}
  0x47   : > { %s5718_s8 = smov 64   ;;  %s5719_s12 = smov 4  }
  0x48   : > { %5276 = dma.hbm_to_vmem [thread:$0]  (!%p5841_p11), %s7317_s5, 3072, %s311_s26, [#allocation9], %s5718_s8, %s5718_s8, %s5719_s12  }
  0x49   : > { %s5535_s20 = scalar_lea.hbm %s7315_s3, 3072 }
  0x4a   : > { %p5536_p1 = scmp.ne.s32.totalorder %s7315_s3, %s5535_s20  ;;  %p5542_p6 = scmp.lt.u32.totalorder %s5535_s20, %s7315_s3 }
  0x4c   : > { %p5538_p2 = pnand %p5536_p1, %p5853_p13 }
  0x4e   : > { %p5539_p4 = pneg %p5538_p2 }
  0x50   : > { %p5544_p8 = pnand %p5542_p6, %p5539_p4 }
  0x52   : > { %5547 = shalt.err (!%p5544_p8)
}
  0x53   : > { %s5548_s4 = scalar_lea.vmem %s295_s15, 3072  ;;  %p5556_p3 = scmp.lt.s32.totalorder %s295_s15, %s295_s15 }
  0x54   : > { %p5549_p10 = scmp.ne.s32.totalorder %s295_s15, %s5548_s4  ;;  %p5557_p5 = scmp.lt.s32.totalorder %s5548_s4, %s5548_s4 }
  0x56   : > { %p5551_p12 = pnand %p5549_p10, %p5853_p13  ;;  %p5558_p7 = por %p5557_p5, %p5556_p3 }
  0x58   : > { %p5552_p0 = pneg %p5551_p12 }
  0x5a   : > { %p5559_p9 = pnand %p5558_p7, %p5552_p0 }
  0x5c   : > { %5562 = shalt.err (!%p5559_p9)
}
  0x5d   : > { %5273 = dma.hbm_to_vmem [thread:$0]  (!%p5841_p11), %s7315_s3, 3072, %s295_s15, [#allocation6], %s5718_s8, %s5718_s8, %s5719_s12  }
  0x5e   : > { %s5720_s9 = smov [#allocation10]   ;;  %s5563_s16 = scalar_lea.hbm %s7319_s7, 2048 }
  0x5f   : > { %s326_s30 = sshll.u32 %s5720_s9, 4  ;;  %p5564_p1 = scmp.ne.s32.totalorder %s7319_s7, %s5563_s16  ;;  %s327_s30 = int_to_ptr.vmem [resolvable:$true] %s326_s30 }
  0x60   : > { %p5570_p6 = scmp.lt.u32.totalorder %s5563_s16, %s7319_s7 }
  0x61   : > { %p5566_p2 = pnand %p5564_p1, %p5853_p13 }
  0x63   : > { %p5567_p4 = pneg %p5566_p2 }
  0x65   : > { %p5572_p8 = pnand %p5570_p6, %p5567_p4 }
  0x67   : > { %5575 = shalt.err (!%p5572_p8)
}
  0x68   : > { %s5576_s15 = scalar_lea.vmem %s327_s30, 2048  ;;  %p5584_p3 = scmp.lt.s32.totalorder %s327_s30, %s327_s30 }
  0x69   : > { %p5577_p10 = scmp.ne.s32.totalorder %s327_s30, %s5576_s15  ;;  %p5585_p5 = scmp.lt.s32.totalorder %s5576_s15, %s5576_s15 }
  0x6b   : > { %p5579_p12 = pnand %p5577_p10, %p5853_p13  ;;  %p5586_p7 = por %p5585_p5, %p5584_p3 }
  0x6d   : > { %p5580_p0 = pneg %p5579_p12 }
  0x6f   : > { %p5587_p9 = pnand %p5586_p7, %p5580_p0 }
  0x71   : > { %5590 = shalt.err (!%p5587_p9)
}
  0x72   : > { %5279 = dma.hbm_to_vmem [thread:$0]  (!%p5841_p11), %s7319_s7, 2048, %s327_s30, [#allocation9], %s5718_s8, %s5718_s8, %s5719_s12  }
  0x73   : > { %s39_s22 = sadd.s32 1, %s5707_s13  ;;  %s46_s24 = sadd.s32 1, %s5699_s11 }
  0x74   : > { %p41_p13 = scmp.ge.s32.totalorder %s39_s22, 2  ;;  %p53_p1 = scmp.ne.s32.totalorder %s5699_s11, %s5695_s10 }
  0x75   : > { %p54_p2 = scmp.eq.s32.totalorder %s5711_s14, 0  ;;  %p5292_p4 = scmp.lt.s32.totalorder %s5711_s14, 2 }
  0x76   : > { %s7624_s22 = smov (%p41_p13, %s39_s22), 0  ;;  %p7402_p8 = scmp.ne.s32.totalorder %s7395_s18, 0 }
  0x77   : > { %p55_p6 = por %p54_p2, %p53_p1  ;;  %s43_s9 = ssub.s32 %s5707_s13, %s7624_s22 }
  0x78   : > { %p5945_p10 = por %p7402_p8, %p53_p1  ;;  %s343_s20 = sand.u32 1, %s5699_s11  }
  0x79   : > { %p44_p12 = scmp.eq.s32.totalorder %s43_s9, 0  ;;  %s5244_s8 = smul.u32 288, %s343_s20 }
  0x7a   : > { %p5952_p11 = pnand %p5292_p4, %p55_p6  ;;  %s5245_s29 = smul.u32 4608, %s5707_s13 }
  0x7b   : > { %s5957_s30 = scalar_select %p44_p12, %s5699_s11, %s46_s24  }
  0x7c   : > { %s347_s16 = scalar_lea.vmem [#allocation2], %s5244_s8  ;;  %s5963_s4 = scalar_lea.hbm %s7312_s0, %s5245_s29 }
  0x7d   : > { %s354_s25 = sshll.u32 %s347_s16, 4  ;;  %s5967_s15 = scalar_lea.sflag [#allocation3], %s343_s20  ;;  %s5965_s25 = int_to_ptr.vmem [resolvable:$true] %s354_s25 }
  0x7e   : > { %s5591_s27 = scalar_lea.hbm %s5963_s4, 4608  ;;  %p5593_p3 = pneg %p5952_p11 }
  0x7f   : > { %p5592_p0 = scmp.ne.s32.totalorder %s5963_s4, %s5591_s27  ;;  %s5596_s9 = scalar_lea.hbm %s7312_s0, 9216 }
  0x80   : > { %p5597_p9 = scmp.lt.u32.totalorder %s5963_s4, %s7312_s0  ;;  %p5598_p13 = scmp.lt.u32.totalorder %s5596_s9, %s5591_s27 }
  0x81   : > { %p5594_p5 = pnand %p5593_p3, %p5592_p0  ;;  %p5600_p2 = scmp.lt.u32.totalorder %s5591_s27, %s5963_s4 }
  0x82   : > { %p5599_p1 = por %p5598_p13, %p5597_p9 }
  0x83   : > { %p5595_p7 = pneg %p5594_p5 }
  0x84   : > { %p5601_p4 = por %p5600_p2, %p5599_p1 }
  0x86   : > { %p5602_p6 = pnand %p5601_p4, %p5595_p7 }
  0x88   : > { %5605 = shalt.err (!%p5602_p6)
}
  0x89   : > { %s5606_s20 = scalar_lea.vmem %s5965_s25, 4608  ;;  %s5721_s16 = smov [#allocation2]  }
  0x8a   : > { %p5607_p8 = scmp.ne.s32.totalorder %s5965_s25, %s5606_s20  ;;  %s5611_s18 = sshll.u32 %s5721_s16, 4  ;;  %s5612_s18 = int_to_ptr.vmem [resolvable:$false] %s5611_s18 }
  0x8b   : > { %s5613_s23 = scalar_lea.vmem %s5612_s18, 9216  ;;  %p5614_p5 = scmp.lt.s32.totalorder %s5965_s25, %s5612_s18 }
  0x8c   : > { %p5609_p12 = pnand %p5607_p8, %p5593_p3  ;;  %p5615_p9 = scmp.lt.s32.totalorder %s5613_s23, %s5606_s20 }
  0x8e   : > { %p5610_p0 = pneg %p5609_p12  ;;  %p5616_p13 = por %p5615_p9, %p5614_p5 }
  0x90   : > { %p5617_p1 = pnand %p5616_p13, %p5610_p0 }
  0x92   : > { %5620 = shalt.err (!%p5617_p1)
}
  0x93   : > { %s7405_s27 = smov 128   ;;  %p7406_p3 = scmp.ne.s32.totalorder %s7399_s21, 0 }
  0x94   : > { %5283 = dma.hbm_to_vmem [thread:$0]  (!%p5952_p11), %s5963_s4, 4608, %s5965_s25, %s5967_s15, %s7405_s27, %s7405_s27, %s5716_s28  }
  0x95   : > { %366 = sbr.rel (%p7406_p3) target bundleno = 1643 (0x66b), region = 56 }
  0x9c   : > { %s6001_s26 = sand.u32 1, %s5695_s10   ;;  %p7407_p7 = scmp.ne.s32.totalorder %s7396_s19, 0 }
  0x9d   : > { %s5246_s24 = smul.u32 288, %s6001_s26  ;;  %s369_s9 = scalar_lea.sflag [#allocation3], %s6001_s26 }
  0x9f   : > { %s6005_s8 = scalar_lea.vmem [#allocation2], %s5246_s24 }
  0xa0   : > { %5674 = dma.done.wait (%p7407_p7), %s369_s9, 4608  }
  0xa1   : > { %5676 = vsyncadd (%p7407_p7), %s369_s9, 4294962688  ;;  %p7408_p11 = scmp.ne.s32.totalorder %s7394_s17, 0 }
  0xa3   : > { %5678 = dma.done.wait (%p7408_p11), [#allocation6], 5120  }
  0xa4   : > { %5680 = vsyncadd (%p7408_p11), [#allocation6], 4294962176 }
  0xa5   : > { %5682 = dma.done.wait (%p7408_p11), [#allocation9], 5120  }
  0xa6   : > { %5684 = vsyncadd (%p7408_p11), [#allocation9], 4294962176  ;;  %v5722_v0 = vmov 0   ;;  %v5359_v1 = vld [vmem:[#allocation5 + $0x4] ss:$8 sps:$4 sm:$0xff]   ;;  %v429_v20 = vld [vmem:[%s6005_s8 + $0x10] sm:$0xff] }
  0xa7   : > { %621 = vmatprep.mubr.bf16.mxu0 %v5722_v0  ;;  %v5361_v2 = vld [vmem:[#allocation5] ss:$8 sps:$4 sm:$0xff]   ;;  %589 = vmatprep.subr.bf16.mxu0 %v5359_v1  ;;  %v5362_v3 = vld [vmem:[#allocation5 + $0x14] ss:$8 sps:$4 sm:$0xff]   ;;  %v5364_v4 = vld [vmem:[#allocation5 + $0x10] ss:$8 sps:$4 sm:$0xff]  }
  0xa8   : > { %590 = vmatpush1.bf16.msra.mxu0 %v5361_v2  ;;  %v5365_v5 = vld [vmem:[#allocation5 + $0x24] ss:$8 sps:$4 sm:$0xff]   ;;  %v5367_v6 = vld [vmem:[#allocation5 + $0x20] ss:$8 sps:$4 sm:$0xff]   ;;  %v5368_v7 = vld [vmem:[#allocation5 + $0x34] ss:$8 sps:$4 sm:$0xff]  }
  0xa9   : > { %591 = vmatprep.subr.bf16.mxu0 %v5362_v3  ;;  %v5370_v8 = vld [vmem:[#allocation5 + $0x30] ss:$8 sps:$4 sm:$0xff]   ;;  %v5371_v9 = vld [vmem:[#allocation5 + $0x44] ss:$8 sps:$4 sm:$0xff]   ;;  %v5373_v10 = vld [vmem:[#allocation5 + $0x40] ss:$8 sps:$4 sm:$0xff]  }
  0xaa   : > { %v5374_v11 = vld [vmem:[#allocation5 + $0x54] ss:$8 sps:$4 sm:$0xff]   ;;  %v5376_v12 = vld [vmem:[#allocation5 + $0x50] ss:$8 sps:$4 sm:$0xff]   ;;  %v5377_v13 = vld [vmem:[#allocation5 + $0x64] ss:$8 sps:$4 sm:$0xff]  }
  0xab   : > { %v5379_v14 = vld [vmem:[#allocation5 + $0x60] ss:$8 sps:$4 sm:$0xff]   ;;  %v5380_v15 = vld [vmem:[#allocation5 + $0x74] ss:$8 sps:$4 sm:$0xff]   ;;  %v5382_v16 = vld [vmem:[#allocation5 + $0x70] ss:$8 sps:$4 sm:$0xff]  }
  0xac   : > { %592 = vmatpush1.bf16.msra.mxu0 %v5364_v4  ;;  %v427_v17 = vld [vmem:[%s6005_s8] sm:$0xff]  ;;  %v428_v18 = vld [vmem:[%s6005_s8 + $0x8] sm:$0xff]  ;;  %v430_v21 = vld [vmem:[%s6005_s8 + $0x18] sm:$0xff]  ;;  %vm5723_vm5 = vmmov 1   ;;  %s7592_s12 = sld [smem:[#allocation91_spill]]  ;;  %s7593_s15 = sld [smem:[#allocation92_spill]] }
  0xad   : > { %593 = vmatprep.subr.bf16.mxu0 %v5365_v5  ;;  %v479_v19 = vpack.c.bf16 %v428_v18, %v427_v17  ;;  %v480_v22 = vpack.c.bf16 %v430_v21, %v429_v20  ;;  %v431_v23 = vld [vmem:[%s6005_s8 + $0x20] sm:$0xff]  ;;  %v432_v24 = vld [vmem:[%s6005_s8 + $0x28] sm:$0xff]  ;;  %v433_v26 = vld [vmem:[%s6005_s8 + $0x30] sm:$0xff]  ;;  %s7610_s16 = sld [smem:[#allocation93_spill]]  ;;  %s4292_s18 = sshll.u32 %s6001_s26, 8 }
  0xae   : > { %v481_v25 = vpack.c.bf16 %v432_v24, %v431_v23  ;;  %v434_v27 = vld [vmem:[%s6005_s8 + $0x38] sm:$0xff]  ;;  %v435_v29 = vld [vmem:[%s6005_s8 + $0x40] sm:$0xff]  ;;  %v436_v30 = vld [vmem:[%s6005_s8 + $0x48] sm:$0xff]  ;;  %s7162_s23 = scalar_lea.vmem [#allocation11], %s4292_s18  ;;  %s7611_s27 = sld [smem:[#allocation17_spill]] }
  0xaf   : > { %v482_v28 = vpack.c.bf16 %v434_v27, %v433_v26  ;;  %v483_v31 = vpack.c.bf16 %v436_v30, %v435_v29  ;;  %v437_v32 = vld [vmem:[%s6005_s8 + $0x50] sm:$0xff]  ;;  %v438_v33 = vld [vmem:[%s6005_s8 + $0x58] sm:$0xff]  ;;  %v439_v35 = vld [vmem:[%s6005_s8 + $0x60] sm:$0xff]  ;;  %s4154_s9 = sshll.u32 %s7162_s23, 4  ;;  %s7612_s21 = sld [smem:[#allocation94_spill]]  ;;  %s7261_s9 = int_to_ptr.vmem [resolvable:$true] %s4154_s9 }
  0xb0   : > { %594 = vmatpush1.bf16.msra.mxu0 %v5367_v6  ;;  %v484_v34 = vpack.c.bf16 %v438_v33, %v437_v32  ;;  %v440_v36 = vld [vmem:[%s6005_s8 + $0x68] sm:$0xff]  ;;  %v441_v38 = vld [vmem:[%s6005_s8 + $0x70] sm:$0xff]  ;;  %v442_v39 = vld [vmem:[%s6005_s8 + $0x78] sm:$0xff]  ;;  %s5621_s25 = scalar_lea.vmem %s7261_s9, 4096 }
  0xb1   : > { %595 = vmatprep.subr.bf16.mxu0 %v5368_v7  ;;  %v485_v37 = vpack.c.bf16 %v440_v36, %v439_v35  ;;  %v486_v40 = vpack.c.bf16 %v442_v39, %v441_v38  ;;  %v443_v41 = vld [vmem:[%s6005_s8 + $0x80] sm:$0xff]  ;;  %v444_v42 = vld [vmem:[%s6005_s8 + $0x88] sm:$0xff]  ;;  %v445_v44 = vld [vmem:[%s6005_s8 + $0x90] sm:$0xff]  ;;  %p5622_p2 = scmp.ne.s32.totalorder %s7261_s9, %s5621_s25 }
  0xb2   : > { %v487_v43 = vpack.c.bf16 %v444_v42, %v443_v41  ;;  %v446_v45 = vld [vmem:[%s6005_s8 + $0x98] sm:$0xff]  ;;  %v447_v47 = vld [vmem:[%s6005_s8 + $0xa0] sm:$0xff]  ;;  %v448_v48 = vld [vmem:[%s6005_s8 + $0xa8] sm:$0xff] }
  0xb3   : > { %v488_v46 = vpack.c.bf16 %v446_v45, %v445_v44  ;;  %v489_v49 = vpack.c.bf16 %v448_v48, %v447_v47  ;;  %v449_v50 = vld [vmem:[%s6005_s8 + $0xb0] sm:$0xff]  ;;  %v450_v51 = vld [vmem:[%s6005_s8 + $0xb8] sm:$0xff]  ;;  %v451_v53 = vld [vmem:[%s6005_s8 + $0xc0] sm:$0xff]  ;;  %p5623_p4 = pnand %p5622_p2, %p5945_p10 }
  0xb4   : > { %596 = vmatpush1.bf16.msra.mxu0 %v5370_v8  ;;  %v490_v52 = vpack.c.bf16 %v450_v51, %v449_v50  ;;  %v452_v54 = vld [vmem:[%s6005_s8 + $0xc8] sm:$0xff]  ;;  %v453_v56 = vld [vmem:[%s6005_s8 + $0xd0] sm:$0xff]  ;;  %v454_v57 = vld [vmem:[%s6005_s8 + $0xd8] sm:$0xff]  ;;  %v499_v8 = vlaneseq  ;;  %s4525_s24 = sshll.u32 %s7611_s27, 12 }
  0xb5   : > { %597 = vmatprep.subr.bf16.mxu0 %v5371_v9  ;;  %v491_v55 = vpack.c.bf16 %v452_v54, %v451_v53  ;;  %v492_v58 = vpack.c.bf16 %v454_v57, %v453_v56  ;;  %v455_v59 = vld [vmem:[%s6005_s8 + $0xe0] sm:$0xff]  ;;  %v456_v60 = vld [vmem:[%s6005_s8 + $0xe8] sm:$0xff]  ;;  %v457_v62 = vld [vmem:[%s6005_s8 + $0xf0] sm:$0xff]  ;;  %s7259_s28 = scalar_lea.hbm %s7612_s21, %s4525_s24  ;;  %p5624_p6 = pneg %p5623_p4 }
  0xb6   : > { %v493_v61 = vpack.c.bf16 %v456_v60, %v455_v59  ;;  %v458_v63 = vld [vmem:[%s6005_s8 + $0xf8] sm:$0xff]  ;;  %v459_v2 = vld [vmem:[%s6005_s8 + $0x100] sm:$0xff]  ;;  %v460_v3 = vld [vmem:[%s6005_s8 + $0x108] sm:$0xff] }
  0xb7   : > { %v494_v1 = vpack.c.bf16 %v458_v63, %v457_v62  ;;  %v495_v4 = vpack.c.bf16 %v460_v3, %v459_v2  ;;  %v461_v5 = vld [vmem:[%s6005_s8 + $0x110] sm:$0xff]  ;;  %v462_v6 = vld [vmem:[%s6005_s8 + $0x118] sm:$0xff]  ;;  %v5383_v9 = vld [vmem:[#allocation7] sm:$0xff]  }
  0xb8   : > { %598 = vmatpush1.bf16.msra.mxu0 %v5373_v10  ;;  %v496_v7 = vpack.c.bf16 %v462_v6, %v461_v5  ;;  %v6073_v10 = vshrl.u32 %v499_v8, 7  ;;  %4824 = vmatprep.subr.bf16.mxu1 %v5383_v9  ;;  %v5387_v24 = vld [vmem:[#allocation7 + $0x20] sm:$0xff]   ;;  %v5388_v30 = vld [vmem:[#allocation7 + $0x28] sm:$0xff]   ;;  %v5389_v41 = vld [vmem:[#allocation7 + $0x30] sm:$0xff]  }
  0xb9   : > { %599 = vmatprep.subr.bf16.mxu0 %v5374_v11  ;;  %4825 = vmatpush3.bf16.msra.mxu1 %v5383_v9  ;;  %v5384_v11 = vld [vmem:[#allocation7 + $0x8] sm:$0xff]   ;;  %v5390_v53 = vld [vmem:[#allocation7 + $0x38] sm:$0xff]   ;;  %v6150_v8 = vld [vmem:[#allocation7 + $0x40] sm:$0xff]  }
  0xba   : > { %4826 = vmatprep.subr.bf16.mxu1 %v5384_v11  ;;  %v501_v18 = vsub.s32 0, %v6073_v10  ;;  %vm1406_vm0 = vcmp.lt.s32.totalorder %v6073_v10, 1  ;;  %vm2107_vm1 = vcmp.lt.s32.totalorder %v6073_v10, 7 }
  0xbc   : > { %600 = vmatpush1.bf16.msra.mxu0 %v5376_v12  ;;  %v505_v12 = vsub.s32 1, %v6073_v10 }
  0xbd   : > { %601 = vmatprep.subr.bf16.mxu0 %v5377_v13  ;;  %v497_v13 = vld [vmem:[%s7314_s2] sm:$0x3]  ;;  %4827 = vmatpush3.bf16.msra.mxu1 %v5384_v11 }
  0xc0   : > { %602 = vmatpush1.bf16.msra.mxu0 %v5379_v14  ;;  %v6079_v14 = vrot.slane %v497_v13, %v505_v12 }
  0xc1   : > { %603 = vmatprep.subr.bf16.mxu0 %v5380_v15 }
  0xc4   : > { %604 = vmatpush1.bf16.msra.mxu0 %v5382_v16  ;;  %v5386_v16 = vld [vmem:[#allocation7 + $0x18] sm:$0xff]  }
  0xc7   : > { %622 = vmatmul.mubr.bf16.vlgmr.msra.gmra.mrb[0].mxu0 %v479_v19 }
  0xc8   : > { %629 = vmatprep.mubr.bf16.mxu0 %v5722_v0 }
  0xcf   : > { %630 = vmatmul.mubr.bf16.gmra.mrb[4].mxu0 %v480_v22 }
  0xd0   : > { %639 = vmatprep.mubr.bf16.mxu0 %v5722_v0 }
  0xd7   : > { %640 = vmatmul.mubr.bf16.gmra.mrb[8].mxu0 %v481_v25  ;;  %v6086_v25 = vrot.slane %v497_v13, %v501_v18 }
  0xd8   : > { %649 = vmatprep.mubr.bf16.mxu0 %v5722_v0 }
  0xdf   : > { %650 = vmatmul.mubr.bf16.gmra.mrb[12].mxu0 %v482_v28 }
  0xe0   : > { %659 = vmatprep.mubr.bf16.mxu0 %v5722_v0 }
  0xe7   : > { %660 = vmatmul.mubr.bf16.gmra.mrb[16].mxu0 %v483_v31 }
  0xe8   : > { %669 = vmatprep.mubr.bf16.mxu0 %v5722_v0 }
  0xef   : > { %670 = vmatmul.mubr.bf16.gmra.mrb[20].mxu0 %v484_v34 }
  0xf0   : > { %679 = vmatprep.mubr.bf16.mxu0 %v5722_v0 }
  0xf7   : > { %680 = vmatmul.mubr.bf16.gmra.mrb[24].mxu0 %v485_v37 }
  0xf8   : > { %689 = vmatprep.mubr.bf16.mxu0 %v5722_v0 }
  0xff   : > { %690 = vmatmul.mubr.bf16.gmra.mrb[28].mxu0 %v486_v40 }
 0x100   : > { %699 = vmatprep.mubr.bf16.mxu0 %v5722_v0 }
 0x107   : > { %700 = vmatmul.mubr.bf16.gmra.mrb[32].mxu0 %v487_v43 }
 0x108   : > { %709 = vmatprep.mubr.bf16.mxu0 %v5722_v0 }
 0x10f   : > { %710 = vmatmul.mubr.bf16.gmra.mrb[36].mxu0 %v488_v46 }
 0x110   : > { %719 = vmatprep.mubr.bf16.mxu0 %v5722_v0 }
 0x117   : > { %720 = vmatmul.mubr.bf16.gmra.mrb[40].mxu0 %v489_v49 }
 0x118   : > { %729 = vmatprep.mubr.bf16.mxu0 %v5722_v0 }
 0x11f   : > { %730 = vmatmul.mubr.bf16.gmra.mrb[44].mxu0 %v490_v52 }
 0x120   : > { %739 = vmatprep.mubr.bf16.mxu0 %v5722_v0 }
 0x127   : > { %740 = vmatmul.mubr.bf16.gmra.mrb[48].mxu0 %v491_v55 }
 0x128   : > { %749 = vmatprep.mubr.bf16.mxu0 %v5722_v0 }
 0x12f   : > { %750 = vmatmul.mubr.bf16.gmra.mrb[52].mxu0 %v492_v58 }
 0x130   : > { %759 = vmatprep.mubr.bf16.mxu0 %v5722_v0 }
 0x137   : > { %760 = vmatmul.mubr.bf16.gmra.mrb[56].mxu0 %v493_v61 }
 0x138   : > { %769 = vmatprep.mubr.bf16.mxu0 %v5722_v0 }
 0x13f   : > { %770 = vmatmul.mubr.bf16.gmra.mrb[60].mxu0 %v494_v1 }
 0x140   : > { %779 = vmatprep.mubr.bf16.mxu0 %v5722_v0 }
 0x147   : > { %780 = vmatmul.mubr.bf16.gmra.mrb[64].mxu0 %v495_v4 }
 0x148   : > { %789 = vmatprep.mubr.bf16.mxu0 %v5722_v0  ;;  %v5385_v0 = vld [vmem:[#allocation7 + $0x10] sm:$0xff]  }
 0x149   : > { %4828 = vmatprep.subr.bf16.mxu1 %v5385_v0 }
 0x14a   : > { %4829 = vmatpush3.bf16.msra.mxu1 %v5385_v0 }
 0x14b   : > { %4830 = vmatprep.subr.bf16.mxu1 %v5386_v16 }
 0x14e   : > { %4831 = vmatpush3.bf16.msra.mxu1 %v5386_v16 }
 0x14f   : > { %790 = vmatmul.mubr.bf16.gmra.mrb[68].mxu0 %v496_v7  ;;  %4832 = vmatprep.subr.bf16.mxu1 %v5387_v24 }
 0x152   : > { %4833 = vmatpush3.bf16.msra.mxu1 %v5387_v24 }
 0x153   : > { %4834 = vmatprep.subr.bf16.mxu1 %v5388_v30 }
 0x156   : > { %4835 = vmatpush3.bf16.msra.mxu1 %v5388_v30 }
 0x157   : > { %4836 = vmatprep.subr.bf16.mxu1 %v5389_v41 }
 0x15a   : > { %4837 = vmatpush3.bf16.msra.mxu1 %v5389_v41 }
 0x15b   : > { %4838 = vmatprep.subr.bf16.mxu1 %v5390_v53 }
 0x15e   : > { %4839 = vmatpush3.bf16.msra.mxu1 %v5390_v53 }
 0x15f   : > { %4876 = vmatprep.subr.bf16.mxu1 %v6150_v8 }
 0x19a   : > { %v623_v15 = vpop.f32.mrb[0].mxu0 }
 0x19b   : > { %v624_v17 = vpop.f32.mrb[1].mxu0 }
 0x19c   : > { %v625_v19 = vadd.f32 %v624_v17, %v6079_v14  ;;  %v626_v20 = vpop.f32.mrb[2].mxu0 }
 0x19d   : > { %v627_v21 = vpop.f32.mrb[3].mxu0 }
 0x19e   : > { %v6083_v22 = vmax.f32 %v625_v19, 0.0  ;;  %v628_v23 = vadd.f32 %v627_v21, %v6079_v14 }
 0x1a0   : > { %v6088_v26 = vmax.f32 %v628_v23, 0.0  ;;  %v7331_v27 = vrot.slane %v6083_v22, 7  ;;  %v7330_v58 = vrot.slane %v6083_v22, 1 }
 0x1a2   : > { %v1371_v28 = vrot.slane %v6088_v26, 7  ;;  %v631_v29 = vpop.f32.mrb[4].mxu0  ;;  %v2072_v47 = vrot.slane %v6088_v26, 1 }
 0x1a3   : > { %v632_v32 = vadd.f32 %v631_v29, %v6086_v25  ;;  %v633_v33 = vpop.f32.mrb[5].mxu0 }
 0x1a4   : > { %v634_v34 = vadd.f32 %v633_v33, %v6079_v14  ;;  %v635_v35 = vpop.f32.mrb[6].mxu0  ;;  %v6101_v36 = vsel %vm1406_vm0, %v7331_v27, %v1371_v28  ;;  %v6148_v5 = vsel %vm2107_vm1, %v7330_v58, %v2072_v47 }
 0x1a5   : > { %v636_v37 = vadd.f32 %v635_v35, %v6086_v25  ;;  %v637_v38 = vpop.f32.mrb[7].mxu0  ;;  %v800_v42 = vmax.f32 %v632_v32, 0.0  ;;  %7412 = vst [vmem:[#allocation22_spill] sm:$0xff] %v6148_v5 }
 0x1a6   : > { %v6104_v39 = vmax.f32 %v634_v34, 0.0  ;;  %v638_v40 = vadd.f32 %v637_v38, %v6079_v14 }
 0x1a7   : > { %v802_v43 = vmax.f32 %v636_v37, 0.0 }
 0x1a8   : > { %v1372_v44 = vrot.slane %v6104_v39, 7  ;;  %v2073_v45 = vrot.slane %v6104_v39, 1  ;;  %v6109_v46 = vmax.f32 %v638_v40, 0.0 }
 0x1a9   : > { %v6112_v48 = vpack.c.bf16 %v802_v43, %v800_v42 }
 0x1aa   : > { %v1373_v50 = vrot.slane %v6109_v46, 7  ;;  %v2074_v51 = vrot.slane %v6109_v46, 1  ;;  %v641_v52 = vpop.f32.mrb[8].mxu0  ;;  %v6122_v56 = vsel %vm1406_vm0, %v1371_v28, %v1372_v44  ;;  %v6126_v57 = vsel %vm2107_vm1, %v2072_v47, %v2073_v45 }
 0x1ab   : > { %7409 = vst [vmem:[#allocation19_spill] sm:$0xff] %v6112_v48  ;;  %v642_v54 = vadd.f32 %v641_v52, %v6086_v25  ;;  %v643_v55 = vpop.f32.mrb[9].mxu0  ;;  %7410 = vst [vmem:[#allocation20_spill] sm:$0xff] %v6126_v57 }
 0x1ac   : > { %v6131_v59 = vsel %vm2107_vm1, %v2073_v45, %v2074_v51  ;;  %v644_v60 = vadd.f32 %v643_v55, %v6079_v14  ;;  %v645_v61 = vpop.f32.mrb[10].mxu0  ;;  %v6137_v1 = vsel %vm1406_vm0, %v1372_v44, %v1373_v50 }
 0x1ad   : > { %7411 = vst [vmem:[#allocation21_spill] sm:$0xff] %v6131_v59  ;;  %v646_v62 = vadd.f32 %v645_v61, %v6086_v25  ;;  %v647_v63 = vpop.f32.mrb[11].mxu0  ;;  %v804_v6 = vmax.f32 %v642_v54, 0.0 }
 0x1ae   : > { %v6139_v2 = vmax.f32 %v644_v60, 0.0  ;;  %v648_v3 = vadd.f32 %v647_v63, %v6079_v14 }
 0x1af   : > { %v806_v7 = vmax.f32 %v646_v62, 0.0 }
 0x1b0   : > { %v1374_v11 = vrot.slane %v6139_v2, 7  ;;  %v2075_v12 = vrot.slane %v6139_v2, 1  ;;  %v6156_v13 = vmax.f32 %v648_v3, 0.0 }
 0x1b1   : > { %v6158_v0 = vpack.c.bf16 %v806_v7, %v804_v6 }
 0x1b2   : > { %v6163_v15 = vsel %vm2107_vm1, %v2074_v51, %v2075_v12  ;;  %v1375_v16 = vrot.slane %v6156_v13, 7  ;;  %v2076_v17 = vrot.slane %v6156_v13, 1  ;;  %v651_v18 = vpop.f32.mrb[12].mxu0  ;;  %v6169_v19 = vsel %vm1406_vm0, %v1373_v50, %v1374_v11 }
 0x1b3   : > { %7413 = vst [vmem:[#allocation23_spill] sm:$0xff] %v6158_v0  ;;  %7414 = vst [vmem:[#allocation24_spill] sm:$0xff] %v6163_v15  ;;  %v652_v21 = vadd.f32 %v651_v18, %v6086_v25  ;;  %v653_v23 = vpop.f32.mrb[13].mxu0 }
 0x1b4   : > { %v654_v24 = vadd.f32 %v653_v23, %v6079_v14  ;;  %v655_v28 = vpop.f32.mrb[14].mxu0  ;;  %v6177_v29 = vsel %vm1406_vm0, %v1374_v11, %v1375_v16  ;;  %v6189_v38 = vsel %vm2107_vm1, %v2075_v12, %v2076_v17 }
 0x1b5   : > { %v656_v32 = vadd.f32 %v655_v28, %v6086_v25  ;;  %v657_v33 = vpop.f32.mrb[15].mxu0  ;;  %7415 = vst [vmem:[#allocation25_spill] sm:$0xff] %v6189_v38  ;;  %v808_v40 = vmax.f32 %v652_v21, 0.0 }
 0x1b6   : > { %v6184_v35 = vmax.f32 %v654_v24, 0.0  ;;  %v658_v37 = vadd.f32 %v657_v33, %v6079_v14 }
 0x1b7   : > { %v810_v41 = vmax.f32 %v656_v32, 0.0 }
 0x1b8   : > { %v1376_v42 = vrot.slane %v6184_v35, 7  ;;  %v2077_v43 = vrot.slane %v6184_v35, 1  ;;  %v6193_v44 = vmax.f32 %v658_v37, 0.0 }
 0x1b9   : > { %v6195_v45 = vpack.c.bf16 %v810_v41, %v808_v40 }
 0x1ba   : > { %v1377_v47 = vrot.slane %v6193_v44, 7  ;;  %v2078_v50 = vrot.slane %v6193_v44, 1  ;;  %v661_v51 = vpop.f32.mrb[16].mxu0  ;;  %v6201_v52 = vsel %vm1406_vm0, %v1375_v16, %v1376_v42  ;;  %v6208_v60 = vsel %vm2107_vm1, %v2076_v17, %v2077_v43 }
 0x1bb   : > { %7416 = vst [vmem:[#allocation26_spill] sm:$0xff] %v6195_v45  ;;  %v662_v54 = vadd.f32 %v661_v51, %v6086_v25  ;;  %v663_v55 = vpop.f32.mrb[17].mxu0  ;;  %7417 = vst [vmem:[#allocation27_spill] sm:$0xff] %v6208_v60 }
 0x1bc   : > { %v664_v61 = vadd.f32 %v663_v55, %v6079_v14  ;;  %v665_v62 = vpop.f32.mrb[18].mxu0  ;;  %v6213_v63 = vsel %vm1406_vm0, %v1376_v42, %v1377_v47  ;;  %v6225_v17 = vsel %vm2107_vm1, %v2077_v43, %v2078_v50 }
 0x1bd   : > { %v666_v6 = vadd.f32 %v665_v62, %v6086_v25  ;;  %v667_v7 = vpop.f32.mrb[19].mxu0  ;;  %7418 = vst [vmem:[#allocation28_spill] sm:$0xff] %v6225_v17  ;;  %v812_v18 = vmax.f32 %v662_v54, 0.0 }
 0x1be   : > { %v6220_v12 = vmax.f32 %v664_v61, 0.0  ;;  %v668_v16 = vadd.f32 %v667_v7, %v6079_v14 }
 0x1bf   : > { %v814_v21 = vmax.f32 %v666_v6, 0.0 }
 0x1c0   : > { %v1378_v23 = vrot.slane %v6220_v12, 7  ;;  %v2079_v24 = vrot.slane %v6220_v12, 1  ;;  %v6229_v28 = vmax.f32 %v668_v16, 0.0 }
 0x1c1   : > { %v6231_v32 = vpack.c.bf16 %v814_v21, %v812_v18 }
 0x1c2   : > { %v1379_v33 = vrot.slane %v6229_v28, 7  ;;  %v2080_v37 = vrot.slane %v6229_v28, 1  ;;  %v671_v40 = vpop.f32.mrb[20].mxu0  ;;  %v6237_v41 = vsel %vm1406_vm0, %v1377_v47, %v1378_v23  ;;  %v6244_v54 = vsel %vm2107_vm1, %v2078_v50, %v2079_v24 }
 0x1c3   : > { %7419 = vst [vmem:[#allocation29_spill] sm:$0xff] %v6231_v32  ;;  %v672_v43 = vadd.f32 %v671_v40, %v6086_v25  ;;  %v673_v51 = vpop.f32.mrb[21].mxu0  ;;  %7420 = vst [vmem:[#allocation30_spill] sm:$0xff] %v6244_v54 }
 0x1c4   : > { %v674_v55 = vadd.f32 %v673_v51, %v6079_v14  ;;  %v675_v61 = vpop.f32.mrb[22].mxu0  ;;  %v6249_v62 = vsel %vm1406_vm0, %v1378_v23, %v1379_v33  ;;  %v6261_v21 = vsel %vm2107_vm1, %v2079_v24, %v2080_v37 }
 0x1c5   : > { %v676_v6 = vadd.f32 %v675_v61, %v6086_v25  ;;  %v677_v7 = vpop.f32.mrb[23].mxu0  ;;  %7422 = vst [vmem:[#allocation32_spill] sm:$0xff] %v6261_v21  ;;  %v816_v40 = vmax.f32 %v672_v43, 0.0 }
 0x1c6   : > { %v6256_v18 = vmax.f32 %v674_v55, 0.0  ;;  %v678_v50 = vadd.f32 %v677_v7, %v6079_v14 }
 0x1c7   : > { %v818_v23 = vmax.f32 %v676_v6, 0.0 }
 0x1c8   : > { %7421 = vst [vmem:[#allocation31_spill] sm:$0xff] %v6256_v18  ;;  %v1380_v51 = vrot.slane %v6256_v18, 7  ;;  %v2081_v47 = vrot.slane %v6256_v18, 1  ;;  %v6265_v3 = vmax.f32 %v678_v50, 0.0 }
 0x1c9   : > { %v6267_v61 = vpack.c.bf16 %v818_v23, %v816_v40 }
 0x1ca   : > { %7423 = vst [vmem:[#allocation33_spill] sm:$0xff] %v6265_v3  ;;  %v1381_v20 = vrot.slane %v6265_v3, 7  ;;  %v2082_v55 = vrot.slane %v6265_v3, 1  ;;  %v681_v9 = vpop.f32.mrb[24].mxu0  ;;  %v6273_v7 = vsel %vm1406_vm0, %v1379_v33, %v1380_v51  ;;  %v6280_v50 = vsel %vm2107_vm1, %v2080_v37, %v2081_v47 }
 0x1cb   : > { %7424 = vst [vmem:[#allocation34_spill] sm:$0xff] %v6267_v61  ;;  %v682_v43 = vadd.f32 %v681_v9, %v6086_v25  ;;  %v683_v6 = vpop.f32.mrb[25].mxu0  ;;  %7425 = vst [vmem:[#allocation35_spill] sm:$0xff] %v6280_v50 }
 0x1cc   : > { %v684_v40 = vadd.f32 %v683_v6, %v6079_v14  ;;  %v685_v23 = vpop.f32.mrb[26].mxu0  ;;  %v6285_v42 = vsel %vm1406_vm0, %v1380_v51, %v1381_v20  ;;  %v6297_v6 = vsel %vm2107_vm1, %v2081_v47, %v2082_v55 }
 0x1cd   : > { %v686_v53 = vadd.f32 %v685_v23, %v6086_v25  ;;  %v687_v24 = vpop.f32.mrb[27].mxu0  ;;  %7427 = vst [vmem:[#allocation37_spill] sm:$0xff] %v6297_v6  ;;  %v820_v49 = vmax.f32 %v682_v43, 0.0 }
 0x1ce   : > { %v6292_v30 = vmax.f32 %v684_v40, 0.0  ;;  %v688_v37 = vadd.f32 %v687_v24, %v6079_v14 }
 0x1cf   : > { %v822_v51 = vmax.f32 %v686_v53, 0.0 }
 0x1d0   : > { %7426 = vst [vmem:[#allocation36_spill] sm:$0xff] %v6292_v30  ;;  %v1382_v31 = vrot.slane %v6292_v30, 7  ;;  %v2083_v33 = vrot.slane %v6292_v30, 1  ;;  %v6301_v16 = vmax.f32 %v688_v37, 0.0 }
 0x1d1   : > { %v6303_v23 = vpack.c.bf16 %v822_v51, %v820_v49 }
 0x1d2   : > { %7428 = vst [vmem:[#allocation38_spill] sm:$0xff] %v6301_v16  ;;  %v1383_v9 = vrot.slane %v6301_v16, 7  ;;  %v2084_v40 = vrot.slane %v6301_v16, 1  ;;  %v691_v11 = vpop.f32.mrb[28].mxu0  ;;  %v6309_v24 = vsel %vm1406_vm0, %v1381_v20, %v1382_v31  ;;  %v6316_v37 = vsel %vm2107_vm1, %v2082_v55, %v2083_v33 }
 0x1d3   : > { %7429 = vst [vmem:[#allocation39_spill] sm:$0xff] %v6303_v23  ;;  %v692_v47 = vadd.f32 %v691_v11, %v6086_v25  ;;  %v693_v43 = vpop.f32.mrb[29].mxu0  ;;  %7430 = vst [vmem:[#allocation40_spill] sm:$0xff] %v6316_v37 }
 0x1d4   : > { %v694_v49 = vadd.f32 %v693_v43, %v6079_v14  ;;  %v695_v51 = vpop.f32.mrb[30].mxu0  ;;  %v6321_v34 = vsel %vm1406_vm0, %v1382_v31, %v1383_v9  ;;  %v6333_v43 = vsel %vm2107_vm1, %v2083_v33, %v2084_v40 }
 0x1d5   : > { %v696_v4 = vadd.f32 %v695_v51, %v6086_v25  ;;  %v697_v53 = vpop.f32.mrb[31].mxu0  ;;  %7432 = vst [vmem:[#allocation42_spill] sm:$0xff] %v6333_v43  ;;  %v824_v27 = vmax.f32 %v692_v47, 0.0 }
 0x1d6   : > { %v6328_v58 = vmax.f32 %v694_v49, 0.0  ;;  %v698_v55 = vadd.f32 %v697_v53, %v6079_v14 }
 0x1d7   : > { %v826_v31 = vmax.f32 %v696_v4, 0.0 }
 0x1d8   : > { %7431 = vst [vmem:[#allocation41_spill] sm:$0xff] %v6328_v58  ;;  %v1384_v23 = vrot.slane %v6328_v58, 7  ;;  %v2085_v20 = vrot.slane %v6328_v58, 1  ;;  %v6337_v61 = vmax.f32 %v698_v55, 0.0 }
 0x1d9   : > { %v6339_v51 = vpack.c.bf16 %v826_v31, %v824_v27 }
 0x1da   : > { %7433 = vst [vmem:[#allocation43_spill] sm:$0xff] %v6337_v61  ;;  %v1385_v11 = vrot.slane %v6337_v61, 7  ;;  %v2086_v49 = vrot.slane %v6337_v61, 1  ;;  %v701_v32 = vpop.f32.mrb[32].mxu0  ;;  %v6345_v53 = vsel %vm1406_vm0, %v1383_v9, %v1384_v23  ;;  %v6352_v55 = vsel %vm2107_vm1, %v2084_v40, %v2085_v20 }
 0x1db   : > { %7434 = vst [vmem:[#allocation44_spill] sm:$0xff] %v6339_v51  ;;  %v702_v33 = vadd.f32 %v701_v32, %v6086_v25  ;;  %v703_v47 = vpop.f32.mrb[33].mxu0  ;;  %7435 = vst [vmem:[#allocation45_spill] sm:$0xff] %v6352_v55 }
 0x1dc   : > { %v704_v27 = vadd.f32 %v703_v47, %v6079_v14  ;;  %v705_v31 = vpop.f32.mrb[34].mxu0  ;;  %v6357_v51 = vsel %vm1406_vm0, %v1384_v23, %v1385_v11  ;;  %v6369_v47 = vsel %vm2107_vm1, %v2085_v20, %v2086_v49 }
 0x1dd   : > { %v706_v45 = vadd.f32 %v705_v31, %v6086_v25  ;;  %v707_v4 = vpop.f32.mrb[35].mxu0  ;;  %7437 = vst [vmem:[#allocation47_spill] sm:$0xff] %v6369_v47  ;;  %v828_v48 = vmax.f32 %v702_v33, 0.0 }
 0x1de   : > { %v6364_v0 = vmax.f32 %v704_v27, 0.0  ;;  %v708_v40 = vadd.f32 %v707_v4, %v6079_v14 }
 0x1df   : > { %v830_v23 = vmax.f32 %v706_v45, 0.0 }
 0x1e0   : > { %7436 = vst [vmem:[#allocation46_spill] sm:$0xff] %v6364_v0  ;;  %v1386_v6 = vrot.slane %v6364_v0, 7  ;;  %v2087_v9 = vrot.slane %v6364_v0, 1  ;;  %v6373_v43 = vmax.f32 %v708_v40, 0.0 }
 0x1e1   : > { %v6375_v31 = vpack.c.bf16 %v830_v23, %v828_v48 }
 0x1e2   : > { %7438 = vst [vmem:[#allocation48_spill] sm:$0xff] %v6373_v43  ;;  %v1387_v32 = vrot.slane %v6373_v43, 7  ;;  %v2088_v27 = vrot.slane %v6373_v43, 1  ;;  %v711_v55 = vpop.f32.mrb[36].mxu0  ;;  %v6381_v4 = vsel %vm1406_vm0, %v1385_v11, %v1386_v6  ;;  %v6388_v40 = vsel %vm2107_vm1, %v2086_v49, %v2087_v9 }
 0x1e3   : > { %7439 = vst [vmem:[#allocation49_spill] sm:$0xff] %v6375_v31  ;;  %v712_v20 = vadd.f32 %v711_v55, %v6086_v25  ;;  %v713_v33 = vpop.f32.mrb[37].mxu0  ;;  %7440 = vst [vmem:[#allocation50_spill] sm:$0xff] %v6388_v40 }
 0x1e4   : > { %v714_v48 = vadd.f32 %v713_v33, %v6079_v14  ;;  %v715_v23 = vpop.f32.mrb[38].mxu0  ;;  %v6393_v31 = vsel %vm1406_vm0, %v1386_v6, %v1387_v32  ;;  %v6405_v33 = vsel %vm2107_vm1, %v2087_v9, %v2088_v27 }
 0x1e5   : > { %v716_v37 = vadd.f32 %v715_v23, %v6086_v25  ;;  %v717_v45 = vpop.f32.mrb[39].mxu0  ;;  %7442 = vst [vmem:[#allocation52_spill] sm:$0xff] %v6405_v33  ;;  %v832_v50 = vmax.f32 %v712_v20, 0.0 }
 0x1e6   : > { %v6400_v21 = vmax.f32 %v714_v48, 0.0  ;;  %v718_v49 = vadd.f32 %v717_v45, %v6079_v14 }
 0x1e7   : > { %v834_v6 = vmax.f32 %v716_v37, 0.0 }
 0x1e8   : > { %7441 = vst [vmem:[#allocation51_spill] sm:$0xff] %v6400_v21  ;;  %v1388_v17 = vrot.slane %v6400_v21, 7  ;;  %v2089_v11 = vrot.slane %v6400_v21, 1  ;;  %v6409_v47 = vmax.f32 %v718_v49, 0.0 }
 0x1e9   : > { %v6411_v23 = vpack.c.bf16 %v834_v6, %v832_v50 }
 0x1ea   : > { %7443 = vst [vmem:[#allocation53_spill] sm:$0xff] %v6409_v47  ;;  %v1389_v55 = vrot.slane %v6409_v47, 7  ;;  %v2090_v48 = vrot.slane %v6409_v47, 1  ;;  %v721_v40 = vpop.f32.mrb[40].mxu0  ;;  %v6417_v45 = vsel %vm1406_vm0, %v1387_v32, %v1388_v17  ;;  %v6424_v49 = vsel %vm2107_vm1, %v2088_v27, %v2089_v11 }
 0x1eb   : > { %7444 = vst [vmem:[#allocation54_spill] sm:$0xff] %v6411_v23  ;;  %v722_v9 = vadd.f32 %v721_v40, %v6086_v25  ;;  %v723_v20 = vpop.f32.mrb[41].mxu0  ;;  %7445 = vst [vmem:[#allocation55_spill] sm:$0xff] %v6424_v49 }
 0x1ec   : > { %v724_v50 = vadd.f32 %v723_v20, %v6079_v14  ;;  %v725_v6 = vpop.f32.mrb[42].mxu0  ;;  %v6429_v23 = vsel %vm1406_vm0, %v1388_v17, %v1389_v55  ;;  %v6435_v37 = vsel %vm2107_vm1, %v2089_v11, %v2090_v48 }
 0x1ed   : > { %7446 = vst [vmem:[#allocation56_spill] sm:$0xff] %v6435_v37  ;;  %v726_v40 = vadd.f32 %v725_v6, %v6086_v25  ;;  %v727_v54 = vpop.f32.mrb[43].mxu0  ;;  %v836_v60 = vmax.f32 %v722_v9, 0.0 }
 0x1ee   : > { %v6440_v38 = vmax.f32 %v724_v50, 0.0  ;;  %v728_v20 = vadd.f32 %v727_v54, %v6079_v14 }
 0x1ef   : > { %v838_v17 = vmax.f32 %v726_v40, 0.0 }
 0x1f0   : > { %7447 = vst [vmem:[#allocation57_spill] sm:$0xff] %v6440_v38  ;;  %v1390_v59 = vrot.slane %v6440_v38, 7  ;;  %v2091_v32 = vrot.slane %v6440_v38, 1  ;;  %v6445_v33 = vmax.f32 %v728_v20, 0.0 }
 0x1f1   : > { %v6447_v11 = vpack.c.bf16 %v838_v17, %v836_v60 }
 0x1f2   : > { %7448 = vst [vmem:[#allocation58_spill] sm:$0xff] %v6445_v33  ;;  %v1391_v6 = vrot.slane %v6445_v33, 7  ;;  %v2092_v49 = vrot.slane %v6445_v33, 1  ;;  %v731_v15 = vpop.f32.mrb[44].mxu0  ;;  %v6453_v50 = vsel %vm1406_vm0, %v1389_v55, %v1390_v59  ;;  %v6460_v20 = vsel %vm2107_vm1, %v2090_v48, %v2091_v32 }
 0x1f3   : > { %7449 = vst [vmem:[#allocation59_spill] sm:$0xff] %v6447_v11  ;;  %v732_v9 = vadd.f32 %v731_v15, %v6086_v25  ;;  %v733_v40 = vpop.f32.mrb[45].mxu0  ;;  %7450 = vst [vmem:[#allocation60_spill] sm:$0xff] %v6460_v20 }
 0x1f4   : > { %v734_v60 = vadd.f32 %v733_v40, %v6079_v14  ;;  %v735_v17 = vpop.f32.mrb[46].mxu0  ;;  %v6465_v27 = vsel %vm1406_vm0, %v1390_v59, %v1391_v6  ;;  %v6471_v54 = vsel %vm2107_vm1, %v2091_v32, %v2092_v49 }
 0x1f5   : > { %7451 = vst [vmem:[#allocation61_spill] sm:$0xff] %v6471_v54  ;;  %v736_v15 = vadd.f32 %v735_v17, %v6086_v25  ;;  %v737_v11 = vpop.f32.mrb[47].mxu0  ;;  %v840_v57 = vmax.f32 %v732_v9, 0.0 }
 0x1f6   : > { %v6476_v5 = vmax.f32 %v734_v60, 0.0  ;;  %v738_v40 = vadd.f32 %v737_v11, %v6079_v14 }
 0x1f7   : > { %v842_v59 = vmax.f32 %v736_v15, 0.0 }
 0x1f8   : > { %7452 = vst [vmem:[#allocation62_spill] sm:$0xff] %v6476_v5  ;;  %v1392_v38 = vrot.slane %v6476_v5, 7  ;;  %v2093_v55 = vrot.slane %v6476_v5, 1  ;;  %v6481_v37 = vmax.f32 %v738_v40, 0.0 }
 0x1f9   : > { %v6483_v32 = vpack.c.bf16 %v842_v59, %v840_v57 }
 0x1fa   : > { %7453 = vst [vmem:[#allocation63_spill] sm:$0xff] %v6481_v37  ;;  %v1393_v17 = vrot.slane %v6481_v37, 7  ;;  %v2094_v20 = vrot.slane %v6481_v37, 1  ;;  %v741_v33 = vpop.f32.mrb[48].mxu0  ;;  %v6489_v60 = vsel %vm1406_vm0, %v1391_v6, %v1392_v38  ;;  %v6496_v40 = vsel %vm2107_vm1, %v2092_v49, %v2093_v55 }
 0x1fb   : > { %7454 = vst [vmem:[#allocation64_spill] sm:$0xff] %v6483_v32  ;;  %v742_v9 = vadd.f32 %v741_v33, %v6086_v25  ;;  %v743_v15 = vpop.f32.mrb[49].mxu0  ;;  %7455 = vst [vmem:[#allocation65_spill] sm:$0xff] %v6496_v40 }
 0x1fc   : > { %v744_v57 = vadd.f32 %v743_v15, %v6079_v14  ;;  %v745_v59 = vpop.f32.mrb[50].mxu0  ;;  %v6501_v48 = vsel %vm1406_vm0, %v1392_v38, %v1393_v17  ;;  %v6507_v11 = vsel %vm2107_vm1, %v2093_v55, %v2094_v20 }
 0x1fd   : > { %7456 = vst [vmem:[#allocation66_spill] sm:$0xff] %v6507_v11  ;;  %v746_v33 = vadd.f32 %v745_v59, %v6086_v25  ;;  %v747_v32 = vpop.f32.mrb[51].mxu0  ;;  %v844_v37 = vmax.f32 %v742_v9, 0.0 }
 0x1fe   : > { %v6512_v5 = vmax.f32 %v744_v57, 0.0  ;;  %v748_v15 = vadd.f32 %v747_v32, %v6079_v14 }
 0x1ff   : > { %v846_v38 = vmax.f32 %v746_v33, 0.0 }
 0x200   : > { %7457 = vst [vmem:[#allocation67_spill] sm:$0xff] %v6512_v5  ;;  %v1394_v21 = vrot.slane %v6512_v5, 7  ;;  %v2095_v6 = vrot.slane %v6512_v5, 1  ;;  %v6517_v54 = vmax.f32 %v748_v15, 0.0 }
 0x201   : > { %v6519_v55 = vpack.c.bf16 %v846_v38, %v844_v37 }
 0x202   : > { %7458 = vst [vmem:[#allocation68_spill] sm:$0xff] %v6517_v54  ;;  %v1395_v59 = vrot.slane %v6517_v54, 7  ;;  %v2096_v40 = vrot.slane %v6517_v54, 1  ;;  %v751_v47 = vpop.f32.mrb[52].mxu0  ;;  %v6525_v57 = vsel %vm1406_vm0, %v1393_v17, %v1394_v21  ;;  %v6532_v15 = vsel %vm2107_vm1, %v2094_v20, %v2095_v6 }
 0x203   : > { %7459 = vst [vmem:[#allocation69_spill] sm:$0xff] %v6519_v55  ;;  %v752_v9 = vadd.f32 %v751_v47, %v6086_v25  ;;  %v753_v33 = vpop.f32.mrb[53].mxu0  ;;  %7460 = vst [vmem:[#allocation70_spill] sm:$0xff] %v6532_v15 }
 0x204   : > { %v754_v37 = vadd.f32 %v753_v33, %v6079_v14  ;;  %v755_v38 = vpop.f32.mrb[54].mxu0  ;;  %v6537_v49 = vsel %vm1406_vm0, %v1394_v21, %v1395_v59  ;;  %v6543_v32 = vsel %vm2107_vm1, %v2095_v6, %v2096_v40 }
 0x205   : > { %7461 = vst [vmem:[#allocation71_spill] sm:$0xff] %v6543_v32  ;;  %v756_v47 = vadd.f32 %v755_v38, %v6086_v25  ;;  %v757_v55 = vpop.f32.mrb[55].mxu0  ;;  %v848_v54 = vmax.f32 %v752_v9, 0.0 }
 0x206   : > { %v6548_v5 = vmax.f32 %v754_v37, 0.0  ;;  %v758_v33 = vadd.f32 %v757_v55, %v6079_v14 }
 0x207   : > { %v850_v21 = vmax.f32 %v756_v47, 0.0 }
 0x208   : > { %7462 = vst [vmem:[#allocation72_spill] sm:$0xff] %v6548_v5  ;;  %v1396_v0 = vrot.slane %v6548_v5, 7  ;;  %v2097_v17 = vrot.slane %v6548_v5, 1  ;;  %v6553_v11 = vmax.f32 %v758_v33, 0.0 }
 0x209   : > { %v6555_v6 = vpack.c.bf16 %v850_v21, %v848_v54 }
 0x20a   : > { %7463 = vst [vmem:[#allocation73_spill] sm:$0xff] %v6553_v11  ;;  %v1397_v38 = vrot.slane %v6553_v11, 7  ;;  %v2098_v15 = vrot.slane %v6553_v11, 1  ;;  %v761_v43 = vpop.f32.mrb[56].mxu0  ;;  %v6561_v37 = vsel %vm1406_vm0, %v1395_v59, %v1396_v0  ;;  %v6568_v33 = vsel %vm2107_vm1, %v2096_v40, %v2097_v17 }
 0x20b   : > { %7464 = vst [vmem:[#allocation74_spill] sm:$0xff] %v6555_v6  ;;  %v762_v9 = vadd.f32 %v761_v43, %v6086_v25  ;;  %v763_v47 = vpop.f32.mrb[57].mxu0  ;;  %7465 = vst [vmem:[#allocation75_spill] sm:$0xff] %v6568_v33 }
 0x20c   : > { %v764_v54 = vadd.f32 %v763_v47, %v6079_v14  ;;  %v765_v21 = vpop.f32.mrb[58].mxu0  ;;  %v6573_v20 = vsel %vm1406_vm0, %v1396_v0, %v1397_v38  ;;  %v6579_v55 = vsel %vm2107_vm1, %v2097_v17, %v2098_v15 }
 0x20d   : > { %7466 = vst [vmem:[#allocation76_spill] sm:$0xff] %v6579_v55  ;;  %v766_v43 = vadd.f32 %v765_v21, %v6086_v25  ;;  %v767_v6 = vpop.f32.mrb[59].mxu0  ;;  %v852_v11 = vmax.f32 %v762_v9, 0.0 }
 0x20e   : > { %v6584_v5 = vmax.f32 %v764_v54, 0.0  ;;  %v768_v47 = vadd.f32 %v767_v6, %v6079_v14 }
 0x20f   : > { %v854_v0 = vmax.f32 %v766_v43, 0.0 }
 0x210   : > { %7467 = vst [vmem:[#allocation77_spill] sm:$0xff] %v6584_v5  ;;  %v1398_v58 = vrot.slane %v6584_v5, 7  ;;  %v2099_v59 = vrot.slane %v6584_v5, 1  ;;  %v6589_v32 = vmax.f32 %v768_v47, 0.0 }
 0x211   : > { %v6591_v17 = vpack.c.bf16 %v854_v0, %v852_v11 }
 0x212   : > { %7468 = vst [vmem:[#allocation78_spill] sm:$0xff] %v6589_v32  ;;  %v1399_v21 = vrot.slane %v6589_v32, 7  ;;  %v2100_v33 = vrot.slane %v6589_v32, 1  ;;  %v771_v61 = vpop.f32.mrb[60].mxu0  ;;  %v6597_v54 = vsel %vm1406_vm0, %v1397_v38, %v1398_v58  ;;  %v6604_v47 = vsel %vm2107_vm1, %v2098_v15, %v2099_v59 }
 0x213   : > { %7469 = vst [vmem:[#allocation79_spill] sm:$0xff] %v6591_v17  ;;  %v772_v9 = vadd.f32 %v771_v61, %v6086_v25  ;;  %v773_v43 = vpop.f32.mrb[61].mxu0  ;;  %7470 = vst [vmem:[#allocation80_spill] sm:$0xff] %v6604_v47 }
 0x214   : > { %v774_v11 = vadd.f32 %v773_v43, %v6079_v14  ;;  %v775_v0 = vpop.f32.mrb[62].mxu0  ;;  %v6609_v40 = vsel %vm1406_vm0, %v1398_v58, %v1399_v21  ;;  %v6615_v6 = vsel %vm2107_vm1, %v2099_v59, %v2100_v33 }
 0x215   : > { %7471 = vst [vmem:[#allocation81_spill] sm:$0xff] %v6615_v6  ;;  %v776_v61 = vadd.f32 %v775_v0, %v6086_v25  ;;  %v777_v17 = vpop.f32.mrb[63].mxu0  ;;  %v856_v32 = vmax.f32 %v772_v9, 0.0 }
 0x216   : > { %v6620_v5 = vmax.f32 %v774_v11, 0.0  ;;  %v778_v43 = vadd.f32 %v777_v17, %v6079_v14 }
 0x217   : > { %v858_v58 = vmax.f32 %v776_v61, 0.0 }
 0x218   : > { %7472 = vst [vmem:[#allocation82_spill] sm:$0xff] %v6620_v5  ;;  %v1400_v30 = vrot.slane %v6620_v5, 7  ;;  %v2101_v38 = vrot.slane %v6620_v5, 1  ;;  %v6625_v55 = vmax.f32 %v778_v43, 0.0 }
 0x219   : > { %v6627_v59 = vpack.c.bf16 %v858_v58, %v856_v32 }
 0x21a   : > { %7473 = vst [vmem:[#allocation83_spill] sm:$0xff] %v6625_v55  ;;  %v1401_v0 = vrot.slane %v6625_v55, 7  ;;  %v2102_v47 = vrot.slane %v6625_v55, 1  ;;  %v781_v16 = vpop.f32.mrb[64].mxu0  ;;  %v6633_v11 = vsel %vm1406_vm0, %v1399_v21, %v1400_v30  ;;  %v6640_v43 = vsel %vm2107_vm1, %v2100_v33, %v2101_v38 }
 0x21b   : > { %7474 = vst [vmem:[#allocation84_spill] sm:$0xff] %v6627_v59  ;;  %v782_v9 = vadd.f32 %v781_v16, %v6086_v25  ;;  %v783_v61 = vpop.f32.mrb[65].mxu0  ;;  %7475 = vst [vmem:[#allocation85_spill] sm:$0xff] %v6640_v43 }
 0x21c   : > { %v784_v32 = vadd.f32 %v783_v61, %v6079_v14  ;;  %v785_v58 = vpop.f32.mrb[66].mxu0  ;;  %v6645_v15 = vsel %vm1406_vm0, %v1400_v30, %v1401_v0  ;;  %v6651_v17 = vsel %vm2107_vm1, %v2101_v38, %v2102_v47 }
 0x21d   : > { %7476 = vst [vmem:[#allocation86_spill] sm:$0xff] %v6651_v17  ;;  %v786_v16 = vadd.f32 %v785_v58, %v6086_v25  ;;  %v787_v59 = vpop.f32.mrb[67].mxu0  ;;  %v860_v55 = vmax.f32 %v782_v9, 0.0  ;;  %v869_v25 = vadd.s32 16, %v6073_v10 }
 0x21e   : > { %v6656_v5 = vmax.f32 %v784_v32, 0.0  ;;  %v788_v61 = vadd.f32 %v787_v59, %v6079_v14 }
 0x21f   : > { %v862_v30 = vmax.f32 %v786_v16, 0.0 }
 0x220   : > { %7477 = vst [vmem:[#allocation87_spill] sm:$0xff] %v6656_v5  ;;  %v1402_v18 = vrot.slane %v6656_v5, 7  ;;  %v2103_v21 = vrot.slane %v6656_v5, 1  ;;  %v6661_v6 = vmax.f32 %v788_v61, 0.0  ;;  %v871_v61 = vadd.s32 32, %v6073_v10 }
 0x221   : > { %v6663_v38 = vpack.c.bf16 %v862_v30, %v860_v55  ;;  %v907_v5 = vand.u32 15, %v6073_v10 }
 0x222   : > { %7478 = vst [vmem:[#allocation88_spill] sm:$0xff] %v6661_v6  ;;  %v1403_v58 = vrot.slane %v6661_v6, 7  ;;  %v2104_v33 = vrot.slane %v6661_v6, 1  ;;  %v791_v32 = vpop.f32.mrb[68].mxu0  ;;  %v6670_v59 = vsel %vm1406_vm0, %v1401_v0, %v1402_v18  ;;  %v6677_v55 = vsel %vm2107_vm1, %v2102_v47, %v2103_v21 }
 0x223   : > { %7479 = vst [vmem:[#allocation89_spill] sm:$0xff] %v6663_v38  ;;  %v792_v16 = vpop.f32.mrb[69].mxu0  ;;  %7480 = vst [vmem:[#allocation90_spill] sm:$0xff] %v6677_v55  ;;  %v921_v6 = vand.u32 15, %v869_v25  ;;  %vm4526_vm2 = vcmp.ne.s32.totalorder %v907_v5, 0  ;;  %v873_v25 = vadd.s32 48, %v6073_v10 }
 0x224   : > { %v793_v30 = vadd.f32 %v792_v16, %v6079_v14  ;;  %v794_v38 = vpop.f32.mrb[70].mxu0  ;;  %v6682_v32 = vsel %vm1406_vm0, %v1402_v18, %v1403_v58  ;;  %v6688_v9 = vsel %vm2107_vm1, %v2103_v21, %v2104_v33  ;;  %v935_v18 = vand.u32 15, %v871_v61  ;;  %vm4318_vm6 = vmpackc.low %vm5723_vm5, %vm4526_vm2 }
 0x225   : > { %v795_v43 = vpop.f32.mrb[71].mxu0  ;;  %vm6700_vm3 = vcmp.ne.s32.totalorder %v921_v6, 0  ;;  %v875_v5 = vadd.s32 64, %v6073_v10  ;;  %v7483_v61 = vrot.slane %v6083_v22, 7  ;;  %v7484_v55 = vrot.slane %v6083_v22, 1 }
 0x226   : > { %v6693_v16 = vmax.f32 %v793_v30, 0.0  ;;  %v796_v38 = vadd.f32 %v795_v43, %v6079_v14  ;;  %vm4528_vm4 = vcmp.ne.s32.totalorder %v935_v18, 0  ;;  %vm4322_vm7 = vmpackc.low %vm5723_vm5, %vm6700_vm3  ;;  %v7486_v18 = vpack.c.bf16 %v6177_v29, %v6169_v19 }
 0x227   : > { %vm4326_vm8 = vmpackc.low %vm5723_vm5, %vm4528_vm4  ;;  %v963_v21 = vand.u32 15, %v875_v5  ;;  %v7487_v19 = vpack.c.bf16 %v6213_v63, %v6201_v52  ;;  %v7488_v29 = vpack.c.bf16 %v6249_v62, %v6237_v41  ;;  %v881_v5 = vadd.s32 112, %v6073_v10  ;;  %v5396_v63 = vld [vmem:[#allocation7 + $0x68] sm:$0xff]  }
 0x228   : > { %v1404_v3 = vrot.slane %v6693_v16, 7  ;;  %v2105_v0 = vrot.slane %v6693_v16, 1  ;;  %v6698_v17 = vmax.f32 %v796_v38, 0.0  ;;  %v7489_v41 = vpack.c.bf16 %v6285_v42, %v6273_v7  ;;  %v5398_v7 = vld [vmem:[#allocation7 + $0x78] sm:$0xff]  }
 0x229   : > { %vm4530_vm10 = vcmp.ne.s32.totalorder %v963_v21, 0  ;;  %v1005_v52 = vand.u32 15, %v881_v5  ;;  %v7490_v62 = vpack.c.bf16 %v6321_v34, %v6309_v24  ;;  %v5397_v21 = vld [vmem:[#allocation7 + $0x70] sm:$0xff]   ;;  %v7491_v34 = vpack.c.bf16 %v6357_v51, %v6345_v53 }
 0x22a   : > { %v1405_v47 = vrot.slane %v6698_v17, 7  ;;  %v2106_v30 = vrot.slane %v6698_v17, 1  ;;  %v6709_v14 = vsel %vm1406_vm0, %v1403_v58, %v1404_v3  ;;  %v6716_v6 = vsel %vm2107_vm1, %v2104_v33, %v2105_v0  ;;  %vm4334_vm12 = vmpackc.low %vm5723_vm5, %vm4530_vm10 }
 0x22b   : > { %v7492_v24 = vpack.c.bf16 %v6393_v31, %v6381_v4  ;;  %v7493_v31 = vpack.c.bf16 %v6429_v23, %v6417_v45  ;;  %v7494_v4 = vpack.c.bf16 %v6465_v27, %v6453_v50  ;;  %v7495_v23 = vpack.c.bf16 %v6501_v48, %v6489_v60 }
 0x22c   : > { %v1442_v38 = vsel %vm1406_vm0, %v1405_v47, %v7483_v61  ;;  %v6725_v58 = vsel %vm1406_vm0, %v1404_v3, %v1405_v47  ;;  %v6731_v43 = vsel %vm2107_vm1, %v2105_v0, %v2106_v30  ;;  %v6743_v3 = vsel %vm2107_vm1, %v2106_v30, %v7484_v55  ;;  %v5392_v0 = vld [vmem:[#allocation7 + $0x48] sm:$0xff]  }
 0x22d   : > { %v4319_v33 = vpack.c.bf16 %v6101_v36, %v1442_v38  ;;  %v4387_v61 = vpack.c.bf16 %v6725_v58, %v6709_v14  ;;  %v949_v47 = vand.u32 15, %v873_v25  ;;  %v4475_v36 = vpack.c.bf16 %v6743_v3, %v6731_v43  ;;  %v5393_v25 = vld [vmem:[#allocation7 + $0x50] sm:$0xff]   ;;  %v7507_v14 = vld [vmem:[#allocation31_spill] sm:$0xff] }
 0x22e   : > { %v7485_v38 = vpack.c.bf16 %v6137_v1, %v6122_v56  ;;  %v877_v55 = vadd.s32 80, %v6073_v10  ;;  %v879_v30 = vadd.s32 96, %v6073_v10  ;;  %v5394_v1 = vld [vmem:[#allocation7 + $0x58] sm:$0xff]   ;;  %vm4533_vm1 = vcmp.ne.s32.totalorder %v1005_v52, 0 }
 0x22f   : > { %4840 = vmatprep.mubr.msk.bf16.mxu1 %vm4318_vm6, %v4319_v33  ;;  %vm4529_vm9 = vcmp.ne.s32.totalorder %v949_v47, 0  ;;  %v883_v33 = vadd.s32 128, %v6073_v10  ;;  %vm4346_vm3 = vmpackc.low %vm5723_vm5, %vm4533_vm1  ;;  %v7496_v45 = vpack.c.bf16 %v6537_v49, %v6525_v57  ;;  %v897_v27 = vadd.s32 240, %v6073_v10  ;;  %v5406_v52 = vld [vmem:[#allocation7 + $0xb8] sm:$0xff]  }
 0x230   : > { %4841 = vmatmul.mubr.msk.bf16.vlgmr.msra.gmra.mrb[0].mxu1 %vm4322_vm7, %v7485_v38  ;;  %vm4330_vm11 = vmpackc.low %vm5723_vm5, %vm4529_vm9  ;;  %v977_v56 = vand.u32 15, %v877_v55  ;;  %v887_v38 = vadd.s32 160, %v6073_v10  ;;  %v899_v50 = vadd.s32 256, %v6073_v10  ;;  %v7497_v48 = vpack.c.bf16 %v6573_v20, %v6561_v37 }
 0x231   : > { %4877 = vmatpush3.bf16.msra.mxu1 %v6150_v8  ;;  %4844 = vmatprep.mubr.msk.bf16.mxu1 %vm4326_vm8, %v7486_v18  ;;  %v991_v8 = vand.u32 15, %v879_v30  ;;  %v5395_v18 = vld [vmem:[#allocation7 + $0x60] sm:$0xff]   ;;  %v1019_v47 = vand.u32 15, %v883_v33  ;;  %v1117_v5 = vand.u32 15, %v897_v27  ;;  %v7498_v60 = vpack.c.bf16 %v6609_v40, %v6597_v54  ;;  %v5400_v40 = vld [vmem:[#allocation7 + $0x88] sm:$0xff]  }
 0x232   : > { %4878 = vmatprep.subr.bf16.mxu1 %v5392_v0  ;;  %vm4531_vm13 = vcmp.ne.s32.totalorder %v977_v56, 0  ;;  %v1047_v55 = vand.u32 15, %v887_v38  ;;  %v5399_v30 = vld [vmem:[#allocation7 + $0x80] sm:$0xff]   ;;  %v891_v56 = vadd.s32 192, %v6073_v10  ;;  %v901_v49 = vadd.s32 272, %v6073_v10  ;;  %v7518_v38 = vld [vmem:[#allocation53_spill] sm:$0xff] }
 0x233   : > { %vm4532_vm14 = vcmp.ne.s32.totalorder %v991_v8, 0  ;;  %vm4338_vm15 = vmpackc.low %vm5723_vm5, %vm4531_vm13  ;;  %vm4534_vm2 = vcmp.ne.s32.totalorder %v1019_v47, 0  ;;  %v895_v8 = vadd.s32 224, %v6073_v10  ;;  %v7499_v33 = vpack.c.bf16 %v6645_v15, %v6633_v11  ;;  %v5401_v11 = vld [vmem:[#allocation7 + $0x90] sm:$0xff]  }
 0x234   : > { %vm4342_vm0 = vmpackc.low %vm5723_vm5, %vm4532_vm14  ;;  %vm4536_vm7 = vcmp.ne.s32.totalorder %v1047_v55, 0  ;;  %v1075_v53 = vand.u32 15, %v891_v56  ;;  %v1145_v57 = vand.u32 15, %v901_v49  ;;  %v7500_v20 = vpack.c.bf16 %v6682_v32, %v6670_v59  ;;  %v5402_v59 = vld [vmem:[#allocation7 + $0x98] sm:$0xff]   ;;  %v7513_v47 = vld [vmem:[#allocation41_spill] sm:$0xff] }
 0x235   : > { %4879 = vmatpush3.bf16.msra.mxu1 %v5392_v0  ;;  %v885_v0 = vadd.s32 144, %v6073_v10  ;;  %vm4350_vm4 = vmpackc.low %vm5723_vm5, %vm4534_vm2  ;;  %vm4541_vm2 = vcmp.ne.s32.totalorder %v1117_v5, 0  ;;  %v7501_v37 = vpack.c.bf16 %v6088_v26, %v6083_v22  ;;  %v7502_v54 = vpack.c.bf16 %v6109_v46, %v6104_v39  ;;  %v5403_v26 = vld [vmem:[#allocation7 + $0xa0] sm:$0xff]   ;;  %v5404_v39 = vld [vmem:[#allocation7 + $0xa8] sm:$0xff]  }
 0x236   : > { %4880 = vmatprep.subr.bf16.mxu1 %v5393_v25  ;;  %vm4358_vm9 = vmpackc.low %vm5723_vm5, %vm4536_vm7  ;;  %vm4543_vm7 = vcmp.ne.s32.totalorder %v1145_v57, 0  ;;  %v7503_v15 = vpack.c.bf16 %v6156_v13, %v6139_v2  ;;  %v7504_v32 = vpack.c.bf16 %v6193_v44, %v6184_v35  ;;  %v7505_v22 = vpack.c.bf16 %v6229_v28, %v6220_v12  ;;  %v5407_v46 = vld [vmem:[#allocation8 + $0x40] sm:$0xff]   ;;  %v5408_v2 = vld [vmem:[#allocation8 + $0x48] sm:$0xff]  }
 0x237   : > { %v1033_v42 = vand.u32 15, %v885_v0  ;;  %v7506_v13 = vld [vmem:[#allocation33_spill] sm:$0xff]  ;;  %4980 = vmatprep.subr.bf16.mxu0 %v5407_v46  ;;  %v7510_v35 = vld [vmem:[#allocation36_spill] sm:$0xff]  ;;  %v7516_v0 = vld [vmem:[#allocation46_spill] sm:$0xff]  ;;  %v870_v57 = vadd.s32 24, %v6073_v10 }
 0x238   : > { %4845 = vmatmul.mubr.msk.bf16.gmra.mrb[4].mxu1 %vm4330_vm11, %v7487_v19  ;;  %vm4538_vm11 = vcmp.ne.s32.totalorder %v1075_v53, 0  ;;  %v7508_v58 = vpack.c.bf16 %v7506_v13, %v7507_v14  ;;  %v5405_v12 = vld [vmem:[#allocation7 + $0xb0] sm:$0xff]   ;;  %4981 = vmatpush3.bf16.msra.mxu0 %v5407_v46  ;;  %v7521_v55 = vld [vmem:[#allocation58_spill] sm:$0xff]  ;;  %v7528_v53 = vld [vmem:[#allocation67_spill] sm:$0xff]  ;;  %v878_v14 = vadd.s32 88, %v6073_v10 }
 0x239   : > { %4848 = vmatprep.mubr.msk.bf16.mxu1 %vm4334_vm12, %v7488_v29  ;;  %4881 = vmatpush3.bf16.msra.mxu1 %v5393_v25  ;;  %vm4535_vm6 = vcmp.ne.s32.totalorder %v1033_v42, 0  ;;  %v889_v25 = vadd.s32 176, %v6073_v10  ;;  %vm4366_vm13 = vmpackc.low %vm5723_vm5, %vm4538_vm11  ;;  %v1103_v29 = vand.u32 15, %v895_v8  ;;  %v5409_v28 = vld [vmem:[#allocation8 + $0x50] sm:$0xff]   ;;  %v7519_v42 = vld [vmem:[#allocation51_spill] sm:$0xff] }
 0x23a   : > { %4882 = vmatprep.subr.bf16.mxu1 %v5394_v1  ;;  %vm4354_vm8 = vmpackc.low %vm5723_vm5, %vm4535_vm6  ;;  %4982 = vmatprep.subr.bf16.mxu0 %v5408_v2  ;;  %v7537_v5 = vld [vmem:[#allocation82_spill] sm:$0xff]  ;;  %v7547_v46 = vld [vmem:[#allocation21_spill] sm:$0xff] }
 0x23b   : > { %v1061_v51 = vand.u32 15, %v889_v25  ;;  %v7524_v25 = vld [vmem:[#allocation63_spill] sm:$0xff] }
 0x23c   : > { %4983 = vmatpush3.bf16.msra.mxu0 %v5408_v2  ;;  %v7550_v2 = vld [vmem:[#allocation25_spill] sm:$0xff] }
 0x23d   : > { %4883 = vmatpush3.bf16.msra.mxu1 %v5394_v1  ;;  %vm4537_vm10 = vcmp.ne.s32.totalorder %v1061_v51, 0  ;;  %v893_v1 = vadd.s32 208, %v6073_v10  ;;  %4984 = vmatprep.subr.bf16.mxu0 %v5409_v28  ;;  %v7527_v51 = vld [vmem:[#allocation68_spill] sm:$0xff] }
 0x23e   : > { %4884 = vmatprep.subr.bf16.mxu1 %v5395_v18  ;;  %vm4362_vm12 = vmpackc.low %vm5723_vm5, %vm4537_vm10 }
 0x23f   : > { %v1089_v19 = vand.u32 15, %v893_v1  ;;  %v7531_v1 = vld [vmem:[#allocation72_spill] sm:$0xff] }
 0x240   : > { %4849 = vmatmul.mubr.msk.bf16.gmra.mrb[8].mxu1 %vm4338_vm15, %v7489_v41  ;;  %vm4540_vm15 = vcmp.ne.s32.totalorder %v1103_v29, 0  ;;  %4985 = vmatpush3.bf16.msra.mxu0 %v5409_v28  ;;  %v7534_v29 = vld [vmem:[#allocation77_spill] sm:$0xff] }
 0x241   : > { %4852 = vmatprep.mubr.msk.bf16.mxu1 %vm4342_vm0, %v7490_v62  ;;  %4885 = vmatpush3.bf16.msra.mxu1 %v5395_v18  ;;  %vm4539_vm14 = vcmp.ne.s32.totalorder %v1089_v19, 0  ;;  %vm4374_vm1 = vmpackc.low %vm5723_vm5, %vm4540_vm15  ;;  %v1131_v18 = vand.u32 15, %v899_v50  ;;  %v7515_v62 = vld [vmem:[#allocation48_spill] sm:$0xff]  ;;  %v7533_v19 = vld [vmem:[#allocation78_spill] sm:$0xff] }
 0x242   : > { %4886 = vmatprep.subr.bf16.mxu1 %v5396_v63  ;;  %vm4370_vm0 = vmpackc.low %vm5723_vm5, %vm4539_vm14  ;;  %v7536_v50 = vld [vmem:[#allocation83_spill] sm:$0xff] }
 0x245   : > { %4887 = vmatpush3.bf16.msra.mxu1 %v5396_v63  ;;  %v7512_v63 = vld [vmem:[#allocation43_spill] sm:$0xff] }
 0x246   : > { %4888 = vmatprep.subr.bf16.mxu1 %v5397_v21  ;;  %v7514_v41 = vpack.c.bf16 %v7512_v63, %v7513_v47  ;;  %v7556_v63 = vld [vmem:[#allocation32_spill] sm:$0xff] }
 0x248   : > { %4853 = vmatmul.mubr.msk.bf16.gmra.mrb[12].mxu1 %vm4346_vm3, %v7491_v34  ;;  %vm4542_vm3 = vcmp.ne.s32.totalorder %v1131_v18, 0  ;;  %v7522_v34 = vld [vmem:[#allocation57_spill] sm:$0xff]  ;;  %v7538_v18 = vpack.c.bf16 %v7536_v50, %v7537_v5  ;;  %v890_v50 = vadd.s32 184, %v6073_v10  ;;  %v892_v5 = vadd.s32 200, %v6073_v10 }
 0x249   : > { %4856 = vmatprep.mubr.msk.bf16.mxu1 %vm4350_vm4, %v7492_v24  ;;  %4889 = vmatpush3.bf16.msra.mxu1 %v5397_v21  ;;  %vm4378_vm4 = vmpackc.low %vm5723_vm5, %vm4541_vm2  ;;  %v7517_v21 = vpack.c.bf16 %v7515_v62, %v7516_v0  ;;  %v7523_v24 = vpack.c.bf16 %v7521_v55, %v7522_v34  ;;  %v884_v62 = vadd.s32 136, %v6073_v10  ;;  %v5410_v0 = vld [vmem:[#allocation8 + $0x58] sm:$0xff]   ;;  %v7559_v55 = vld [vmem:[#allocation37_spill] sm:$0xff] }
 0x24a   : > { %4890 = vmatprep.subr.bf16.mxu1 %v5398_v7  ;;  %vm4382_vm6 = vmpackc.low %vm5723_vm5, %vm4542_vm3  ;;  %4986 = vmatprep.subr.bf16.mxu0 %v5410_v0 }
 0x24b   : > { %4987 = vmatpush3.bf16.msra.mxu0 %v5410_v0 }
 0x24d   : > { %4891 = vmatpush3.bf16.msra.mxu1 %v5398_v7  ;;  %v7520_v7 = vpack.c.bf16 %v7518_v38, %v7519_v42  ;;  %v5411_v38 = vld [vmem:[#allocation8 + $0x60] sm:$0xff]   ;;  %v1026_v42 = vand.u32 15, %v884_v62  ;;  %v7591_v62 = vpack.c.bf16 %v6716_v6, %v6688_v9 }
 0x24e   : > { %4928 = vmatprep.subr.bf16.mxu1 %v5399_v30  ;;  %4988 = vmatprep.subr.bf16.mxu0 %v5411_v38 }
 0x24f   : > { %4989 = vmatpush3.bf16.msra.mxu0 %v5411_v38 }
 0x250   : > { %4857 = vmatmul.mubr.msk.bf16.gmra.mrb[16].mxu1 %vm4354_vm8, %v7493_v31  ;;  %vm4386_vm8 = vmpackc.low %vm5723_vm5, %vm4543_vm7  ;;  %v7529_v31 = vpack.c.bf16 %v7527_v51, %v7528_v53  ;;  %v886_v51 = vadd.s32 152, %v6073_v10  ;;  %v888_v53 = vadd.s32 168, %v6073_v10 }
 0x251   : > { %4860 = vmatprep.mubr.msk.bf16.mxu1 %vm4358_vm9, %v7494_v4  ;;  %v7530_v4 = vld [vmem:[#allocation73_spill] sm:$0xff] }
 0x252   : > { %v7532_v8 = vpack.c.bf16 %v7530_v4, %v7531_v1  ;;  %v1040_v4 = vand.u32 15, %v886_v51  ;;  %v1054_v1 = vand.u32 15, %v888_v53 }
 0x258   : > { %4861 = vmatmul.mubr.msk.bf16.gmra.mrb[20].mxu1 %vm4362_vm12, %v7495_v23  ;;  %v7535_v23 = vpack.c.bf16 %v7533_v19, %v7534_v29  ;;  %v7565_v19 = vld [vmem:[#allocation47_spill] sm:$0xff] }
 0x259   : > { %4864 = vmatprep.mubr.msk.bf16.mxu1 %vm4366_vm13, %v7496_v45  ;;  %v868_v45 = vadd.s32 8, %v6073_v10 }
 0x25b   : > { %v914_v27 = vand.u32 15, %v868_v45  ;;  %v7568_v45 = vld [vmem:[#allocation52_spill] sm:$0xff] }
 0x25d   : > { %vm4544_vm9 = vcmp.ne.s32.totalorder %v914_v27, 15 }
 0x25e   : > { %vm4406_vm10 = vmpackc.low %vm4544_vm9, %vm5723_vm5  ;;  %vm4552_vm9 = vcmp.ne.s32.totalorder %v1026_v42, 15  ;;  %v5414_v42 = vld [vmem:[#allocation8 + $0x78] sm:$0xff]  }
 0x260   : > { %4865 = vmatmul.mubr.msk.bf16.gmra.mrb[24].mxu1 %vm4370_vm0, %v7497_v48  ;;  %v7539_v48 = vld [vmem:[#allocation88_spill] sm:$0xff] }
 0x261   : > { %4868 = vmatprep.mubr.msk.bf16.mxu1 %vm4374_vm1, %v7498_v60  ;;  %v7540_v60 = vld [vmem:[#allocation87_spill] sm:$0xff] }
 0x262   : > { %v7541_v49 = vpack.c.bf16 %v7539_v48, %v7540_v60  ;;  %v1082_v48 = vand.u32 15, %v892_v5  ;;  %v7570_v60 = vld [vmem:[#allocation60_spill] sm:$0xff] }
 0x268   : > { %4869 = vmatmul.mubr.msk.bf16.gmra.mrb[28].mxu1 %vm4378_vm4, %v7499_v33  ;;  %v872_v33 = vadd.s32 40, %v6073_v10 }
 0x269   : > { %4872 = vmatprep.mubr.msk.bf16.mxu1 %vm4382_vm6, %v7500_v20  ;;  %v928_v20 = vand.u32 15, %v870_v57 }
 0x26b   : > { %vm4545_vm11 = vcmp.ne.s32.totalorder %v928_v20, 15  ;;  %v7574_v20 = vld [vmem:[#allocation61_spill] sm:$0xff] }
 0x26c   : > { %vm4410_vm13 = vmpackc.low %vm4545_vm11, %vm5723_vm5 }
 0x26d   : > { %vm4438_vm11 = vmpackc.low %vm4552_vm9, %vm5723_vm5 }
 0x270   : > { %4873 = vmatmul.mubr.msk.bf16.gmra.mrb[32].mxu1 %vm4386_vm8, %v4387_v61  ;;  %v7509_v61 = vld [vmem:[#allocation38_spill] sm:$0xff] }
 0x271   : > { %4892 = vmatprep.mubr.bf16.mxu1 %v7501_v37  ;;  %v7511_v44 = vpack.c.bf16 %v7509_v61, %v7510_v35  ;;  %v942_v37 = vand.u32 15, %v872_v33  ;;  %v984_v61 = vand.u32 15, %v878_v14  ;;  %v7573_v33 = vld [vmem:[#allocation65_spill] sm:$0xff]  ;;  %v7582_v14 = vld [vmem:[#allocation80_spill] sm:$0xff] }
 0x273   : > { %vm4546_vm12 = vcmp.ne.s32.totalorder %v942_v37, 15  ;;  %vm4549_vm3 = vcmp.ne.s32.totalorder %v984_v61, 15  ;;  %v7575_v37 = vpack.c.bf16 %v7573_v33, %v7574_v20 }
 0x274   : > { %vm4414_vm14 = vmpackc.low %vm4546_vm12, %vm5723_vm5  ;;  %vm4553_vm12 = vcmp.ne.s32.totalorder %v1040_v4, 15 }
 0x275   : > { %vm4426_vm6 = vmpackc.low %vm4549_vm3, %vm5723_vm5 }
 0x278   : > { %4893 = vmatmul.mubr.bf16.vlgmr.msra.gmra.mrb[36].mxu1 %v7502_v54  ;;  %v7543_v54 = vld [vmem:[#allocation20_spill] sm:$0xff] }
 0x279   : > { %4929 = vmatpush3.bf16.msra.mxu1 %v5399_v30  ;;  %4896 = vmatprep.mubr.bf16.mxu1 %v7503_v15  ;;  %v7525_v30 = vld [vmem:[#allocation62_spill] sm:$0xff] }
 0x27a   : > { %4930 = vmatprep.subr.bf16.mxu1 %v5400_v40  ;;  %v7526_v56 = vpack.c.bf16 %v7524_v25, %v7525_v30  ;;  %v7544_v15 = vld [vmem:[#allocation22_spill] sm:$0xff]  ;;  %v7561_v25 = vld [vmem:[#allocation45_spill] sm:$0xff] }
 0x27b   : > { %v7562_v30 = vld [vmem:[#allocation42_spill] sm:$0xff] }
 0x27d   : > { %4931 = vmatpush3.bf16.msra.mxu1 %v5400_v40  ;;  %v7542_v40 = vpack.c.bf16 %v6698_v17, %v6693_v16  ;;  %v7549_v16 = vld [vmem:[#allocation27_spill] sm:$0xff] }
 0x27e   : > { %4932 = vmatprep.subr.bf16.mxu1 %v5401_v11  ;;  %v7551_v13 = vpack.c.bf16 %v7549_v16, %v7550_v2  ;;  %v900_v16 = vadd.s32 264, %v6073_v10 }
 0x280   : > { %4897 = vmatmul.mubr.bf16.gmra.mrb[4].mxu1 %v7504_v32  ;;  %v876_v32 = vadd.s32 72, %v6073_v10 }
 0x281   : > { %4900 = vmatprep.mubr.bf16.mxu1 %v7505_v22  ;;  %4933 = vmatpush3.bf16.msra.mxu1 %v5401_v11  ;;  %v7545_v11 = vpack.c.bf16 %v7543_v54, %v7544_v15  ;;  %v896_v54 = vadd.s32 232, %v6073_v10 }
 0x282   : > { %4934 = vmatprep.subr.bf16.mxu1 %v5402_v59 }
 0x285   : > { %4935 = vmatpush3.bf16.msra.mxu1 %v5402_v59  ;;  %v874_v59 = vadd.s32 56, %v6073_v10 }
 0x286   : > { %4936 = vmatprep.subr.bf16.mxu1 %v5403_v26 }
 0x287   : > { %v956_v22 = vand.u32 15, %v874_v59  ;;  %v7576_v59 = vld [vmem:[#allocation70_spill] sm:$0xff] }
 0x288   : > { %4901 = vmatmul.mubr.bf16.gmra.mrb[8].mxu1 %v7508_v58  ;;  %v880_v58 = vadd.s32 104, %v6073_v10 }
 0x289   : > { %4904 = vmatprep.mubr.bf16.mxu1 %v7511_v44  ;;  %4937 = vmatpush3.bf16.msra.mxu1 %v5403_v26  ;;  %v970_v26 = vand.u32 15, %v876_v32  ;;  %vm4547_vm15 = vcmp.ne.s32.totalorder %v956_v22, 15  ;;  %v7552_v44 = vld [vmem:[#allocation30_spill] sm:$0xff] }
 0x28a   : > { %4938 = vmatprep.subr.bf16.mxu1 %v5404_v39  ;;  %vm4418_vm1 = vmpackc.low %vm4547_vm15, %vm5723_vm5  ;;  %v998_v35 = vand.u32 15, %v880_v58  ;;  %v7577_v32 = vld [vmem:[#allocation66_spill] sm:$0xff]  ;;  %v7583_v58 = vld [vmem:[#allocation76_spill] sm:$0xff] }
 0x28b   : > { %vm4548_vm0 = vcmp.ne.s32.totalorder %v970_v26, 15  ;;  %v7578_v22 = vpack.c.bf16 %v7576_v59, %v7577_v32  ;;  %v7579_v26 = vld [vmem:[#allocation75_spill] sm:$0xff]  ;;  %v7584_v61 = vpack.c.bf16 %v7582_v14, %v7583_v58 }
 0x28c   : > { %vm4422_vm2 = vmpackc.low %vm4548_vm0, %vm5723_vm5  ;;  %vm4550_vm4 = vcmp.ne.s32.totalorder %v998_v35, 15  ;;  %v7585_v35 = vld [vmem:[#allocation85_spill] sm:$0xff] }
 0x28d   : > { %4939 = vmatpush3.bf16.msra.mxu1 %v5404_v39  ;;  %v7546_v39 = vld [vmem:[#allocation24_spill] sm:$0xff]  ;;  %vm4430_vm7 = vmpackc.low %vm4550_vm4, %vm5723_vm5 }
 0x28e   : > { %4940 = vmatprep.subr.bf16.mxu1 %v5405_v12  ;;  %v7548_v17 = vpack.c.bf16 %v7546_v39, %v7547_v46  ;;  %v7580_v39 = vld [vmem:[#allocation71_spill] sm:$0xff] }
 0x28f   : > { %v7581_v46 = vpack.c.bf16 %v7579_v26, %v7580_v39 }
 0x290   : > { %4905 = vmatmul.mubr.bf16.gmra.mrb[12].mxu1 %v7514_v41  ;;  %v882_v41 = vadd.s32 120, %v6073_v10 }
 0x291   : > { %4908 = vmatprep.mubr.bf16.mxu1 %v7517_v21  ;;  %4941 = vmatpush3.bf16.msra.mxu1 %v5405_v12  ;;  %v7553_v12 = vld [vmem:[#allocation28_spill] sm:$0xff] }
 0x292   : > { %4942 = vmatprep.subr.bf16.mxu1 %v5406_v52  ;;  %v7554_v28 = vpack.c.bf16 %v7552_v44, %v7553_v12  ;;  %v1012_v21 = vand.u32 15, %v882_v41  ;;  %v7586_v44 = vld [vmem:[#allocation81_spill] sm:$0xff] }
 0x293   : > { %v7587_v12 = vpack.c.bf16 %v7585_v35, %v7586_v44 }
 0x294   : > { %vm4551_vm8 = vcmp.ne.s32.totalorder %v1012_v21, 15 }
 0x295   : > { %4943 = vmatpush3.bf16.msra.mxu1 %v5406_v52  ;;  %v7555_v52 = vld [vmem:[#allocation35_spill] sm:$0xff] }
 0x296   : > { %v7557_v47 = vpack.c.bf16 %v7555_v52, %v7556_v63  ;;  %v7588_v63 = vld [vmem:[#allocation90_spill] sm:$0xff] }
 0x298   : > { %4909 = vmatmul.mubr.bf16.gmra.mrb[16].mxu1 %v7520_v7  ;;  %v7558_v7 = vld [vmem:[#allocation40_spill] sm:$0xff] }
 0x299   : > { %4912 = vmatprep.mubr.bf16.mxu1 %v7523_v24  ;;  %v7560_v34 = vpack.c.bf16 %v7558_v7, %v7559_v55  ;;  %v5412_v24 = vld [vmem:[#allocation8 + $0x68] sm:$0xff]   ;;  %v5415_v7 = vld [vmem:[#allocation8] sm:$0xff]  }
 0x29a   : > { %4990 = vmatprep.subr.bf16.mxu0 %v5412_v24 }
 0x29b   : > { %4991 = vmatpush3.bf16.msra.mxu0 %v5412_v24 }
 0x2a0   : > { %4913 = vmatmul.mubr.bf16.gmra.mrb[20].mxu1 %v7526_v56  ;;  %v7563_v56 = vpack.c.bf16 %v7561_v25, %v7562_v30 }
 0x2a1   : > { %4916 = vmatprep.mubr.bf16.mxu1 %v7529_v31  ;;  %v5413_v31 = vld [vmem:[#allocation8 + $0x70] sm:$0xff]  }
 0x2a2   : > { %4992 = vmatprep.subr.bf16.mxu0 %v5413_v31 }
 0x2a3   : > { %4993 = vmatpush3.bf16.msra.mxu0 %v5413_v31 }
 0x2a4   : > { %4994 = vmatprep.subr.bf16.mxu0 %v5414_v42 }
 0x2a7   : > { %4995 = vmatpush3.bf16.msra.mxu0 %v5414_v42 }
 0x2a8   : > { %4917 = vmatmul.mubr.bf16.gmra.mrb[24].mxu1 %v7532_v8  ;;  %v7564_v8 = vld [vmem:[#allocation50_spill] sm:$0xff]  ;;  %5028 = vmatprep.subr.bf16.mxu0 %v5415_v7 }
 0x2a9   : > { %4920 = vmatprep.mubr.bf16.mxu1 %v7535_v23  ;;  %v7566_v29 = vpack.c.bf16 %v7564_v8, %v7565_v19  ;;  %v7567_v23 = vld [vmem:[#allocation55_spill] sm:$0xff] }
 0x2aa   : > { %v7569_v27 = vpack.c.bf16 %v7567_v23, %v7568_v45  ;;  %v6979_v19 = vld [vmem:[%s7592_s12] ss:$0 sm:$0xff]  ;;  %s4139_s12 = scalar_lea.sflag [#allocation4], %s6001_s26 }
 0x2b0   : > { %4921 = vmatmul.mubr.bf16.gmra.mrb[28].mxu1 %v7538_v18  ;;  %v1068_v18 = vand.u32 15, %v890_v50 }
 0x2b1   : > { %4924 = vmatprep.mubr.bf16.mxu1 %v7541_v49  ;;  %v7571_v49 = vld [vmem:[#allocation56_spill] sm:$0xff] }
 0x2b2   : > { %v7572_v57 = vpack.c.bf16 %v7570_v60, %v7571_v49  ;;  %vm4555_vm0 = vcmp.ne.s32.totalorder %v1068_v18, 15 }
 0x2b8   : > { %4925 = vmatmul.mubr.bf16.gmra.mrb[40].mxu1 %v7542_v40  ;;  %v894_v40 = vadd.s32 216, %v6073_v10 }
 0x2b9   : > { %4944 = vmatprep.mubr.msk.bf16.mxu1 %vm4406_vm10, %v7545_v11  ;;  %vm4434_vm10 = vmpackc.low %vm4551_vm8, %vm5723_vm5  ;;  %v1110_v11 = vand.u32 15, %v896_v54 }
 0x2ba   : > { %v1096_v15 = vand.u32 15, %v894_v40 }
 0x2bc   : > { %vm4557_vm4 = vcmp.ne.s32.totalorder %v1096_v15, 15 }
 0x2c0   : > { %4945 = vmatmul.mubr.msk.bf16.vlgmr.msra.gmra.mrb[44].mxu1 %vm4410_vm13, %v7548_v17  ;;  %vm4554_vm13 = vcmp.ne.s32.totalorder %v1054_v1, 15  ;;  %v898_v17 = vadd.s32 248, %v6073_v10 }
 0x2c1   : > { %4948 = vmatprep.mubr.msk.bf16.mxu1 %vm4414_vm14, %v7551_v13  ;;  %vm4442_vm14 = vmpackc.low %vm4553_vm12, %vm5723_vm5  ;;  %v1138_v13 = vand.u32 15, %v900_v16  ;;  %v5416_v16 = vld [vmem:[#allocation8 + $0x8] sm:$0xff]  }
 0x2c2   : > { %vm4446_vm15 = vmpackc.low %vm4554_vm13, %vm5723_vm5  ;;  %v1124_v2 = vand.u32 15, %v898_v17 }
 0x2c4   : > { %vm4559_vm9 = vcmp.ne.s32.totalorder %v1124_v2, 15 }
 0x2c8   : > { %4949 = vmatmul.mubr.msk.bf16.gmra.mrb[4].mxu1 %vm4418_vm1, %v7554_v28  ;;  %vm4556_vm1 = vcmp.ne.s32.totalorder %v1082_v48, 15  ;;  %v902_v28 = vadd.s32 280, %v6073_v10 }
 0x2c9   : > { %4952 = vmatprep.mubr.msk.bf16.mxu1 %vm4422_vm2, %v7557_v47  ;;  %vm4450_vm2 = vmpackc.low %vm4555_vm0, %vm5723_vm5  ;;  %v7589_v47 = vld [vmem:[#allocation86_spill] sm:$0xff] }
 0x2ca   : > { %vm4454_vm3 = vmpackc.low %vm4556_vm1, %vm5723_vm5  ;;  %v1152_v52 = vand.u32 15, %v902_v28  ;;  %v7590_v41 = vpack.c.bf16 %v7588_v63, %v7589_v47 }
 0x2cc   : > { %vm4561_vm13 = vcmp.ne.s32.totalorder %v1152_v52, 15 }
 0x2d0   : > { %4953 = vmatmul.mubr.msk.bf16.gmra.mrb[8].mxu1 %vm4426_vm6, %v7560_v34  ;;  %vm4558_vm6 = vcmp.ne.s32.totalorder %v1110_v11, 15 }
 0x2d1   : > { %4956 = vmatprep.mubr.msk.bf16.mxu1 %vm4430_vm7, %v7563_v56  ;;  %vm4458_vm7 = vmpackc.low %vm4557_vm4, %vm5723_vm5 }
 0x2d2   : > { %vm4462_vm8 = vmpackc.low %vm4558_vm6, %vm5723_vm5 }
 0x2d8   : > { %4957 = vmatmul.mubr.msk.bf16.gmra.mrb[12].mxu1 %vm4434_vm10, %v7566_v29  ;;  %vm4560_vm10 = vcmp.ne.s32.totalorder %v1138_v13, 15 }
 0x2d9   : > { %4960 = vmatprep.mubr.msk.bf16.mxu1 %vm4438_vm11, %v7569_v27  ;;  %vm4466_vm11 = vmpackc.low %vm4559_vm9, %vm5723_vm5 }
 0x2da   : > { %vm4470_vm12 = vmpackc.low %vm4560_vm10, %vm5723_vm5 }
 0x2e0   : > { %4961 = vmatmul.mubr.msk.bf16.gmra.mrb[16].mxu1 %vm4442_vm14, %v7572_v57  ;;  %vm4474_vm14 = vmpackc.low %vm4561_vm13, %vm5723_vm5 }
 0x2e1   : > { %4964 = vmatprep.mubr.msk.bf16.mxu1 %vm4446_vm15, %v7575_v37 }
 0x2e8   : > { %4965 = vmatmul.mubr.msk.bf16.gmra.mrb[20].mxu1 %vm4450_vm2, %v7578_v22 }
 0x2e9   : > { %4968 = vmatprep.mubr.msk.bf16.mxu1 %vm4454_vm3, %v7581_v46 }
 0x2f0   : > { %4969 = vmatmul.mubr.msk.bf16.gmra.mrb[24].mxu1 %vm4458_vm7, %v7584_v61 }
 0x2f1   : > { %4972 = vmatprep.mubr.msk.bf16.mxu1 %vm4462_vm8, %v7587_v12  ;;  %v5417_v12 = vld [vmem:[#allocation8 + $0x10] sm:$0xff]  }
 0x2f8   : > { %4973 = vmatmul.mubr.msk.bf16.gmra.mrb[28].mxu1 %vm4466_vm11, %v7590_v41 }
 0x2f9   : > { %4976 = vmatprep.mubr.msk.bf16.mxu1 %vm4470_vm12, %v7591_v62 }
 0x300   : > { %4977 = vmatmul.mubr.msk.bf16.gmra.mrb[48].mxu1 %vm4474_vm14, %v4475_v36 }
 0x303   : > { %v4842_v10 = vpop.f32.mrb[0].mxu1 }
 0x304   : > { %v1703_v0 = vpop.f32.mrb[1].mxu1 }
 0x305   : > { %v4843_v21 = vpop.f32.mrb[2].mxu1  ;;  %v5418_v0 = vld [vmem:[#allocation8 + $0x18] sm:$0xff]  }
 0x306   : > { %v1706_v38 = vpop.f32.mrb[3].mxu1 }
 0x343   : > { %v4874_v55 = vpop.f32.mrb[32].mxu1 }
 0x344   : > { %v1831_v34 = vpop.f32.mrb[33].mxu1 }
 0x345   : > { %v4875_v9 = vpop.f32.mrb[34].mxu1 }
 0x346   : > { %v1834_v6 = vpop.f32.mrb[35].mxu1 }
 0x34b   : > { %v4894_v24 = vpop.f32.mrb[36].mxu1 }
 0x34c   : > { %v1937_v25 = vadd.f32 %v4894_v24, %v4842_v10  ;;  %v1928_v30 = vpop.f32.mrb[37].mxu1 }
 0x34d   : > { %v4895_v56 = vpop.f32.mrb[38].mxu1 }
 0x34e   : > { %v1940_v51 = vadd.f32 %v4895_v56, %v4843_v21  ;;  %v1931_v43 = vpop.f32.mrb[39].mxu1 }
 0x38b   : > { %v4926_v3 = vpop.f32.mrb[40].mxu1 }
 0x38c   : > { %v2056_v36 = vpop.f32.mrb[41].mxu1 }
 0x38d   : > { %v6972_v53 = vadd.f32 %v2056_v36, %v1831_v34  ;;  %v4927_v31 = vpop.f32.mrb[42].mxu1  ;;  %v5420_v36 = vld [vmem:[#allocation8 + $0x28] sm:$0xff]  }
 0x38e   : > { %v2059_v4 = vpop.f32.mrb[43].mxu1 }
 0x38f   : > { %v6974_v1 = vadd.f32 %v2059_v4, %v1834_v6  ;;  %v5419_v6 = vld [vmem:[#allocation8 + $0x20] sm:$0xff]  }
 0x393   : > { %v4946_v8 = vpop.f32.mrb[44].mxu1 }
 0x394   : > { %v2550_v29 = vadd.f32 %v4946_v8, %v1937_v25  ;;  %v2405_v23 = vpop.f32.mrb[45].mxu1 }
 0x395   : > { %v4947_v45 = vpop.f32.mrb[46].mxu1 }
 0x396   : > { %v2593_v27 = vadd.f32 %v6979_v19, %v2550_v29  ;;  %v2551_v50 = vadd.f32 %v4947_v45, %v1940_v51  ;;  %v2408_v5 = vpop.f32.mrb[47].mxu1 }
 0x398   : > { %v2594_v18 = vadd.f32 %v6979_v19, %v2551_v50  ;;  %v2629_v48 = vmax.f32 %v2593_v27, 0.0  ;;  %v5421_v50 = vld [vmem:[#allocation8 + $0x30] sm:$0xff]  }
 0x39a   : > { %v2630_v60 = vmax.f32 %v2594_v18, 0.0 }
 0x39b   : > { %v4950_v49 = vpop.f32.mrb[4].mxu1 }
 0x39c   : > { %v2597_v57 = vadd.f32 %v4950_v49, %v6979_v19  ;;  %v2421_v33 = vpop.f32.mrb[5].mxu1  ;;  %v6984_v20 = vpack.c.bf16 %v2630_v60, %v2629_v48 }
 0x39d   : > { %v2595_v37 = vadd.f32 %v6979_v19, %v2421_v33  ;;  %v4951_v40 = vpop.f32.mrb[6].mxu1 }
 0x39e   : > { %v2598_v54 = vadd.f32 %v4951_v40, %v6979_v19  ;;  %v2424_v15 = vpop.f32.mrb[7].mxu1  ;;  %4996 = vmatprep.mubr.bf16.mxu0 %v6984_v20  ;;  %v2633_v59 = vmax.f32 %v2597_v57, 0.0 }
 0x39f   : > { %v2596_v11 = vadd.f32 %v6979_v19, %v2424_v15  ;;  %v2631_v22 = vmax.f32 %v2595_v37, 0.0  ;;  %v5422_v37 = vld [vmem:[#allocation8 + $0x38] sm:$0xff]  }
 0x3a0   : > { %v2634_v32 = vmax.f32 %v2598_v54, 0.0 }
 0x3a1   : > { %v2632_v26 = vmax.f32 %v2596_v11, 0.0 }
 0x3a2   : > { %v6990_v39 = vpack.c.bf16 %v2634_v32, %v2633_v59 }
 0x3a3   : > { %v6992_v46 = vpack.c.bf16 %v2632_v26, %v2631_v22  ;;  %v4954_v17 = vpop.f32.mrb[8].mxu1  ;;  %v7030_v26 = vld [vmem:[#allocation8 + $0x80] sm:$0xff]  }
 0x3a4   : > { %v2601_v2 = vadd.f32 %v4954_v17, %v6979_v19  ;;  %v2437_v13 = vpop.f32.mrb[9].mxu1 }
 0x3a5   : > { %v2599_v14 = vadd.f32 %v6979_v19, %v2437_v13  ;;  %v4955_v58 = vpop.f32.mrb[10].mxu1  ;;  %4997 = vmatmul.mubr.bf16.vlgmr.msra.gmra.mrb[72].mxu0 %v6992_v46 }
 0x3a6   : > { %v2602_v61 = vadd.f32 %v4955_v58, %v6979_v19  ;;  %v2440_v35 = vpop.f32.mrb[11].mxu1  ;;  %5000 = vmatprep.mubr.bf16.mxu0 %v6990_v39  ;;  %5029 = vmatpush3.bf16.msra.mxu0 %v5415_v7  ;;  %v2637_v28 = vmax.f32 %v2601_v2, 0.0 }
 0x3a7   : > { %v2600_v44 = vadd.f32 %v6979_v19, %v2440_v35  ;;  %5030 = vmatprep.subr.bf16.mxu0 %v5416_v16  ;;  %v2635_v63 = vmax.f32 %v2599_v14, 0.0 }
 0x3a8   : > { %v2638_v52 = vmax.f32 %v2602_v61, 0.0 }
 0x3a9   : > { %v2636_v47 = vmax.f32 %v2600_v44, 0.0 }
 0x3aa   : > { %v7000_v41 = vpack.c.bf16 %v2638_v52, %v2637_v28  ;;  %5031 = vmatpush3.bf16.msra.mxu0 %v5416_v16 }
 0x3ab   : > { %v7002_v62 = vpack.c.bf16 %v2636_v47, %v2635_v63  ;;  %v4958_v10 = vpop.f32.mrb[12].mxu1  ;;  %5032 = vmatprep.subr.bf16.mxu0 %v5417_v12 }
 0x3ac   : > { %v2605_v21 = vadd.f32 %v4958_v10, %v6979_v19  ;;  %v2453_v38 = vpop.f32.mrb[13].mxu1 }
 0x3ad   : > { %v2603_v42 = vadd.f32 %v6979_v19, %v2453_v38  ;;  %v4959_v7 = vpop.f32.mrb[14].mxu1  ;;  %5001 = vmatmul.mubr.bf16.gmra.mrb[76].mxu0 %v7002_v62 }
 0x3ae   : > { %v2606_v55 = vadd.f32 %v4959_v7, %v6979_v19  ;;  %v2456_v34 = vpop.f32.mrb[15].mxu1  ;;  %5004 = vmatprep.mubr.bf16.mxu0 %v7000_v41  ;;  %5033 = vmatpush3.bf16.msra.mxu0 %v5417_v12  ;;  %v2641_v24 = vmax.f32 %v2605_v21, 0.0 }
 0x3af   : > { %v2604_v9 = vadd.f32 %v6979_v19, %v2456_v34  ;;  %5034 = vmatprep.subr.bf16.mxu0 %v5418_v0  ;;  %v2639_v30 = vmax.f32 %v2603_v42, 0.0 }
 0x3b0   : > { %v2642_v25 = vmax.f32 %v2606_v55, 0.0 }
 0x3b1   : > { %v2640_v56 = vmax.f32 %v2604_v9, 0.0 }
 0x3b2   : > { %v7010_v51 = vpack.c.bf16 %v2642_v25, %v2641_v24  ;;  %5035 = vmatpush3.bf16.msra.mxu0 %v5418_v0 }
 0x3b3   : > { %v7012_v43 = vpack.c.bf16 %v2640_v56, %v2639_v30  ;;  %v4962_v3 = vpop.f32.mrb[16].mxu1  ;;  %5036 = vmatprep.subr.bf16.mxu0 %v5419_v6 }
 0x3b4   : > { %v2609_v31 = vadd.f32 %v4962_v3, %v6979_v19  ;;  %v2469_v4 = vpop.f32.mrb[17].mxu1 }
 0x3b5   : > { %v2607_v8 = vadd.f32 %v6979_v19, %v2469_v4  ;;  %v4963_v29 = vpop.f32.mrb[18].mxu1  ;;  %5005 = vmatmul.mubr.bf16.gmra.mrb[80].mxu0 %v7012_v43 }
 0x3b6   : > { %v2610_v23 = vadd.f32 %v4963_v29, %v6979_v19  ;;  %v2472_v45 = vpop.f32.mrb[19].mxu1  ;;  %5008 = vmatprep.mubr.bf16.mxu0 %v7010_v51  ;;  %5037 = vmatpush3.bf16.msra.mxu0 %v5419_v6  ;;  %v2645_v5 = vmax.f32 %v2609_v31, 0.0 }
 0x3b7   : > { %v2608_v27 = vadd.f32 %v6979_v19, %v2472_v45  ;;  %5038 = vmatprep.subr.bf16.mxu0 %v5420_v36  ;;  %v2643_v48 = vmax.f32 %v2607_v8, 0.0 }
 0x3b8   : > { %v2646_v18 = vmax.f32 %v2610_v23, 0.0 }
 0x3b9   : > { %v2644_v60 = vmax.f32 %v2608_v27, 0.0 }
 0x3ba   : > { %v7020_v49 = vpack.c.bf16 %v2646_v18, %v2645_v5  ;;  %5039 = vmatpush3.bf16.msra.mxu0 %v5420_v36 }
 0x3bb   : > { %v7022_v57 = vpack.c.bf16 %v2644_v60, %v2643_v48  ;;  %v4966_v33 = vpop.f32.mrb[20].mxu1  ;;  %5040 = vmatprep.subr.bf16.mxu0 %v5421_v50 }
 0x3bc   : > { %v2613_v40 = vadd.f32 %v4966_v33, %v6979_v19  ;;  %v2485_v54 = vpop.f32.mrb[21].mxu1 }
 0x3bd   : > { %v2611_v15 = vadd.f32 %v6979_v19, %v2485_v54  ;;  %v4967_v11 = vpop.f32.mrb[22].mxu1  ;;  %5009 = vmatmul.mubr.bf16.gmra.mrb[84].mxu0 %v7022_v57  ;;  %v5431_v54 = vld [vmem:[#allocation10 + $0x40] sm:$0xff]  }
 0x3be   : > { %v2614_v59 = vadd.f32 %v4967_v11, %v6979_v19  ;;  %v2488_v32 = vpop.f32.mrb[23].mxu1  ;;  %5012 = vmatprep.mubr.bf16.mxu0 %v7020_v49  ;;  %5041 = vmatpush3.bf16.msra.mxu0 %v5421_v50  ;;  %v2649_v17 = vmax.f32 %v2613_v40, 0.0  ;;  %v5724_v11 = vmov 0.0|0.0  }
 0x3bf   : > { %v2612_v22 = vadd.f32 %v6979_v19, %v2488_v32  ;;  %5042 = vmatprep.subr.bf16.mxu0 %v5422_v37  ;;  %v2647_v2 = vmax.f32 %v2611_v15, 0.0  ;;  %v5433_v15 = vld [vmem:[#allocation10 + $0x48] sm:$0xff]   ;;  %4712 = vmatprep.subr.bf16.mxu1 %v5431_v54  ;;  %v5435_v32 = vld [vmem:[#allocation10 + $0x50] sm:$0xff]  }
 0x3c0   : > { %v2650_v16 = vmax.f32 %v2614_v59, 0.0  ;;  %v5434_v59 = vld [vmem:[#allocation10 + $0x8] sm:$0xff]  }
 0x3c1   : > { %v2648_v13 = vmax.f32 %v2612_v22, 0.0  ;;  %v5437_v22 = vld [vmem:[#allocation10 + $0x58] sm:$0xff]  }
 0x3c2   : > { %v7032_v14 = vpack.c.bf16 %v2650_v16, %v2649_v17  ;;  %5043 = vmatpush3.bf16.msra.mxu0 %v5422_v37  ;;  %v5425_v17 = vld [vmem:[#allocation8 + $0x90] sm:$0xff]   ;;  %v5438_v16 = vld [vmem:[#allocation10 + $0x18] sm:$0xff]  }
 0x3c3   : > { %v7034_v58 = vpack.c.bf16 %v2648_v13, %v2647_v2  ;;  %v4970_v61 = vpop.f32.mrb[24].mxu1  ;;  %5076 = vmatprep.subr.bf16.mxu0 %v7030_v26  ;;  %v5439_v2 = vld [vmem:[#allocation10 + $0x60] sm:$0xff]   ;;  %v5426_v13 = vld [vmem:[#allocation8 + $0x98] sm:$0xff]  }
 0x3c4   : > { %v2617_v35 = vadd.f32 %v4970_v61, %v6979_v19  ;;  %v2501_v44 = vpop.f32.mrb[25].mxu1  ;;  %v5440_v61 = vld [vmem:[#allocation10 + $0x20] sm:$0xff]  }
 0x3c5   : > { %v2615_v12 = vadd.f32 %v6979_v19, %v2501_v44  ;;  %v4971_v28 = vpop.f32.mrb[26].mxu1  ;;  %5013 = vmatmul.mubr.bf16.gmra.mrb[88].mxu0 %v7034_v58  ;;  %v5443_v44 = vld [vmem:[#allocation10 + $0x70] sm:$0xff]  }
 0x3c6   : > { %v2618_v52 = vadd.f32 %v4971_v28, %v6979_v19  ;;  %v2504_v63 = vpop.f32.mrb[27].mxu1  ;;  %5016 = vmatprep.mubr.bf16.mxu0 %v7032_v14  ;;  %v2653_v10 = vmax.f32 %v2617_v35, 0.0  ;;  %v5442_v35 = vld [vmem:[#allocation10 + $0x28] sm:$0xff]   ;;  %v5444_v28 = vld [vmem:[#allocation10 + $0x30] sm:$0xff]  }
 0x3c7   : > { %v2616_v47 = vadd.f32 %v6979_v19, %v2504_v63  ;;  %v2651_v21 = vmax.f32 %v2615_v12, 0.0  ;;  %v5428_v12 = vld [vmem:[#allocation8 + $0xa8] sm:$0xff]   ;;  %v5430_v63 = vld [vmem:[#allocation8 + $0xb8] sm:$0xff]  }
 0x3c8   : > { %v2654_v0 = vmax.f32 %v2618_v52, 0.0  ;;  %v5429_v52 = vld [vmem:[#allocation8 + $0xb0] sm:$0xff]  }
 0x3c9   : > { %v2652_v38 = vmax.f32 %v2616_v47, 0.0 }
 0x3ca   : > { %v7043_v42 = vpack.c.bf16 %v2654_v0, %v2653_v10 }
 0x3cb   : > { %v7045_v7 = vpack.c.bf16 %v2652_v38, %v2651_v21  ;;  %v4974_v55 = vpop.f32.mrb[28].mxu1 }
 0x3cc   : > { %v2621_v34 = vadd.f32 %v4974_v55, %v6979_v19  ;;  %v2517_v9 = vpop.f32.mrb[29].mxu1 }
 0x3cd   : > { %v2619_v6 = vadd.f32 %v6979_v19, %v2517_v9  ;;  %v4975_v24 = vpop.f32.mrb[30].mxu1  ;;  %5017 = vmatmul.mubr.bf16.gmra.mrb[92].mxu0 %v7045_v7 }
 0x3ce   : > { %v2622_v25 = vadd.f32 %v4975_v24, %v6979_v19  ;;  %v2520_v30 = vpop.f32.mrb[31].mxu1  ;;  %5020 = vmatprep.mubr.bf16.mxu0 %v7043_v42  ;;  %v2657_v3 = vmax.f32 %v2621_v34, 0.0 }
 0x3cf   : > { %v2620_v56 = vadd.f32 %v6979_v19, %v2520_v30  ;;  %v2655_v31 = vmax.f32 %v2619_v6, 0.0 }
 0x3d0   : > { %v2658_v36 = vmax.f32 %v2622_v25, 0.0 }
 0x3d1   : > { %v2656_v4 = vmax.f32 %v2620_v56, 0.0  ;;  %v7594_v56 = vld [vmem:[#allocation19_spill] sm:$0xff] }
 0x3d2   : > { %v7053_v8 = vpack.c.bf16 %v2658_v36, %v2657_v3 }
 0x3d3   : > { %v7055_v29 = vpack.c.bf16 %v2656_v4, %v2655_v31  ;;  %v4978_v23 = vpop.f32.mrb[48].mxu1 }
 0x3d4   : > { %v2533_v45 = vpop.f32.mrb[49].mxu1 }
 0x3d5   : > { %v2580_v27 = vadd.f32 %v2533_v45, %v6972_v53  ;;  %v4979_v50 = vpop.f32.mrb[50].mxu1  ;;  %5021 = vmatmul.mubr.bf16.gmra.mrb[96].mxu0 %v7055_v29  ;;  %v5432_v53 = vld [vmem:[#allocation10] sm:$0xff]  }
 0x3d6   : > { %v2536_v5 = vpop.f32.mrb[51].mxu1  ;;  %5024 = vmatprep.mubr.bf16.mxu0 %v7053_v8  ;;  %4713 = vmatpush3.bf16.msra.mxu1 %v5432_v53 }
 0x3d7   : > { %v2623_v18 = vadd.f32 %v6979_v19, %v2580_v27  ;;  %v2581_v48 = vadd.f32 %v2536_v5, %v6974_v1  ;;  %4714 = vmatprep.subr.bf16.mxu1 %v5433_v15  ;;  %v5424_v1 = vld [vmem:[#allocation8 + $0x88] sm:$0xff]  }
 0x3d9   : > { %v2624_v60 = vadd.f32 %v6979_v19, %v2581_v48  ;;  %v2659_v33 = vmax.f32 %v2623_v18, 0.0  ;;  %v5436_v19 = vld [vmem:[#allocation10 + $0x10] sm:$0xff]  }
 0x3da   : > { %4715 = vmatpush3.bf16.msra.mxu1 %v5434_v59 }
 0x3db   : > { %v2660_v37 = vmax.f32 %v2624_v60, 0.0  ;;  %4716 = vmatprep.subr.bf16.mxu1 %v5435_v32 }
 0x3dd   : > { %v7063_v40 = vpack.c.bf16 %v2660_v37, %v2659_v33  ;;  %v7595_v33 = vld [vmem:[#allocation23_spill] sm:$0xff] }
 0x3de   : > { %4717 = vmatpush3.bf16.msra.mxu1 %v5436_v19 }
 0x3df   : > { %5025 = vmatmul.mubr.bf16.gmra.mrb[100].mxu0 %v7063_v40  ;;  %4718 = vmatprep.subr.bf16.mxu1 %v5437_v22 }
 0x3e0   : > { %5044 = vmatprep.mubr.bf16.mxu0 %v5724_v11 }
 0x3e2   : > { %4719 = vmatpush3.bf16.msra.mxu1 %v5438_v16 }
 0x3e3   : > { %4720 = vmatprep.subr.bf16.mxu1 %v5439_v2 }
 0x3e6   : > { %4721 = vmatpush3.bf16.msra.mxu1 %v5440_v61 }
 0x3e7   : > { %5045 = vmatmul.mubr.bf16.vlgmr.msra.gmra.mrb[72].mxu0 %v6984_v20  ;;  %v5441_v20 = vld [vmem:[#allocation10 + $0x68] sm:$0xff]  }
 0x3e8   : > { %5077 = vmatpush3.bf16.msra.mxu0 %v7030_v26  ;;  %5048 = vmatprep.mubr.bf16.mxu0 %v6992_v46  ;;  %v5427_v26 = vld [vmem:[#allocation8 + $0xa0] sm:$0xff]  }
 0x3e9   : > { %5078 = vmatprep.subr.bf16.mxu0 %v5424_v1  ;;  %4722 = vmatprep.subr.bf16.mxu1 %v5441_v20 }
 0x3ea   : > { %4723 = vmatpush3.bf16.msra.mxu1 %v5442_v35 }
 0x3eb   : > { %4724 = vmatprep.subr.bf16.mxu1 %v5443_v44 }
 0x3ec   : > { %5079 = vmatpush3.bf16.msra.mxu0 %v5424_v1 }
 0x3ed   : > { %5080 = vmatprep.subr.bf16.mxu0 %v5425_v17 }
 0x3ee   : > { %4725 = vmatpush3.bf16.msra.mxu1 %v5444_v28 }
 0x3ef   : > { %5049 = vmatmul.mubr.bf16.gmra.mrb[76].mxu0 %v6990_v39 }
 0x3f0   : > { %5052 = vmatprep.mubr.bf16.mxu0 %v7002_v62  ;;  %5081 = vmatpush3.bf16.msra.mxu0 %v5425_v17 }
 0x3f1   : > { %5082 = vmatprep.subr.bf16.mxu0 %v5426_v13 }
 0x3f4   : > { %5083 = vmatpush3.bf16.msra.mxu0 %v5426_v13  ;;  %v7596_v13 = vld [vmem:[#allocation26_spill] sm:$0xff] }
 0x3f5   : > { %5084 = vmatprep.subr.bf16.mxu0 %v5427_v26 }
 0x3f7   : > { %5053 = vmatmul.mubr.bf16.gmra.mrb[80].mxu0 %v7000_v41 }
 0x3f8   : > { %5056 = vmatprep.mubr.bf16.mxu0 %v7012_v43  ;;  %5085 = vmatpush3.bf16.msra.mxu0 %v5427_v26 }
 0x3f9   : > { %5086 = vmatprep.subr.bf16.mxu0 %v5428_v12 }
 0x3fc   : > { %5087 = vmatpush3.bf16.msra.mxu0 %v5428_v12 }
 0x3fd   : > { %5088 = vmatprep.subr.bf16.mxu0 %v5429_v52 }
 0x3ff   : > { %5057 = vmatmul.mubr.bf16.gmra.mrb[84].mxu0 %v7010_v51 }
 0x400   : > { %5060 = vmatprep.mubr.bf16.mxu0 %v7022_v57  ;;  %5089 = vmatpush3.bf16.msra.mxu0 %v5429_v52 }
 0x401   : > { %5090 = vmatprep.subr.bf16.mxu0 %v5430_v63 }
 0x404   : > { %5091 = vmatpush3.bf16.msra.mxu0 %v5430_v63 }
 0x407   : > { %5061 = vmatmul.mubr.bf16.gmra.mrb[88].mxu0 %v7020_v49 }
 0x408   : > { %5064 = vmatprep.mubr.bf16.mxu0 %v7034_v58 }
 0x40f   : > { %5065 = vmatmul.mubr.bf16.gmra.mrb[92].mxu0 %v7032_v14 }
 0x410   : > { %5068 = vmatprep.mubr.bf16.mxu0 %v7045_v7 }
 0x417   : > { %5069 = vmatmul.mubr.bf16.gmra.mrb[96].mxu0 %v7043_v42 }
 0x418   : > { %5072 = vmatprep.mubr.bf16.mxu0 %v7055_v29 }
 0x41f   : > { %5073 = vmatmul.mubr.bf16.gmra.mrb[100].mxu0 %v7053_v8 }
 0x420   : > { %5092 = vmatprep.mubr.bf16.mxu0 %v6992_v46  ;;  %v5446_v46 = vld [vmem:[#allocation10 + $0x38] sm:$0xff]  }
 0x427   : > { %5093 = vmatmul.mubr.bf16.vlgmr.msra.gmra.mrb[72].mxu0 %v6990_v39  ;;  %v5445_v39 = vld [vmem:[#allocation10 + $0x78] sm:$0xff]  }
 0x428   : > { %5096 = vmatprep.mubr.bf16.mxu0 %v7002_v62  ;;  %4726 = vmatprep.subr.bf16.mxu1 %v5445_v39 }
 0x429   : > { %4727 = vmatpush3.bf16.msra.mxu1 %v5446_v46 }
 0x42f   : > { %5097 = vmatmul.mubr.bf16.gmra.mrb[76].mxu0 %v7000_v41  ;;  %v7102_v41 = vld [vmem:[%s7593_s15] ss:$0 sm:$0xff] }
 0x430   : > { %5100 = vmatprep.mubr.bf16.mxu0 %v7012_v43 }
 0x437   : > { %5101 = vmatmul.mubr.bf16.gmra.mrb[80].mxu0 %v7010_v51 }
 0x438   : > { %5104 = vmatprep.mubr.bf16.mxu0 %v7022_v57 }
 0x43f   : > { %5105 = vmatmul.mubr.bf16.gmra.mrb[84].mxu0 %v7020_v49 }
 0x440   : > { %5108 = vmatprep.mubr.bf16.mxu0 %v7034_v58 }
 0x447   : > { %5109 = vmatmul.mubr.bf16.gmra.mrb[88].mxu0 %v7032_v14 }
 0x448   : > { %5112 = vmatprep.mubr.bf16.mxu0 %v7045_v7 }
 0x44f   : > { %5113 = vmatmul.mubr.bf16.gmra.mrb[92].mxu0 %v7043_v42 }
 0x450   : > { %5116 = vmatprep.mubr.bf16.mxu0 %v7055_v29 }
 0x457   : > { %5117 = vmatmul.mubr.bf16.gmra.mrb[96].mxu0 %v7053_v8 }
 0x458   : > { %5120 = vmatprep.mubr.bf16.mxu0 %v7063_v40 }
 0x45f   : > { %5121 = vmatmul.mubr.bf16.gmra.mrb[100].mxu0 %v5724_v11 }
 0x4fa   : > { %v5094_v62 = vpop.f32.mrb[72].mxu0 }
 0x4fb   : > { %v3652_v51 = vadd.f32 %v5094_v62, %v7102_v41  ;;  %v3484_v43 = vpop.f32.mrb[73].mxu0 }
 0x4fc   : > { %v3650_v49 = vadd.f32 %v7102_v41, %v3484_v43  ;;  %v5095_v57 = vpop.f32.mrb[74].mxu0 }
 0x4fd   : > { %v3653_v14 = vadd.f32 %v5095_v57, %v7102_v41  ;;  %v3487_v58 = vpop.f32.mrb[75].mxu0  ;;  %v3684_v10 = vmax.f32 %v3652_v51, 0.0 }
 0x4fe   : > { %v3651_v47 = vadd.f32 %v7102_v41, %v3487_v58  ;;  %v3682_v21 = vmax.f32 %v3650_v49, 0.0  ;;  %v7597_v49 = vld [vmem:[#allocation29_spill] sm:$0xff] }
 0x4ff   : > { %v3685_v0 = vmax.f32 %v3653_v14, 0.0 }
 0x500   : > { %v3683_v38 = vmax.f32 %v3651_v47, 0.0 }
 0x501   : > { %v3749_v42 = vpack.c.bf16 %v3685_v0, %v3684_v10 }
 0x502   : > { %v3747_v7 = vpack.c.bf16 %v3683_v38, %v3682_v21  ;;  %v5098_v55 = vpop.f32.mrb[76].mxu0 }
 0x503   : > { %v3656_v34 = vadd.f32 %v5098_v55, %v7102_v41  ;;  %v3500_v9 = vpop.f32.mrb[77].mxu0 }
 0x504   : > { %v3654_v6 = vadd.f32 %v7102_v41, %v3500_v9  ;;  %v5099_v24 = vpop.f32.mrb[78].mxu0  ;;  %3913 = vmatprep.mubr.bf16.mxu1 %v3747_v7 }
 0x505   : > { %v3657_v25 = vadd.f32 %v5099_v24, %v7102_v41  ;;  %v3503_v30 = vpop.f32.mrb[79].mxu0  ;;  %3914 = vmatmul.mubr.bf16.vlgmr.msra.gmra.mrb[52].mxu1 %v7594_v56  ;;  %v3688_v36 = vmax.f32 %v3656_v34, 0.0  ;;  %v7598_v24 = vld [vmem:[#allocation34_spill] sm:$0xff] }
 0x506   : > { %v3655_v3 = vadd.f32 %v7102_v41, %v3503_v30  ;;  %3921 = vmatprep.mubr.bf16.mxu1 %v3749_v42  ;;  %v3686_v4 = vmax.f32 %v3654_v6, 0.0 }
 0x507   : > { %v3689_v31 = vmax.f32 %v3657_v25, 0.0 }
 0x508   : > { %v3687_v8 = vmax.f32 %v3655_v3, 0.0 }
 0x509   : > { %v3753_v29 = vpack.c.bf16 %v3689_v31, %v3688_v36 }
 0x50a   : > { %v3751_v23 = vpack.c.bf16 %v3687_v8, %v3686_v4  ;;  %v5102_v45 = vpop.f32.mrb[80].mxu0 }
 0x50b   : > { %v3660_v27 = vadd.f32 %v5102_v45, %v7102_v41  ;;  %v3516_v50 = vpop.f32.mrb[81].mxu0 }
 0x50c   : > { %v3658_v5 = vadd.f32 %v7102_v41, %v3516_v50  ;;  %v5103_v18 = vpop.f32.mrb[82].mxu0 }
 0x50d   : > { %v3661_v48 = vadd.f32 %v5103_v18, %v7102_v41  ;;  %v3519_v60 = vpop.f32.mrb[83].mxu0  ;;  %3922 = vmatmul.mubr.bf16.gmra.mrb[56].mxu1 %v7595_v33  ;;  %v3692_v40 = vmax.f32 %v3660_v27, 0.0  ;;  %v7599_v18 = vld [vmem:[#allocation39_spill] sm:$0xff] }
 0x50e   : > { %v3659_v37 = vadd.f32 %v7102_v41, %v3519_v60  ;;  %3929 = vmatprep.mubr.bf16.mxu1 %v3751_v23  ;;  %v3690_v53 = vmax.f32 %v3658_v5, 0.0 }
 0x50f   : > { %v3693_v54 = vmax.f32 %v3661_v48, 0.0 }
 0x510   : > { %v3691_v15 = vmax.f32 %v3659_v37, 0.0 }
 0x511   : > { %v3757_v11 = vpack.c.bf16 %v3693_v54, %v3692_v40 }
 0x512   : > { %v3755_v59 = vpack.c.bf16 %v3691_v15, %v3690_v53  ;;  %v5106_v32 = vpop.f32.mrb[84].mxu0 }
 0x513   : > { %v3664_v1 = vadd.f32 %v5106_v32, %v7102_v41  ;;  %v3532_v19 = vpop.f32.mrb[85].mxu0 }
 0x514   : > { %v3662_v22 = vadd.f32 %v7102_v41, %v3532_v19  ;;  %v5107_v17 = vpop.f32.mrb[86].mxu0 }
 0x515   : > { %v3665_v16 = vadd.f32 %v5107_v17, %v7102_v41  ;;  %v3535_v2 = vpop.f32.mrb[87].mxu0  ;;  %3930 = vmatmul.mubr.bf16.gmra.mrb[60].mxu1 %v7596_v13  ;;  %v3696_v20 = vmax.f32 %v3664_v1, 0.0  ;;  %v7600_v17 = vld [vmem:[#allocation44_spill] sm:$0xff] }
 0x516   : > { %v3663_v61 = vadd.f32 %v7102_v41, %v3535_v2  ;;  %3937 = vmatprep.mubr.bf16.mxu1 %v3753_v29  ;;  %v3694_v35 = vmax.f32 %v3662_v22, 0.0 }
 0x517   : > { %v3697_v26 = vmax.f32 %v3665_v16, 0.0 }
 0x518   : > { %v3695_v44 = vmax.f32 %v3663_v61, 0.0 }
 0x519   : > { %v3761_v12 = vpack.c.bf16 %v3697_v26, %v3696_v20 }
 0x51a   : > { %v3759_v28 = vpack.c.bf16 %v3695_v44, %v3694_v35  ;;  %v5110_v52 = vpop.f32.mrb[88].mxu0  ;;  %v7601_v44 = vld [vmem:[#allocation49_spill] sm:$0xff] }
 0x51b   : > { %v3668_v63 = vadd.f32 %v5110_v52, %v7102_v41  ;;  %v3548_v39 = vpop.f32.mrb[89].mxu0  ;;  %v7603_v52 = vld [vmem:[#allocation59_spill] sm:$0xff] }
 0x51c   : > { %v3666_v46 = vadd.f32 %v7102_v41, %v3548_v39  ;;  %v5111_v62 = vpop.f32.mrb[90].mxu0  ;;  %v7607_v39 = vld [vmem:[#allocation79_spill] sm:$0xff] }
 0x51d   : > { %v3669_v51 = vadd.f32 %v5111_v62, %v7102_v41  ;;  %v3551_v43 = vpop.f32.mrb[91].mxu0  ;;  %3938 = vmatmul.mubr.bf16.gmra.mrb[64].mxu1 %v7597_v49  ;;  %v3700_v14 = vmax.f32 %v3668_v63, 0.0  ;;  %v7604_v63 = vld [vmem:[#allocation64_spill] sm:$0xff]  ;;  %v7609_v62 = vld [vmem:[#allocation89_spill] sm:$0xff] }
 0x51e   : > { %v3667_v57 = vadd.f32 %v7102_v41, %v3551_v43  ;;  %3945 = vmatprep.mubr.bf16.mxu1 %v3755_v59  ;;  %v3698_v47 = vmax.f32 %v3666_v46, 0.0  ;;  %v7608_v46 = vld [vmem:[#allocation84_spill] sm:$0xff]  ;;  %v7155_v43 = vld [vmem:[%s7610_s16] ss:$0 sm:$0xff] }
 0x51f   : > { %v3701_v58 = vmax.f32 %v3669_v51, 0.0 }
 0x520   : > { %v3699_v10 = vmax.f32 %v3667_v57, 0.0 }
 0x521   : > { %v3765_v0 = vpack.c.bf16 %v3701_v58, %v3700_v14 }
 0x522   : > { %v3763_v21 = vpack.c.bf16 %v3699_v10, %v3698_v47  ;;  %v5114_v38 = vpop.f32.mrb[92].mxu0 }
 0x523   : > { %v3672_v42 = vadd.f32 %v5114_v38, %v7102_v41  ;;  %v3564_v7 = vpop.f32.mrb[93].mxu0 }
 0x524   : > { %v3670_v55 = vadd.f32 %v7102_v41, %v3564_v7  ;;  %v5115_v34 = vpop.f32.mrb[94].mxu0  ;;  %v5448_v7 = vld [vmem:[%s6005_s8 + $0x18] sm:$0xff] }
 0x525   : > { %v3673_v9 = vadd.f32 %v5115_v34, %v7102_v41  ;;  %v3567_v6 = vpop.f32.mrb[95].mxu0  ;;  %3946 = vmatmul.mubr.bf16.gmra.mrb[68].mxu1 %v7598_v24  ;;  %v3704_v30 = vmax.f32 %v3672_v42, 0.0 }
 0x526   : > { %v3671_v25 = vadd.f32 %v7102_v41, %v3567_v6  ;;  %3953 = vmatprep.mubr.bf16.mxu1 %v3757_v11  ;;  %v3702_v3 = vmax.f32 %v3670_v55, 0.0 }
 0x527   : > { %v3705_v56 = vmax.f32 %v3673_v9, 0.0 }
 0x528   : > { %v3703_v36 = vmax.f32 %v3671_v25, 0.0 }
 0x529   : > { %v3769_v31 = vpack.c.bf16 %v3705_v56, %v3704_v30 }
 0x52a   : > { %v3767_v4 = vpack.c.bf16 %v3703_v36, %v3702_v3  ;;  %v5118_v8 = vpop.f32.mrb[96].mxu0  ;;  %v5449_v36 = vld [vmem:[%s6005_s8 + $0x20] sm:$0xff] }
 0x52b   : > { %v3676_v29 = vadd.f32 %v5118_v8, %v7102_v41  ;;  %v3580_v23 = vpop.f32.mrb[97].mxu0 }
 0x52c   : > { %v3674_v45 = vadd.f32 %v7102_v41, %v3580_v23  ;;  %v5119_v27 = vpop.f32.mrb[98].mxu0 }
 0x52d   : > { %v3677_v50 = vadd.f32 %v5119_v27, %v7102_v41  ;;  %v3583_v5 = vpop.f32.mrb[99].mxu0  ;;  %3954 = vmatmul.mubr.bf16.gmra.mrb[72].mxu1 %v7599_v18  ;;  %v3708_v60 = vmax.f32 %v3676_v29, 0.0  ;;  %v5450_v29 = vld [vmem:[%s6005_s8 + $0x28] sm:$0xff] }
 0x52e   : > { %v3675_v48 = vadd.f32 %v7102_v41, %v3583_v5  ;;  %3961 = vmatprep.mubr.bf16.mxu1 %v3759_v28  ;;  %v3706_v37 = vmax.f32 %v3674_v45, 0.0  ;;  %v7602_v28 = vld [vmem:[#allocation54_spill] sm:$0xff] }
 0x52f   : > { %v3709_v33 = vmax.f32 %v3677_v50, 0.0 }
 0x530   : > { %v3707_v40 = vmax.f32 %v3675_v48, 0.0 }
 0x531   : > { %v3773_v54 = vpack.c.bf16 %v3709_v33, %v3708_v60 }
 0x532   : > { %v3771_v53 = vpack.c.bf16 %v3707_v40, %v3706_v37  ;;  %v5122_v15 = vpop.f32.mrb[100].mxu0  ;;  %v5451_v37 = vld [vmem:[%s6005_s8 + $0x30] sm:$0xff] }
 0x533   : > { %v3680_v11 = vadd.f32 %v5122_v15, %v7102_v41  ;;  %v3596_v59 = vpop.f32.mrb[101].mxu0  ;;  %v5452_v15 = vld [vmem:[%s6005_s8 + $0x38] sm:$0xff] }
 0x534   : > { %v3678_v32 = vadd.f32 %v7102_v41, %v3596_v59  ;;  %v5123_v1 = vpop.f32.mrb[102].mxu0 }
 0x535   : > { %v3681_v19 = vadd.f32 %v5123_v1, %v7102_v41  ;;  %v3599_v22 = vpop.f32.mrb[103].mxu0  ;;  %3962 = vmatmul.mubr.bf16.gmra.mrb[76].mxu1 %v7600_v17  ;;  %v3712_v2 = vmax.f32 %v3680_v11, 0.0 }
 0x536   : > { %v3679_v16 = vadd.f32 %v7102_v41, %v3599_v22  ;;  %3969 = vmatprep.mubr.bf16.mxu1 %v3761_v12  ;;  %v3710_v61 = vmax.f32 %v3678_v32, 0.0  ;;  %v7605_v41 = vld [vmem:[#allocation69_spill] sm:$0xff]  ;;  %v7606_v12 = vld [vmem:[#allocation74_spill] sm:$0xff] }
 0x537   : > { %v3713_v13 = vmax.f32 %v3681_v19, 0.0 }
 0x538   : > { %v3711_v20 = vmax.f32 %v3679_v16, 0.0 }
 0x539   : > { %v3777_v26 = vpack.c.bf16 %v3713_v13, %v3712_v2  ;;  %v5453_v13 = vld [vmem:[%s6005_s8 + $0x40] sm:$0xff] }
 0x53a   : > { %v3775_v35 = vpack.c.bf16 %v3711_v20, %v3710_v61 }
 0x53d   : > { %3970 = vmatmul.mubr.bf16.gmra.mrb[80].mxu1 %v7601_v44 }
 0x53e   : > { %3977 = vmatprep.mubr.bf16.mxu1 %v3763_v21 }
 0x545   : > { %3978 = vmatmul.mubr.bf16.gmra.mrb[84].mxu1 %v7602_v28 }
 0x546   : > { %3985 = vmatprep.mubr.bf16.mxu1 %v3765_v0  ;;  %v5447_v0 = vld [vmem:[%s6005_s8 + $0x10] sm:$0xff] }
 0x54d   : > { %3986 = vmatmul.mubr.bf16.gmra.mrb[88].mxu1 %v7603_v52 }
 0x54e   : > { %3993 = vmatprep.mubr.bf16.mxu1 %v3767_v4 }
 0x555   : > { %3994 = vmatmul.mubr.bf16.gmra.mrb[92].mxu1 %v7604_v63 }
 0x556   : > { %4001 = vmatprep.mubr.bf16.mxu1 %v3769_v31 }
 0x55d   : > { %4002 = vmatmul.mubr.bf16.gmra.mrb[96].mxu1 %v7605_v41 }
 0x55e   : > { %4009 = vmatprep.mubr.bf16.mxu1 %v3771_v53 }
 0x565   : > { %4010 = vmatmul.mubr.bf16.gmra.mrb[100].mxu1 %v7606_v12 }
 0x566   : > { %4017 = vmatprep.mubr.bf16.mxu1 %v3773_v54 }
 0x56d   : > { %4018 = vmatmul.mubr.bf16.gmra.mrb[104].mxu1 %v7607_v39 }
 0x56e   : > { %4025 = vmatprep.mubr.bf16.mxu1 %v3775_v35  ;;  %v5454_v35 = vld [vmem:[%s6005_s8 + $0x48] sm:$0xff] }
 0x575   : > { %4026 = vmatmul.mubr.bf16.gmra.mrb[108].mxu1 %v7608_v46 }
 0x576   : > { %4033 = vmatprep.mubr.bf16.mxu1 %v3777_v26 }
 0x57d   : > { %4034 = vmatmul.mubr.bf16.gmra.mrb[112].mxu1 %v7609_v62 }
 0x5d8   : > { %v4728_v51 = vpop.f32.mrb[52].mxu1 }
 0x5d9   : > { %v4729_v49 = vpop.f32.mrb[53].mxu1 }
 0x5da   : > { %v4730_v57 = vadd.f32 %v4729_v49, %v4728_v51  ;;  %v4731_v14 = vpop.f32.mrb[54].mxu1  ;;  %v5455_v51 = vld [vmem:[%s6005_s8 + $0x50] sm:$0xff] }
 0x5db   : > { %v4732_v58 = vpop.f32.mrb[55].mxu1 }
 0x5dc   : > { %v3916_v47 = vadd.f32 %v4730_v57, %v7155_v43  ;;  %v4733_v10 = vadd.f32 %v4732_v58, %v4731_v14  ;;  %v5456_v58 = vld [vmem:[%s6005_s8 + $0x58] sm:$0xff] }
 0x5de   : > { %v4042_v21 = vadd.f32 %v5447_v0, %v3916_v47  ;;  %v3919_v38 = vadd.f32 %v4733_v10, %v7155_v43 }
 0x5e0   : > { %v4074_v42 = vmax.f32 %v4042_v21, 0.0  ;;  %v4043_v55 = vadd.f32 %v5448_v7, %v3919_v38  ;;  %v4734_v34 = vpop.f32.mrb[56].mxu1 }
 0x5e1   : > { %v4735_v9 = vpop.f32.mrb[57].mxu1 }
 0x5e2   : > { %4106 = vst [vmem:[%s7162_s23] sm:$0xff] %v4074_v42  ;;  %v4075_v6 = vmax.f32 %v4043_v55, 0.0  ;;  %v4736_v24 = vadd.f32 %v4735_v9, %v4734_v34  ;;  %v4737_v25 = vpop.f32.mrb[58].mxu1  ;;  %v5457_v9 = vld [vmem:[%s6005_s8 + $0x60] sm:$0xff] }
 0x5e3   : > { %v4738_v30 = vpop.f32.mrb[59].mxu1 }
 0x5e4   : > { %4107 = vst [vmem:[%s7162_s23 + $0x8] sm:$0xff] %v4075_v6  ;;  %v3924_v56 = vadd.f32 %v4736_v24, %v7155_v43  ;;  %v4739_v3 = vadd.f32 %v4738_v30, %v4737_v25  ;;  %v5458_v30 = vld [vmem:[%s6005_s8 + $0x68] sm:$0xff] }
 0x5e6   : > { %v4044_v31 = vadd.f32 %v5449_v36, %v3924_v56  ;;  %v3927_v4 = vadd.f32 %v4739_v3, %v7155_v43 }
 0x5e8   : > { %v4076_v8 = vmax.f32 %v4044_v31, 0.0  ;;  %v4045_v23 = vadd.f32 %v5450_v29, %v3927_v4  ;;  %v4740_v45 = vpop.f32.mrb[60].mxu1 }
 0x5e9   : > { %v4741_v27 = vpop.f32.mrb[61].mxu1 }
 0x5ea   : > { %4108 = vst [vmem:[%s7162_s23 + $0x10] sm:$0xff] %v4076_v8  ;;  %v4077_v50 = vmax.f32 %v4045_v23, 0.0  ;;  %v4742_v5 = vadd.f32 %v4741_v27, %v4740_v45  ;;  %v4743_v18 = vpop.f32.mrb[62].mxu1  ;;  %v5459_v27 = vld [vmem:[%s6005_s8 + $0x70] sm:$0xff] }
 0x5eb   : > { %v4744_v48 = vpop.f32.mrb[63].mxu1 }
 0x5ec   : > { %4109 = vst [vmem:[%s7162_s23 + $0x18] sm:$0xff] %v4077_v50  ;;  %v3932_v60 = vadd.f32 %v4742_v5, %v7155_v43  ;;  %v4745_v33 = vadd.f32 %v4744_v48, %v4743_v18  ;;  %v5460_v48 = vld [vmem:[%s6005_s8 + $0x78] sm:$0xff] }
 0x5ee   : > { %v4046_v40 = vadd.f32 %v5451_v37, %v3932_v60  ;;  %v3935_v54 = vadd.f32 %v4745_v33, %v7155_v43 }
 0x5f0   : > { %v4078_v53 = vmax.f32 %v4046_v40, 0.0  ;;  %v4047_v11 = vadd.f32 %v5452_v15, %v3935_v54  ;;  %v4746_v59 = vpop.f32.mrb[64].mxu1 }
 0x5f1   : > { %v4747_v32 = vpop.f32.mrb[65].mxu1 }
 0x5f2   : > { %4110 = vst [vmem:[%s7162_s23 + $0x20] sm:$0xff] %v4078_v53  ;;  %v4079_v1 = vmax.f32 %v4047_v11, 0.0  ;;  %v4748_v19 = vadd.f32 %v4747_v32, %v4746_v59  ;;  %v4749_v22 = vpop.f32.mrb[66].mxu1  ;;  %v5461_v32 = vld [vmem:[%s6005_s8 + $0x80] sm:$0xff] }
 0x5f3   : > { %v4750_v17 = vpop.f32.mrb[67].mxu1 }
 0x5f4   : > { %4111 = vst [vmem:[%s7162_s23 + $0x28] sm:$0xff] %v4079_v1  ;;  %v3940_v16 = vadd.f32 %v4748_v19, %v7155_v43  ;;  %v4751_v2 = vadd.f32 %v4750_v17, %v4749_v22  ;;  %v5462_v17 = vld [vmem:[%s6005_s8 + $0x88] sm:$0xff] }
 0x5f6   : > { %v4048_v61 = vadd.f32 %v5453_v13, %v3940_v16  ;;  %v3943_v20 = vadd.f32 %v4751_v2, %v7155_v43 }
 0x5f8   : > { %v4080_v26 = vmax.f32 %v4048_v61, 0.0  ;;  %v4049_v44 = vadd.f32 %v5454_v35, %v3943_v20  ;;  %v4752_v28 = vpop.f32.mrb[68].mxu1 }
 0x5f9   : > { %v4753_v52 = vpop.f32.mrb[69].mxu1 }
 0x5fa   : > { %4112 = vst [vmem:[%s7162_s23 + $0x30] sm:$0xff] %v4080_v26  ;;  %v4081_v63 = vmax.f32 %v4049_v44, 0.0  ;;  %v4754_v41 = vadd.f32 %v4753_v52, %v4752_v28  ;;  %v4755_v12 = vpop.f32.mrb[70].mxu1  ;;  %v5463_v52 = vld [vmem:[%s6005_s8 + $0x90] sm:$0xff] }
 0x5fb   : > { %v4756_v39 = vpop.f32.mrb[71].mxu1 }
 0x5fc   : > { %4113 = vst [vmem:[%s7162_s23 + $0x38] sm:$0xff] %v4081_v63  ;;  %v3948_v46 = vadd.f32 %v4754_v41, %v7155_v43  ;;  %v4757_v62 = vadd.f32 %v4756_v39, %v4755_v12  ;;  %v5464_v39 = vld [vmem:[%s6005_s8 + $0x98] sm:$0xff] }
 0x5fe   : > { %v4050_v49 = vadd.f32 %v5455_v51, %v3948_v46  ;;  %v3951_v57 = vadd.f32 %v4757_v62, %v7155_v43 }
 0x600   : > { %v4082_v14 = vmax.f32 %v4050_v49, 0.0  ;;  %v4051_v47 = vadd.f32 %v5456_v58, %v3951_v57  ;;  %v4758_v10 = vpop.f32.mrb[72].mxu1 }
 0x601   : > { %v4759_v0 = vpop.f32.mrb[73].mxu1 }
 0x602   : > { %4114 = vst [vmem:[%s7162_s23 + $0x40] sm:$0xff] %v4082_v14  ;;  %v4083_v21 = vmax.f32 %v4051_v47, 0.0  ;;  %v4760_v38 = vadd.f32 %v4759_v0, %v4758_v10  ;;  %v4761_v42 = vpop.f32.mrb[74].mxu1  ;;  %v5465_v0 = vld [vmem:[%s6005_s8 + $0xa0] sm:$0xff] }
 0x603   : > { %v4762_v7 = vpop.f32.mrb[75].mxu1 }
 0x604   : > { %4115 = vst [vmem:[%s7162_s23 + $0x48] sm:$0xff] %v4083_v21  ;;  %v3956_v55 = vadd.f32 %v4760_v38, %v7155_v43  ;;  %v4763_v34 = vadd.f32 %v4762_v7, %v4761_v42  ;;  %v5466_v7 = vld [vmem:[%s6005_s8 + $0xa8] sm:$0xff] }
 0x606   : > { %v4052_v6 = vadd.f32 %v5457_v9, %v3956_v55  ;;  %v3959_v24 = vadd.f32 %v4763_v34, %v7155_v43 }
 0x608   : > { %v4084_v25 = vmax.f32 %v4052_v6, 0.0  ;;  %v4053_v56 = vadd.f32 %v5458_v30, %v3959_v24  ;;  %v4764_v3 = vpop.f32.mrb[76].mxu1 }
 0x609   : > { %v4765_v36 = vpop.f32.mrb[77].mxu1 }
 0x60a   : > { %4116 = vst [vmem:[%s7162_s23 + $0x50] sm:$0xff] %v4084_v25  ;;  %v4085_v31 = vmax.f32 %v4053_v56, 0.0  ;;  %v4766_v4 = vadd.f32 %v4765_v36, %v4764_v3  ;;  %v4767_v8 = vpop.f32.mrb[78].mxu1  ;;  %v5467_v36 = vld [vmem:[%s6005_s8 + $0xb0] sm:$0xff] }
 0x60b   : > { %v4768_v29 = vpop.f32.mrb[79].mxu1 }
 0x60c   : > { %4117 = vst [vmem:[%s7162_s23 + $0x58] sm:$0xff] %v4085_v31  ;;  %v3964_v23 = vadd.f32 %v4766_v4, %v7155_v43  ;;  %v4769_v45 = vadd.f32 %v4768_v29, %v4767_v8  ;;  %v5468_v29 = vld [vmem:[%s6005_s8 + $0xb8] sm:$0xff] }
 0x60e   : > { %v4054_v50 = vadd.f32 %v5459_v27, %v3964_v23  ;;  %v3967_v5 = vadd.f32 %v4769_v45, %v7155_v43 }
 0x610   : > { %v4086_v18 = vmax.f32 %v4054_v50, 0.0  ;;  %v4055_v60 = vadd.f32 %v5460_v48, %v3967_v5  ;;  %v4770_v33 = vpop.f32.mrb[80].mxu1 }
 0x611   : > { %v4771_v37 = vpop.f32.mrb[81].mxu1 }
 0x612   : > { %4118 = vst [vmem:[%s7162_s23 + $0x60] sm:$0xff] %v4086_v18  ;;  %v4087_v40 = vmax.f32 %v4055_v60, 0.0  ;;  %v4772_v54 = vadd.f32 %v4771_v37, %v4770_v33  ;;  %v4773_v53 = vpop.f32.mrb[82].mxu1  ;;  %v5469_v37 = vld [vmem:[%s6005_s8 + $0xc0] sm:$0xff] }
 0x613   : > { %v4774_v15 = vpop.f32.mrb[83].mxu1 }
 0x614   : > { %4119 = vst [vmem:[%s7162_s23 + $0x68] sm:$0xff] %v4087_v40  ;;  %v3972_v11 = vadd.f32 %v4772_v54, %v7155_v43  ;;  %v4775_v59 = vadd.f32 %v4774_v15, %v4773_v53  ;;  %v5470_v15 = vld [vmem:[%s6005_s8 + $0xc8] sm:$0xff] }
 0x616   : > { %v4056_v1 = vadd.f32 %v5461_v32, %v3972_v11  ;;  %v3975_v19 = vadd.f32 %v4775_v59, %v7155_v43 }
 0x618   : > { %v4088_v22 = vmax.f32 %v4056_v1, 0.0  ;;  %v4057_v16 = vadd.f32 %v5462_v17, %v3975_v19  ;;  %v4776_v2 = vpop.f32.mrb[84].mxu1 }
 0x619   : > { %v4777_v13 = vpop.f32.mrb[85].mxu1 }
 0x61a   : > { %4120 = vst [vmem:[%s7162_s23 + $0x70] sm:$0xff] %v4088_v22  ;;  %v4089_v61 = vmax.f32 %v4057_v16, 0.0  ;;  %v4778_v20 = vadd.f32 %v4777_v13, %v4776_v2  ;;  %v4779_v26 = vpop.f32.mrb[86].mxu1  ;;  %v5471_v13 = vld [vmem:[%s6005_s8 + $0xd0] sm:$0xff] }
 0x61b   : > { %v4780_v35 = vpop.f32.mrb[87].mxu1 }
 0x61c   : > { %4121 = vst [vmem:[%s7162_s23 + $0x78] sm:$0xff] %v4089_v61  ;;  %v3980_v44 = vadd.f32 %v4778_v20, %v7155_v43  ;;  %v4781_v28 = vadd.f32 %v4780_v35, %v4779_v26  ;;  %v5472_v35 = vld [vmem:[%s6005_s8 + $0xd8] sm:$0xff] }
 0x61e   : > { %v4058_v63 = vadd.f32 %v5463_v52, %v3980_v44  ;;  %v3983_v41 = vadd.f32 %v4781_v28, %v7155_v43 }
 0x620   : > { %v4090_v12 = vmax.f32 %v4058_v63, 0.0  ;;  %v4059_v46 = vadd.f32 %v5464_v39, %v3983_v41  ;;  %v4782_v62 = vpop.f32.mrb[88].mxu1 }
 0x621   : > { %v4783_v51 = vpop.f32.mrb[89].mxu1 }
 0x622   : > { %4122 = vst [vmem:[%s7162_s23 + $0x80] sm:$0xff] %v4090_v12  ;;  %v4091_v49 = vmax.f32 %v4059_v46, 0.0  ;;  %v4784_v57 = vadd.f32 %v4783_v51, %v4782_v62  ;;  %v4785_v14 = vpop.f32.mrb[90].mxu1  ;;  %v5473_v51 = vld [vmem:[%s6005_s8 + $0xe0] sm:$0xff] }
 0x623   : > { %v4786_v58 = vpop.f32.mrb[91].mxu1 }
 0x624   : > { %4123 = vst [vmem:[%s7162_s23 + $0x88] sm:$0xff] %v4091_v49  ;;  %v3988_v47 = vadd.f32 %v4784_v57, %v7155_v43  ;;  %v4787_v10 = vadd.f32 %v4786_v58, %v4785_v14  ;;  %v5474_v58 = vld [vmem:[%s6005_s8 + $0xe8] sm:$0xff] }
 0x626   : > { %v4060_v21 = vadd.f32 %v5465_v0, %v3988_v47  ;;  %v3991_v38 = vadd.f32 %v4787_v10, %v7155_v43 }
 0x628   : > { %v4092_v42 = vmax.f32 %v4060_v21, 0.0  ;;  %v4061_v55 = vadd.f32 %v5466_v7, %v3991_v38  ;;  %v4788_v34 = vpop.f32.mrb[92].mxu1 }
 0x629   : > { %v4789_v9 = vpop.f32.mrb[93].mxu1 }
 0x62a   : > { %4124 = vst [vmem:[%s7162_s23 + $0x90] sm:$0xff] %v4092_v42  ;;  %v4093_v6 = vmax.f32 %v4061_v55, 0.0  ;;  %v4790_v24 = vadd.f32 %v4789_v9, %v4788_v34  ;;  %v4791_v25 = vpop.f32.mrb[94].mxu1  ;;  %v5475_v9 = vld [vmem:[%s6005_s8 + $0xf0] sm:$0xff] }
 0x62b   : > { %v4792_v30 = vpop.f32.mrb[95].mxu1 }
 0x62c   : > { %4125 = vst [vmem:[%s7162_s23 + $0x98] sm:$0xff] %v4093_v6  ;;  %v3996_v56 = vadd.f32 %v4790_v24, %v7155_v43  ;;  %v4793_v3 = vadd.f32 %v4792_v30, %v4791_v25  ;;  %v5476_v30 = vld [vmem:[%s6005_s8 + $0xf8] sm:$0xff] }
 0x62e   : > { %v4062_v31 = vadd.f32 %v5467_v36, %v3996_v56  ;;  %v3999_v4 = vadd.f32 %v4793_v3, %v7155_v43 }
 0x630   : > { %v4094_v8 = vmax.f32 %v4062_v31, 0.0  ;;  %v4063_v23 = vadd.f32 %v5468_v29, %v3999_v4  ;;  %v4794_v45 = vpop.f32.mrb[96].mxu1 }
 0x631   : > { %v4795_v27 = vpop.f32.mrb[97].mxu1 }
 0x632   : > { %4126 = vst [vmem:[%s7162_s23 + $0xa0] sm:$0xff] %v4094_v8  ;;  %v4095_v50 = vmax.f32 %v4063_v23, 0.0  ;;  %v4796_v5 = vadd.f32 %v4795_v27, %v4794_v45  ;;  %v4797_v18 = vpop.f32.mrb[98].mxu1  ;;  %v5477_v27 = vld [vmem:[%s6005_s8 + $0x100] sm:$0xff] }
 0x633   : > { %v4798_v48 = vpop.f32.mrb[99].mxu1 }
 0x634   : > { %4127 = vst [vmem:[%s7162_s23 + $0xa8] sm:$0xff] %v4095_v50  ;;  %v4004_v60 = vadd.f32 %v4796_v5, %v7155_v43  ;;  %v4799_v33 = vadd.f32 %v4798_v48, %v4797_v18  ;;  %v5478_v48 = vld [vmem:[%s6005_s8 + $0x108] sm:$0xff]  ;;  %s5725_s8 = smov [#allocation11]  }
 0x635   : > { %s5625_s4 = sshll.u32 %s5725_s8, 4  ;;  %s5626_s4 = int_to_ptr.vmem [resolvable:$false] %s5625_s4 }
 0x636   : > { %v4064_v40 = vadd.f32 %v5469_v37, %v4004_v60  ;;  %v4007_v54 = vadd.f32 %v4799_v33, %v7155_v43  ;;  %s5627_s15 = scalar_lea.vmem %s5626_s4, 8192  ;;  %p5628_p8 = scmp.lt.s32.totalorder %s7261_s9, %s5626_s4 }
 0x637   : > { %p5629_p12 = scmp.lt.s32.totalorder %s5627_s15, %s5621_s25 }
 0x638   : > { %v4096_v53 = vmax.f32 %v4064_v40, 0.0  ;;  %v4065_v11 = vadd.f32 %v5470_v15, %v4007_v54  ;;  %v4800_v59 = vpop.f32.mrb[100].mxu1 }
 0x639   : > { %v4801_v32 = vpop.f32.mrb[101].mxu1  ;;  %p5630_p0 = por %p5629_p12, %p5628_p8 }
 0x63a   : > { %4128 = vst [vmem:[%s7162_s23 + $0xb0] sm:$0xff] %v4096_v53  ;;  %v4097_v1 = vmax.f32 %v4065_v11, 0.0  ;;  %v4802_v19 = vadd.f32 %v4801_v32, %v4800_v59  ;;  %v4803_v22 = vpop.f32.mrb[102].mxu1 }
 0x63b   : > { %v4804_v17 = vpop.f32.mrb[103].mxu1  ;;  %p5631_p5 = pnand %p5630_p0, %p5624_p6 }
 0x63c   : > { %4129 = vst [vmem:[%s7162_s23 + $0xb8] sm:$0xff] %v4097_v1  ;;  %v4012_v16 = vadd.f32 %v4802_v19, %v7155_v43  ;;  %v4805_v2 = vadd.f32 %v4804_v17, %v4803_v22 }
 0x63e   : > { %v4066_v61 = vadd.f32 %v5471_v13, %v4012_v16  ;;  %v4015_v20 = vadd.f32 %v4805_v2, %v7155_v43 }
 0x640   : > { %v4098_v26 = vmax.f32 %v4066_v61, 0.0  ;;  %v4067_v44 = vadd.f32 %v5472_v35, %v4015_v20  ;;  %v4806_v28 = vpop.f32.mrb[104].mxu1 }
 0x641   : > { %v4807_v52 = vpop.f32.mrb[105].mxu1 }
 0x642   : > { %4130 = vst [vmem:[%s7162_s23 + $0xc0] sm:$0xff] %v4098_v26  ;;  %v4099_v63 = vmax.f32 %v4067_v44, 0.0  ;;  %v4808_v41 = vadd.f32 %v4807_v52, %v4806_v28  ;;  %v4809_v12 = vpop.f32.mrb[106].mxu1 }
 0x643   : > { %v4810_v39 = vpop.f32.mrb[107].mxu1 }
 0x644   : > { %4131 = vst [vmem:[%s7162_s23 + $0xc8] sm:$0xff] %v4099_v63  ;;  %v4020_v46 = vadd.f32 %v4808_v41, %v7155_v43  ;;  %v4811_v62 = vadd.f32 %v4810_v39, %v4809_v12 }
 0x646   : > { %v4068_v49 = vadd.f32 %v5473_v51, %v4020_v46  ;;  %v4023_v57 = vadd.f32 %v4811_v62, %v7155_v43 }
 0x648   : > { %v4100_v14 = vmax.f32 %v4068_v49, 0.0  ;;  %v4069_v47 = vadd.f32 %v5474_v58, %v4023_v57  ;;  %v4812_v10 = vpop.f32.mrb[108].mxu1 }
 0x649   : > { %v4813_v0 = vpop.f32.mrb[109].mxu1 }
 0x64a   : > { %4132 = vst [vmem:[%s7162_s23 + $0xd0] sm:$0xff] %v4100_v14  ;;  %v4101_v21 = vmax.f32 %v4069_v47, 0.0  ;;  %v4814_v38 = vadd.f32 %v4813_v0, %v4812_v10  ;;  %v4815_v42 = vpop.f32.mrb[110].mxu1 }
 0x64b   : > { %v4816_v7 = vpop.f32.mrb[111].mxu1 }
 0x64c   : > { %4133 = vst [vmem:[%s7162_s23 + $0xd8] sm:$0xff] %v4101_v21  ;;  %v4028_v55 = vadd.f32 %v4814_v38, %v7155_v43  ;;  %v4817_v34 = vadd.f32 %v4816_v7, %v4815_v42 }
 0x64e   : > { %v4070_v6 = vadd.f32 %v5475_v9, %v4028_v55  ;;  %v4031_v24 = vadd.f32 %v4817_v34, %v7155_v43 }
 0x650   : > { %v4102_v25 = vmax.f32 %v4070_v6, 0.0  ;;  %v4071_v56 = vadd.f32 %v5476_v30, %v4031_v24  ;;  %v4818_v3 = vpop.f32.mrb[112].mxu1 }
 0x651   : > { %v4819_v36 = vpop.f32.mrb[113].mxu1 }
 0x652   : > { %4134 = vst [vmem:[%s7162_s23 + $0xe0] sm:$0xff] %v4102_v25  ;;  %v4103_v31 = vmax.f32 %v4071_v56, 0.0  ;;  %v4820_v4 = vadd.f32 %v4819_v36, %v4818_v3  ;;  %v4821_v8 = vpop.f32.mrb[114].mxu1 }
 0x653   : > { %v4822_v29 = vpop.f32.mrb[115].mxu1 }
 0x654   : > { %4135 = vst [vmem:[%s7162_s23 + $0xe8] sm:$0xff] %v4103_v31  ;;  %v4036_v23 = vadd.f32 %v4820_v4, %v7155_v43  ;;  %v4823_v45 = vadd.f32 %v4822_v29, %v4821_v8 }
 0x656   : > { %v4072_v50 = vadd.f32 %v5477_v27, %v4036_v23  ;;  %v4039_v5 = vadd.f32 %v4823_v45, %v7155_v43 }
 0x658   : > { %v4104_v18 = vmax.f32 %v4072_v50, 0.0  ;;  %v4073_v60 = vadd.f32 %v5478_v48, %v4039_v5 }
 0x65a   : > { %4136 = vst [vmem:[%s7162_s23 + $0xf0] sm:$0xff] %v4104_v18  ;;  %v4105_v33 = vmax.f32 %v4073_v60, 0.0 }
 0x65c   : > { %4137 = vst [vmem:[%s7162_s23 + $0xf8] sm:$0xff] %v4105_v33 }
 0x65d   : > { %5634 = shalt.err (!%p5631_p5)
}
 0x65e   : > { %s5635_s29 = scalar_lea.hbm %s7259_s28, 4096  ;;  %s5639_s18 = scalar_lea.hbm %s7612_s21, 8192 }
 0x65f   : > { %p5636_p9 = scmp.ne.s32.totalorder %s7259_s28, %s5635_s29  ;;  %p5640_p3 = scmp.lt.u32.totalorder %s7259_s28, %s7612_s21 }
 0x660   : > { %p5641_p7 = scmp.lt.u32.totalorder %s5639_s18, %s5635_s29  ;;  %p5643_p2 = scmp.lt.u32.totalorder %s5635_s29, %s7259_s28 }
 0x661   : > { %p5637_p13 = pnand %p5636_p9, %p5945_p10 }
 0x662   : > { %p5642_p11 = por %p5641_p7, %p5640_p3 }
 0x663   : > { %p5638_p1 = pneg %p5637_p13 }
 0x664   : > { %p5644_p4 = por %p5643_p2, %p5642_p11 }
 0x666   : > { %p5645_p6 = pnand %p5644_p4, %p5638_p1 }
 0x668   : > { %5648 = shalt.err (!%p5645_p6)
}
 0x669   : > { %s5726_s24 = smov 128   ;;  %s5727_s17 = smov 8  }
 0x66a   : > { %5265 = dma.vmem_to_hbm [thread:$0]  (%p5945_p10), %s7261_s9, 4096, %s7259_s28, %s4139_s12, %s5726_s24, %s5726_s24, %s5727_s17  }
 0x66b PF: > { %s7613_s19 = sld [smem:[#allocation16_spill]]  ;;  %s7614_s25 = sld [smem:[#allocation18_spill]] }
 0x66c   : > { %p7616_p12 = scmp.ge.s32.totalorder %s5711_s14, 2 }
 0x671   : > { %s4169_s8 = sand.u32 1, %s7613_s19   ;;  %p7615_p8 = scmp.ne.s32.totalorder %s7614_s25, 0 }
 0x672   : > { %s4170_s4 = scalar_lea.sflag [#allocation4], %s4169_s8 }
 0x673   : > { %p5285_p0 = pnand %p7616_p12, %p7615_p8 }
 0x675   : > { %5686 = dma.done.wait (!%p5285_p0), %s4170_s4, 4096  }
 0x676   : > { %5688 = vsyncadd (!%p5285_p0), %s4170_s4, 4294963200  ;;  %s27_s14 = sadd.s32 1, %s5711_s14   ;;  %s7617_s15 = smov %s5957_s30 }
 0x677   : > { %p24_p5 = scmp.ge.s32.totalorder %s27_s14, 4   ;;  %s7618_s30 = smov %s5695_s10 }
 0x678   : > { %s7619_s10 = smov %s5699_s11  ;;  %s7620_s11 = smov %s7617_s15 }
 0x679   : > { %s7621_s12 = smov %s5707_s13  ;;  %s7622_s13 = smov %s7624_s22 }
 0x67a   :  { %26 = sbr.rel (!%p24_p5) target bundleno = 13 (0xd), region = 122 }
 0x681   :  { %4175 = vsyncpa [#allocation3], 1 }
 0x682   :  { %4177 = vsyncpa [#allocation3 + $0x1], 1 }
 0x683   :  { %4178 = vsyncpa [#allocation6], 1 }
 0x684   :  { %4179 = vsyncpa [#allocation9], 1 }
 0x685   :  { %4180 = vsyncpa [#allocation4], 1 }
 0x686   :  { %4182 = vsyncpa [#allocation4 + $0x1], 1 }

</bundles_post_ra>
